<compile_context>
chip_gen: v7x
topology: tpu7x:2x2x1
jax: 0.10.0
libtpu: 0.0.40
codegen_flags: <defaults>
</compile_context>

<pallas_src>
import functools

import jax
import jax.numpy as jnp
from jax.experimental import pallas as pl
from jax.experimental.pallas import tpu as pltpu


def _silu(x):
    # sigmoid(x) = 0.5 * (tanh(x/2) + 1): tanh runs on the EUP (otherwise-idle slot),
    # avoiding an explicit f32 divide on the VALU.
    return x * (0.5 * jnp.tanh(0.5 * x) + 0.5)


def repncsp_bottleneck_kernel(
    xp_ref,    # (1, H+2, W+2, Cin)  spatially pre-padded input block (one image), NHWC
    w1_ref,    # (9, Cin, Cn)        RepConv 3x3 weight (1x1 branch + BN folded), tap-major
    b1_ref,    # (1, Cn)
    w3_ref,    # (9, Cn, Cout)       second 3x3 conv weight (BN folded)
    b3_ref,    # (1, Cout)
    o_ref,     # (1, H, W, Cout)
    tpad_ref,  # scratch (H+2, W+2, Cn): padded conv1 activation (halo for conv2)
    *,
    residual: bool,
    matmul_dtype,
):
    _, Hp, Wp, Cin = xp_ref.shape
    H, W = Hp - 2, Wp - 2
    Cn = w1_ref.shape[2]
    Cout = w3_ref.shape[2]

    xp = xp_ref[...].reshape(Hp, Wp, Cin)
    w1 = w1_ref[...]
    w3 = w3_ref[...]

    # ---- RepConv (3x3 conv, 1x1 + BN pre-folded) + SiLU: 9 shifted-window matmuls ----
    acc = jnp.zeros((H * W, Cn), jnp.float32)
    for ky in range(3):
        for kx in range(3):
            patch = xp[ky:ky + H, kx:kx + W, :].reshape(H * W, Cin)
            acc = acc + jnp.dot(
                patch.astype(matmul_dtype),
                w1[ky * 3 + kx].astype(matmul_dtype),
                preferred_element_type=jnp.float32,
            )
    t = _silu(acc + b1_ref[...])                         # (H*W, Cn), f32

    # ---- Conv2dModule: 3x3 conv + BN (folded) + SiLU ----
    # Zero only the 1-pixel halo ring of the scratch (it persists across grid steps,
    # so re-zero every step), then write the interior once.
    tpad_ref[0:1, :, :] = jnp.zeros((1, Wp, Cn), jnp.float32)
    tpad_ref[H + 1:H + 2, :, :] = jnp.zeros((1, Wp, Cn), jnp.float32)
    tpad_ref[1:H + 1, 0:1, :] = jnp.zeros((H, 1, Cn), jnp.float32)
    tpad_ref[1:H + 1, W + 1:W + 2, :] = jnp.zeros((H, 1, Cn), jnp.float32)
    tpad_ref[1:H + 1, 1:W + 1, :] = t.reshape(H, W, Cn)

    acc2 = jnp.zeros((H * W, Cout), jnp.float32)
    for ky in range(3):
        for kx in range(3):
            patch = tpad_ref[ky:ky + H, kx:kx + W, :].reshape(H * W, Cn)
            acc2 = acc2 + jnp.dot(
                patch.astype(matmul_dtype),
                w3[ky * 3 + kx].astype(matmul_dtype),
                preferred_element_type=jnp.float32,
            )
    y = _silu(acc2 + b3_ref[...])                        # (H*W, Cout), f32

    if residual:
        # Re-read the input interior at the point of the add, instead of keeping a
        # full-image value live across both conv phases.
        x_int = xp_ref[...].reshape(Hp, Wp, Cin)[1:H + 1, 1:W + 1, :]
        y = y + x_int.reshape(H * W, Cout)               # Cin == Cout when residual

    o_ref[...] = y.reshape(1, H, W, Cout).astype(o_ref.dtype)


def _fold_bn(w_hwio, gamma, beta, mean, var, eps=1e-3):
    """Fold BatchNorm (eval mode, eps=1e-3 as in the module) into a bias-free conv."""
    scale = gamma / jnp.sqrt(var + eps)                   # (Cout,)
    w_f = w_hwio * scale[None, None, None, :]             # (kh, kw, Cin, Cout)
    b_f = beta - mean * scale                             # (Cout,)
    return w_f, b_f


def make_params(key, in_channels, out_channels, expand=1.0):
    neck = int(out_channels * expand)
    ks = jax.random.split(key, 16)

    def conv_w(k, kh, kw, cin, cout):
        return jax.random.normal(k, (kh, kw, cin, cout), jnp.float32) * 0.1

    def bn(k1, k2, k3, k4, c):
        gamma = jax.random.uniform(k1, (c,), jnp.float32, 0.5, 1.5)
        beta = jax.random.normal(k2, (c,), jnp.float32) * 0.1
        mean = jax.random.normal(k3, (c,), jnp.float32) * 0.1
        var = jax.random.uniform(k4, (c,), jnp.float32, 0.5, 1.5)
        return gamma, beta, mean, var

    # RepConv.conv1 : 3x3 + BN
    w1 = conv_w(ks[0], 3, 3, in_channels, neck)
    bn1 = bn(ks[1], ks[2], ks[3], ks[4], neck)
    # RepConv.conv2 : 1x1 + BN
    w2 = conv_w(ks[5], 1, 1, in_channels, neck)
    bn2 = bn(ks[6], ks[7], ks[8], ks[9], neck)
    # Bottleneck.conv2 : 3x3 + BN + SiLU
    w3 = conv_w(ks[10], 3, 3, neck, out_channels)
    bn3 = bn(ks[11], ks[12], ks[13], ks[14], out_channels)

    w1f, b1f = _fold_bn(w1, *bn1)
    w2f, b2f = _fold_bn(w2, *bn2)
    w3f, b3f = _fold_bn(w3, *bn3)
    return dict(w1=w1f, b1=b1f, w2=w2f, b2=b2f, w3=w3f, b3=b3f)


def _prepare_weights(params, matmul_dtype):
    """RepConv re-param (1x1 -> 3x3 center tap) + tap-major (9, Cin, Cout) layout."""
    w1, b1 = params["w1"], params["b1"]            # (3,3,Cin,Cn), (Cn,)
    w2, b2 = params["w2"], params["b2"]            # (1,1,Cin,Cn), (Cn,)
    w3, b3 = params["w3"], params["b3"]            # (3,3,Cn,Cout), (Cout,)
    cin, cn = w1.shape[2], w1.shape[3]
    cout = w3.shape[3]

    # Standard RepConv reparameterization: fold the 1x1 branch into the center tap.
    w1 = w1.at[1, 1].add(w2[0, 0])
    b1 = b1 + b2

    w1 = w1.reshape(9, cin, cn).astype(matmul_dtype)
    w3 = w3.reshape(9, cn, cout).astype(matmul_dtype)
    return w1, b1.reshape(1, cn), w3, b3.reshape(1, cout)


@functools.partial(jax.jit, static_argnames=("residual", "matmul_dtype"))
def repncsp_bottleneck(x_nchw, params, *, residual=True, matmul_dtype=jnp.float32):
    """Pallas forward. x_nchw: (B, Cin, H, W) float32 -> (B, Cout, H, W)."""
    B, Cin, H, W = x_nchw.shape
    Cn = params["w1"].shape[-1]
    Cout = params["w3"].shape[-1]
    residual = bool(residual and (Cin == Cout))

    # NCHW -> NHWC + 1-pixel spatial zero pad in plain XLA (keeps all kernel-side VMEM
    # writes of the input aligned; halo bytes are negligible extra DMA).
    # TODO(synk): accept NHWC at the API boundary to drop both wrapper transposes.
    x = jnp.transpose(x_nchw, (0, 2, 3, 1)).astype(jnp.float32)
    xp = jnp.pad(x, ((0, 0), (1, 1), (1, 1), (0, 0)))

    w1, b1, w3, b3 = _prepare_weights(params, matmul_dtype)

    out_nhwc = pl.pallas_call(
        functools.partial(
            repncsp_bottleneck_kernel, residual=residual, matmul_dtype=matmul_dtype
        ),
        out_shape=jax.ShapeDtypeStruct((B, H, W, Cout), jnp.float32),
        grid=(B,),
        in_specs=[
            pl.BlockSpec((1, H + 2, W + 2, Cin), lambda b: (b, 0, 0, 0)),
            pl.BlockSpec((9, Cin, Cn), lambda b: (0, 0, 0)),
            pl.BlockSpec((1, Cn), lambda b: (0, 0)),
            pl.BlockSpec((9, Cn, Cout), lambda b: (0, 0, 0)),
            pl.BlockSpec((1, Cout), lambda b: (0, 0)),
        ],
        out_specs=pl.BlockSpec((1, H, W, Cout), lambda b: (b, 0, 0, 0)),
        scratch_shapes=[
            pltpu.VMEM((H + 2, W + 2, Cn), jnp.float32),
        ],
        compiler_params=pltpu.CompilerParams(
            dimension_semantics=("parallel",)),
    )(xp, w1, b1, w3, b3)

    return jnp.transpose(out_nhwc, (0, 3, 1, 2))


def _reference(x_nchw, params, *, residual=True):
    """Pure-JAX reference (unfused convs), matches the PyTorch forward semantics."""
    x = jnp.transpose(x_nchw, (0, 2, 3, 1)).astype(jnp.float32)

    def conv(inp, w, b, pad):
        y = jax.lax.conv_general_dilated(
            inp, w, window_strides=(1, 1),
            padding=[(pad, pad), (pad, pad)],
            dimension_numbers=("NHWC", "HWIO", "NHWC"))
        return y + b

    t = _silu(conv(x, params["w1"], params["b1"], 1)
              + conv(x, params["w2"], params["b2"], 0))
    y = _silu(conv(t, params["w3"], params["b3"], 1))
    Cin, Cout = x.shape[-1], params["w3"].shape[-1]
    if residual and Cin == Cout:
        y = y + x
    return jnp.transpose(y, (0, 3, 1, 2))


if __name__ == "__main__":
    key = jax.random.PRNGKey(0)
    k_x, k_p = jax.random.split(key)

    B, C, H, W = 2, 4, 16, 16          # in_channels == out_channels -> residual active
    x = jax.random.normal(k_x, (B, C, H, W), jnp.float32)
    params = make_params(k_p, in_channels=C, out_channels=C, expand=1.0)

    out = jax.block_until_ready(repncsp_bottleneck(x, params, residual=True))
    ref = jax.block_until_ready(_reference(x, params, residual=True))

    assert out.shape == (B, C, H, W), out.shape
    max_err = float(jnp.max(jnp.abs(out - ref)))
    assert max_err < 1e-3, f"max abs error {max_err}"
    print("KERNEL_OK")
</pallas_src>

<mosaic_0001>
module attributes {stable_mosaic.version = 11 : i64} {
  func.func @repncsp_bottleneck_kernel(%arg0: i32, %arg1: memref<1x18x18x4xf32, #tpu.memory_space<vmem>>, %arg2: memref<9x4x4xf32, #tpu.memory_space<vmem>>, %arg3: memref<1x4xf32, #tpu.memory_space<vmem>>, %arg4: memref<9x4x4xf32, #tpu.memory_space<vmem>>, %arg5: memref<1x4xf32, #tpu.memory_space<vmem>>, %arg6: memref<1x16x16x4xf32, #tpu.memory_space<vmem>>, %arg7: memref<18x18x4xf32, #tpu.memory_space<vmem>>) attributes {dimension_semantics = [#tpu.dimension_semantics<parallel>], iteration_bounds = array<i64: 2>, scalar_prefetch = 0 : i64, scratch_operands = 1 : i64, tpu.core_type = #tpu.core_type<tc>, window_params = [{transform_indices = @transform_0, window_bounds = array<i64: 1, 18, 18, 4>}, {pipeline_mode = #tpu.pipeline_mode<synchronous>, transform_indices = @transform_1, window_bounds = array<i64: 9, 4, 4>}, {pipeline_mode = #tpu.pipeline_mode<synchronous>, transform_indices = @transform_2, window_bounds = array<i64: 1, 4>}, {pipeline_mode = #tpu.pipeline_mode<synchronous>, transform_indices = @transform_3, window_bounds = array<i64: 9, 4, 4>}, {pipeline_mode = #tpu.pipeline_mode<synchronous>, transform_indices = @transform_4, window_bounds = array<i64: 1, 4>}, {transform_indices = @transform_5, window_bounds = array<i64: 1, 16, 16, 4>}]} {
    %c0 = arith.constant 0 : index
    %c0_0 = arith.constant 0 : index
    %c0_1 = arith.constant 0 : index
    %c0_2 = arith.constant 0 : index
    %0 = vector.load %arg1[%c0, %c0_0, %c0_1, %c0_2] : memref<1x18x18x4xf32, #tpu.memory_space<vmem>>, vector<1x18x18x4xf32>
    %1 = vector.shape_cast %0 : vector<1x18x18x4xf32> to vector<18x18x4xf32>
    %c0_3 = arith.constant 0 : index
    %c0_4 = arith.constant 0 : index
    %c0_5 = arith.constant 0 : index
    %2 = vector.load %arg2[%c0_3, %c0_4, %c0_5] : memref<9x4x4xf32, #tpu.memory_space<vmem>>, vector<9x4x4xf32>
    %c0_6 = arith.constant 0 : index
    %c0_7 = arith.constant 0 : index
    %c0_8 = arith.constant 0 : index
    %3 = vector.load %arg4[%c0_6, %c0_7, %c0_8] : memref<9x4x4xf32, #tpu.memory_space<vmem>>, vector<9x4x4xf32>
    %cst = arith.constant 0.000000e+00 : f32
    %4 = vector.broadcast %cst : f32 to vector<256x4xf32>
    %5 = vector.extract_strided_slice %1 {offsets = [0, 0, 0], sizes = [16, 16, 4], strides = [1, 1, 1]} : vector<18x18x4xf32> to vector<16x16x4xf32>
    %6 = vector.shape_cast %5 : vector<16x16x4xf32> to vector<256x4xf32>
    %7 = vector.extract_strided_slice %2 {offsets = [0, 0, 0], sizes = [1, 4, 4], strides = [1, 1, 1]} : vector<9x4x4xf32> to vector<1x4x4xf32>
    %8 = vector.shape_cast %7 : vector<1x4x4xf32> to vector<4x4xf32>
    %cst_9 = arith.constant dense<0.000000e+00> : vector<256x4xf32>
    %9 = tpu.matmul %6, %8, %cst_9 {dimension_numbers = #tpu.dot_dimension_numbers<[1], [0], [0], [1], [0, 0, 1, 1], [], []>} : vector<256x4xf32>, vector<4x4xf32>, vector<256x4xf32> -> vector<256x4xf32>
    %10 = arith.addf %4, %9 : vector<256x4xf32>
    %11 = vector.extract_strided_slice %1 {offsets = [0, 1, 0], sizes = [16, 16, 4], strides = [1, 1, 1]} : vector<18x18x4xf32> to vector<16x16x4xf32>
    %12 = vector.shape_cast %11 : vector<16x16x4xf32> to vector<256x4xf32>
    %13 = vector.extract_strided_slice %2 {offsets = [1, 0, 0], sizes = [1, 4, 4], strides = [1, 1, 1]} : vector<9x4x4xf32> to vector<1x4x4xf32>
    %14 = vector.shape_cast %13 : vector<1x4x4xf32> to vector<4x4xf32>
    %cst_10 = arith.constant dense<0.000000e+00> : vector<256x4xf32>
    %15 = tpu.matmul %12, %14, %cst_10 {dimension_numbers = #tpu.dot_dimension_numbers<[1], [0], [0], [1], [0, 0, 1, 1], [], []>} : vector<256x4xf32>, vector<4x4xf32>, vector<256x4xf32> -> vector<256x4xf32>
    %16 = arith.addf %10, %15 : vector<256x4xf32>
    %17 = vector.extract_strided_slice %1 {offsets = [0, 2, 0], sizes = [16, 16, 4], strides = [1, 1, 1]} : vector<18x18x4xf32> to vector<16x16x4xf32>
    %18 = vector.shape_cast %17 : vector<16x16x4xf32> to vector<256x4xf32>
    %19 = vector.extract_strided_slice %2 {offsets = [2, 0, 0], sizes = [1, 4, 4], strides = [1, 1, 1]} : vector<9x4x4xf32> to vector<1x4x4xf32>
    %20 = vector.shape_cast %19 : vector<1x4x4xf32> to vector<4x4xf32>
    %cst_11 = arith.constant dense<0.000000e+00> : vector<256x4xf32>
    %21 = tpu.matmul %18, %20, %cst_11 {dimension_numbers = #tpu.dot_dimension_numbers<[1], [0], [0], [1], [0, 0, 1, 1], [], []>} : vector<256x4xf32>, vector<4x4xf32>, vector<256x4xf32> -> vector<256x4xf32>
    %22 = arith.addf %16, %21 : vector<256x4xf32>
    %23 = vector.extract_strided_slice %1 {offsets = [1, 0, 0], sizes = [16, 16, 4], strides = [1, 1, 1]} : vector<18x18x4xf32> to vector<16x16x4xf32>
    %24 = vector.shape_cast %23 : vector<16x16x4xf32> to vector<256x4xf32>
    %25 = vector.extract_strided_slice %2 {offsets = [3, 0, 0], sizes = [1, 4, 4], strides = [1, 1, 1]} : vector<9x4x4xf32> to vector<1x4x4xf32>
    %26 = vector.shape_cast %25 : vector<1x4x4xf32> to vector<4x4xf32>
    %cst_12 = arith.constant dense<0.000000e+00> : vector<256x4xf32>
    %27 = tpu.matmul %24, %26, %cst_12 {dimension_numbers = #tpu.dot_dimension_numbers<[1], [0], [0], [1], [0, 0, 1, 1], [], []>} : vector<256x4xf32>, vector<4x4xf32>, vector<256x4xf32> -> vector<256x4xf32>
    %28 = arith.addf %22, %27 : vector<256x4xf32>
    %29 = vector.extract_strided_slice %1 {offsets = [1, 1, 0], sizes = [16, 16, 4], strides = [1, 1, 1]} : vector<18x18x4xf32> to vector<16x16x4xf32>
    %30 = vector.shape_cast %29 : vector<16x16x4xf32> to vector<256x4xf32>
    %31 = vector.extract_strided_slice %2 {offsets = [4, 0, 0], sizes = [1, 4, 4], strides = [1, 1, 1]} : vector<9x4x4xf32> to vector<1x4x4xf32>
    %32 = vector.shape_cast %31 : vector<1x4x4xf32> to vector<4x4xf32>
    %cst_13 = arith.constant dense<0.000000e+00> : vector<256x4xf32>
    %33 = tpu.matmul %30, %32, %cst_13 {dimension_numbers = #tpu.dot_dimension_numbers<[1], [0], [0], [1], [0, 0, 1, 1], [], []>} : vector<256x4xf32>, vector<4x4xf32>, vector<256x4xf32> -> vector<256x4xf32>
    %34 = arith.addf %28, %33 : vector<256x4xf32>
    %35 = vector.extract_strided_slice %1 {offsets = [1, 2, 0], sizes = [16, 16, 4], strides = [1, 1, 1]} : vector<18x18x4xf32> to vector<16x16x4xf32>
    %36 = vector.shape_cast %35 : vector<16x16x4xf32> to vector<256x4xf32>
    %37 = vector.extract_strided_slice %2 {offsets = [5, 0, 0], sizes = [1, 4, 4], strides = [1, 1, 1]} : vector<9x4x4xf32> to vector<1x4x4xf32>
    %38 = vector.shape_cast %37 : vector<1x4x4xf32> to vector<4x4xf32>
    %cst_14 = arith.constant dense<0.000000e+00> : vector<256x4xf32>
    %39 = tpu.matmul %36, %38, %cst_14 {dimension_numbers = #tpu.dot_dimension_numbers<[1], [0], [0], [1], [0, 0, 1, 1], [], []>} : vector<256x4xf32>, vector<4x4xf32>, vector<256x4xf32> -> vector<256x4xf32>
    %40 = arith.addf %34, %39 : vector<256x4xf32>
    %41 = vector.extract_strided_slice %1 {offsets = [2, 0, 0], sizes = [16, 16, 4], strides = [1, 1, 1]} : vector<18x18x4xf32> to vector<16x16x4xf32>
    %42 = vector.shape_cast %41 : vector<16x16x4xf32> to vector<256x4xf32>
    %43 = vector.extract_strided_slice %2 {offsets = [6, 0, 0], sizes = [1, 4, 4], strides = [1, 1, 1]} : vector<9x4x4xf32> to vector<1x4x4xf32>
    %44 = vector.shape_cast %43 : vector<1x4x4xf32> to vector<4x4xf32>
    %cst_15 = arith.constant dense<0.000000e+00> : vector<256x4xf32>
    %45 = tpu.matmul %42, %44, %cst_15 {dimension_numbers = #tpu.dot_dimension_numbers<[1], [0], [0], [1], [0, 0, 1, 1], [], []>} : vector<256x4xf32>, vector<4x4xf32>, vector<256x4xf32> -> vector<256x4xf32>
    %46 = arith.addf %40, %45 : vector<256x4xf32>
    %47 = vector.extract_strided_slice %1 {offsets = [2, 1, 0], sizes = [16, 16, 4], strides = [1, 1, 1]} : vector<18x18x4xf32> to vector<16x16x4xf32>
    %48 = vector.shape_cast %47 : vector<16x16x4xf32> to vector<256x4xf32>
    %49 = vector.extract_strided_slice %2 {offsets = [7, 0, 0], sizes = [1, 4, 4], strides = [1, 1, 1]} : vector<9x4x4xf32> to vector<1x4x4xf32>
    %50 = vector.shape_cast %49 : vector<1x4x4xf32> to vector<4x4xf32>
    %cst_16 = arith.constant dense<0.000000e+00> : vector<256x4xf32>
    %51 = tpu.matmul %48, %50, %cst_16 {dimension_numbers = #tpu.dot_dimension_numbers<[1], [0], [0], [1], [0, 0, 1, 1], [], []>} : vector<256x4xf32>, vector<4x4xf32>, vector<256x4xf32> -> vector<256x4xf32>
    %52 = arith.addf %46, %51 : vector<256x4xf32>
    %53 = vector.extract_strided_slice %1 {offsets = [2, 2, 0], sizes = [16, 16, 4], strides = [1, 1, 1]} : vector<18x18x4xf32> to vector<16x16x4xf32>
    %54 = vector.shape_cast %53 : vector<16x16x4xf32> to vector<256x4xf32>
    %55 = vector.extract_strided_slice %2 {offsets = [8, 0, 0], sizes = [1, 4, 4], strides = [1, 1, 1]} : vector<9x4x4xf32> to vector<1x4x4xf32>
    %56 = vector.shape_cast %55 : vector<1x4x4xf32> to vector<4x4xf32>
    %cst_17 = arith.constant dense<0.000000e+00> : vector<256x4xf32>
    %57 = tpu.matmul %54, %56, %cst_17 {dimension_numbers = #tpu.dot_dimension_numbers<[1], [0], [0], [1], [0, 0, 1, 1], [], []>} : vector<256x4xf32>, vector<4x4xf32>, vector<256x4xf32> -> vector<256x4xf32>
    %58 = arith.addf %52, %57 : vector<256x4xf32>
    %c0_18 = arith.constant 0 : index
    %c0_19 = arith.constant 0 : index
    %59 = vector.load %arg3[%c0_18, %c0_19] : memref<1x4xf32, #tpu.memory_space<vmem>>, vector<1x4xf32>
    %60 = vector.broadcast %59 : vector<1x4xf32> to vector<256x4xf32>
    %61 = arith.addf %58, %60 : vector<256x4xf32>
    %cst_20 = arith.constant 5.000000e-01 : f32
    %62 = vector.broadcast %cst_20 : f32 to vector<256x4xf32>
    %63 = arith.mulf %62, %61 : vector<256x4xf32>
    %64 = math.tanh %63 : vector<256x4xf32>
    %cst_21 = arith.constant 5.000000e-01 : f32
    %65 = vector.broadcast %cst_21 : f32 to vector<256x4xf32>
    %66 = arith.mulf %65, %64 : vector<256x4xf32>
    %cst_22 = arith.constant 5.000000e-01 : f32
    %67 = vector.broadcast %cst_22 : f32 to vector<256x4xf32>
    %68 = arith.addf %66, %67 : vector<256x4xf32>
    %69 = arith.mulf %61, %68 : vector<256x4xf32>
    %cst_23 = arith.constant 0.000000e+00 : f32
    %70 = vector.broadcast %cst_23 : f32 to vector<1x18x4xf32>
    %c0_24 = arith.constant 0 : index
    %c0_25 = arith.constant 0 : index
    %c0_26 = arith.constant 0 : index
    %71 = vector.load %arg7[%c0_24, %c0_25, %c0_26] : memref<18x18x4xf32, #tpu.memory_space<vmem>>, vector<1x18x4xf32>
    tpu.vector_store %arg7[%c0_24, %c0_25, %c0_26], %70 {strides = array<i32>} : memref<18x18x4xf32, #tpu.memory_space<vmem>>, vector<1x18x4xf32>,
    %cst_27 = arith.constant 0.000000e+00 : f32
    %72 = vector.broadcast %cst_27 : f32 to vector<1x18x4xf32>
    %c17 = arith.constant 17 : index
    %c0_28 = arith.constant 0 : index
    %c0_29 = arith.constant 0 : index
    %73 = vector.load %arg7[%c17, %c0_28, %c0_29] : memref<18x18x4xf32, #tpu.memory_space<vmem>>, vector<1x18x4xf32>
    tpu.vector_store %arg7[%c17, %c0_28, %c0_29], %72 {strides = array<i32>} : memref<18x18x4xf32, #tpu.memory_space<vmem>>, vector<1x18x4xf32>,
    %cst_30 = arith.constant 0.000000e+00 : f32
    %74 = vector.broadcast %cst_30 : f32 to vector<16x1x4xf32>
    %c1 = arith.constant 1 : index
    %c0_31 = arith.constant 0 : index
    %c0_32 = arith.constant 0 : index
    %75 = vector.load %arg7[%c1, %c0_31, %c0_32] : memref<18x18x4xf32, #tpu.memory_space<vmem>>, vector<16x1x4xf32>
    tpu.vector_store %arg7[%c1, %c0_31, %c0_32], %74 {strides = array<i32>} : memref<18x18x4xf32, #tpu.memory_space<vmem>>, vector<16x1x4xf32>,
    %cst_33 = arith.constant 0.000000e+00 : f32
    %76 = vector.broadcast %cst_33 : f32 to vector<16x1x4xf32>
    %c1_34 = arith.constant 1 : index
    %c17_35 = arith.constant 17 : index
    %c0_36 = arith.constant 0 : index
    %77 = vector.load %arg7[%c1_34, %c17_35, %c0_36] : memref<18x18x4xf32, #tpu.memory_space<vmem>>, vector<16x1x4xf32>
    tpu.vector_store %arg7[%c1_34, %c17_35, %c0_36], %76 {strides = array<i32>} : memref<18x18x4xf32, #tpu.memory_space<vmem>>, vector<16x1x4xf32>,
    %78 = vector.shape_cast %69 : vector<256x4xf32> to vector<16x16x4xf32>
    %c1_37 = arith.constant 1 : index
    %c1_38 = arith.constant 1 : index
    %c0_39 = arith.constant 0 : index
    %79 = vector.load %arg7[%c1_37, %c1_38, %c0_39] : memref<18x18x4xf32, #tpu.memory_space<vmem>>, vector<16x16x4xf32>
    tpu.vector_store %arg7[%c1_37, %c1_38, %c0_39], %78 {strides = array<i32>} : memref<18x18x4xf32, #tpu.memory_space<vmem>>, vector<16x16x4xf32>,
    %cst_40 = arith.constant 0.000000e+00 : f32
    %80 = vector.broadcast %cst_40 : f32 to vector<256x4xf32>
    %c0_41 = arith.constant 0 : index
    %c0_42 = arith.constant 0 : index
    %c0_43 = arith.constant 0 : index
    %81 = vector.load %arg7[%c0_41, %c0_42, %c0_43] : memref<18x18x4xf32, #tpu.memory_space<vmem>>, vector<16x16x4xf32>
    %82 = vector.shape_cast %81 : vector<16x16x4xf32> to vector<256x4xf32>
    %83 = vector.extract_strided_slice %3 {offsets = [0, 0, 0], sizes = [1, 4, 4], strides = [1, 1, 1]} : vector<9x4x4xf32> to vector<1x4x4xf32>
    %84 = vector.shape_cast %83 : vector<1x4x4xf32> to vector<4x4xf32>
    %cst_44 = arith.constant dense<0.000000e+00> : vector<256x4xf32>
    %85 = tpu.matmul %82, %84, %cst_44 {dimension_numbers = #tpu.dot_dimension_numbers<[1], [0], [0], [1], [0, 0, 1, 1], [], []>} : vector<256x4xf32>, vector<4x4xf32>, vector<256x4xf32> -> vector<256x4xf32>
    %86 = arith.addf %80, %85 : vector<256x4xf32>
    %c0_45 = arith.constant 0 : index
    %c1_46 = arith.constant 1 : index
    %c0_47 = arith.constant 0 : index
    %87 = vector.load %arg7[%c0_45, %c1_46, %c0_47] : memref<18x18x4xf32, #tpu.memory_space<vmem>>, vector<16x16x4xf32>
    %88 = vector.shape_cast %87 : vector<16x16x4xf32> to vector<256x4xf32>
    %89 = vector.extract_strided_slice %3 {offsets = [1, 0, 0], sizes = [1, 4, 4], strides = [1, 1, 1]} : vector<9x4x4xf32> to vector<1x4x4xf32>
    %90 = vector.shape_cast %89 : vector<1x4x4xf32> to vector<4x4xf32>
    %cst_48 = arith.constant dense<0.000000e+00> : vector<256x4xf32>
    %91 = tpu.matmul %88, %90, %cst_48 {dimension_numbers = #tpu.dot_dimension_numbers<[1], [0], [0], [1], [0, 0, 1, 1], [], []>} : vector<256x4xf32>, vector<4x4xf32>, vector<256x4xf32> -> vector<256x4xf32>
    %92 = arith.addf %86, %91 : vector<256x4xf32>
    %c0_49 = arith.constant 0 : index
    %c2 = arith.constant 2 : index
    %c0_50 = arith.constant 0 : index
    %93 = vector.load %arg7[%c0_49, %c2, %c0_50] : memref<18x18x4xf32, #tpu.memory_space<vmem>>, vector<16x16x4xf32>
    %94 = vector.shape_cast %93 : vector<16x16x4xf32> to vector<256x4xf32>
    %95 = vector.extract_strided_slice %3 {offsets = [2, 0, 0], sizes = [1, 4, 4], strides = [1, 1, 1]} : vector<9x4x4xf32> to vector<1x4x4xf32>
    %96 = vector.shape_cast %95 : vector<1x4x4xf32> to vector<4x4xf32>
    %cst_51 = arith.constant dense<0.000000e+00> : vector<256x4xf32>
    %97 = tpu.matmul %94, %96, %cst_51 {dimension_numbers = #tpu.dot_dimension_numbers<[1], [0], [0], [1], [0, 0, 1, 1], [], []>} : vector<256x4xf32>, vector<4x4xf32>, vector<256x4xf32> -> vector<256x4xf32>
    %98 = arith.addf %92, %97 : vector<256x4xf32>
    %c1_52 = arith.constant 1 : index
    %c0_53 = arith.constant 0 : index
    %c0_54 = arith.constant 0 : index
    %99 = vector.load %arg7[%c1_52, %c0_53, %c0_54] : memref<18x18x4xf32, #tpu.memory_space<vmem>>, vector<16x16x4xf32>
    %100 = vector.shape_cast %99 : vector<16x16x4xf32> to vector<256x4xf32>
    %101 = vector.extract_strided_slice %3 {offsets = [3, 0, 0], sizes = [1, 4, 4], strides = [1, 1, 1]} : vector<9x4x4xf32> to vector<1x4x4xf32>
    %102 = vector.shape_cast %101 : vector<1x4x4xf32> to vector<4x4xf32>
    %cst_55 = arith.constant dense<0.000000e+00> : vector<256x4xf32>
    %103 = tpu.matmul %100, %102, %cst_55 {dimension_numbers = #tpu.dot_dimension_numbers<[1], [0], [0], [1], [0, 0, 1, 1], [], []>} : vector<256x4xf32>, vector<4x4xf32>, vector<256x4xf32> -> vector<256x4xf32>
    %104 = arith.addf %98, %103 : vector<256x4xf32>
    %c1_56 = arith.constant 1 : index
    %c1_57 = arith.constant 1 : index
    %c0_58 = arith.constant 0 : index
    %105 = vector.load %arg7[%c1_56, %c1_57, %c0_58] : memref<18x18x4xf32, #tpu.memory_space<vmem>>, vector<16x16x4xf32>
    %106 = vector.shape_cast %105 : vector<16x16x4xf32> to vector<256x4xf32>
    %107 = vector.extract_strided_slice %3 {offsets = [4, 0, 0], sizes = [1, 4, 4], strides = [1, 1, 1]} : vector<9x4x4xf32> to vector<1x4x4xf32>
    %108 = vector.shape_cast %107 : vector<1x4x4xf32> to vector<4x4xf32>
    %cst_59 = arith.constant dense<0.000000e+00> : vector<256x4xf32>
    %109 = tpu.matmul %106, %108, %cst_59 {dimension_numbers = #tpu.dot_dimension_numbers<[1], [0], [0], [1], [0, 0, 1, 1], [], []>} : vector<256x4xf32>, vector<4x4xf32>, vector<256x4xf32> -> vector<256x4xf32>
    %110 = arith.addf %104, %109 : vector<256x4xf32>
    %c1_60 = arith.constant 1 : index
    %c2_61 = arith.constant 2 : index
    %c0_62 = arith.constant 0 : index
    %111 = vector.load %arg7[%c1_60, %c2_61, %c0_62] : memref<18x18x4xf32, #tpu.memory_space<vmem>>, vector<16x16x4xf32>
    %112 = vector.shape_cast %111 : vector<16x16x4xf32> to vector<256x4xf32>
    %113 = vector.extract_strided_slice %3 {offsets = [5, 0, 0], sizes = [1, 4, 4], strides = [1, 1, 1]} : vector<9x4x4xf32> to vector<1x4x4xf32>
    %114 = vector.shape_cast %113 : vector<1x4x4xf32> to vector<4x4xf32>
    %cst_63 = arith.constant dense<0.000000e+00> : vector<256x4xf32>
    %115 = tpu.matmul %112, %114, %cst_63 {dimension_numbers = #tpu.dot_dimension_numbers<[1], [0], [0], [1], [0, 0, 1, 1], [], []>} : vector<256x4xf32>, vector<4x4xf32>, vector<256x4xf32> -> vector<256x4xf32>
    %116 = arith.addf %110, %115 : vector<256x4xf32>
    %c2_64 = arith.constant 2 : index
    %c0_65 = arith.constant 0 : index
    %c0_66 = arith.constant 0 : index
    %117 = vector.load %arg7[%c2_64, %c0_65, %c0_66] : memref<18x18x4xf32, #tpu.memory_space<vmem>>, vector<16x16x4xf32>
    %118 = vector.shape_cast %117 : vector<16x16x4xf32> to vector<256x4xf32>
    %119 = vector.extract_strided_slice %3 {offsets = [6, 0, 0], sizes = [1, 4, 4], strides = [1, 1, 1]} : vector<9x4x4xf32> to vector<1x4x4xf32>
    %120 = vector.shape_cast %119 : vector<1x4x4xf32> to vector<4x4xf32>
    %cst_67 = arith.constant dense<0.000000e+00> : vector<256x4xf32>
    %121 = tpu.matmul %118, %120, %cst_67 {dimension_numbers = #tpu.dot_dimension_numbers<[1], [0], [0], [1], [0, 0, 1, 1], [], []>} : vector<256x4xf32>, vector<4x4xf32>, vector<256x4xf32> -> vector<256x4xf32>
    %122 = arith.addf %116, %121 : vector<256x4xf32>
    %c2_68 = arith.constant 2 : index
    %c1_69 = arith.constant 1 : index
    %c0_70 = arith.constant 0 : index
    %123 = vector.load %arg7[%c2_68, %c1_69, %c0_70] : memref<18x18x4xf32, #tpu.memory_space<vmem>>, vector<16x16x4xf32>
    %124 = vector.shape_cast %123 : vector<16x16x4xf32> to vector<256x4xf32>
    %125 = vector.extract_strided_slice %3 {offsets = [7, 0, 0], sizes = [1, 4, 4], strides = [1, 1, 1]} : vector<9x4x4xf32> to vector<1x4x4xf32>
    %126 = vector.shape_cast %125 : vector<1x4x4xf32> to vector<4x4xf32>
    %cst_71 = arith.constant dense<0.000000e+00> : vector<256x4xf32>
    %127 = tpu.matmul %124, %126, %cst_71 {dimension_numbers = #tpu.dot_dimension_numbers<[1], [0], [0], [1], [0, 0, 1, 1], [], []>} : vector<256x4xf32>, vector<4x4xf32>, vector<256x4xf32> -> vector<256x4xf32>
    %128 = arith.addf %122, %127 : vector<256x4xf32>
    %c2_72 = arith.constant 2 : index
    %c2_73 = arith.constant 2 : index
    %c0_74 = arith.constant 0 : index
    %129 = vector.load %arg7[%c2_72, %c2_73, %c0_74] : memref<18x18x4xf32, #tpu.memory_space<vmem>>, vector<16x16x4xf32>
    %130 = vector.shape_cast %129 : vector<16x16x4xf32> to vector<256x4xf32>
    %131 = vector.extract_strided_slice %3 {offsets = [8, 0, 0], sizes = [1, 4, 4], strides = [1, 1, 1]} : vector<9x4x4xf32> to vector<1x4x4xf32>
    %132 = vector.shape_cast %131 : vector<1x4x4xf32> to vector<4x4xf32>
    %cst_75 = arith.constant dense<0.000000e+00> : vector<256x4xf32>
    %133 = tpu.matmul %130, %132, %cst_75 {dimension_numbers = #tpu.dot_dimension_numbers<[1], [0], [0], [1], [0, 0, 1, 1], [], []>} : vector<256x4xf32>, vector<4x4xf32>, vector<256x4xf32> -> vector<256x4xf32>
    %134 = arith.addf %128, %133 : vector<256x4xf32>
    %c0_76 = arith.constant 0 : index
    %c0_77 = arith.constant 0 : index
    %135 = vector.load %arg5[%c0_76, %c0_77] : memref<1x4xf32, #tpu.memory_space<vmem>>, vector<1x4xf32>
    %136 = vector.broadcast %135 : vector<1x4xf32> to vector<256x4xf32>
    %137 = arith.addf %134, %136 : vector<256x4xf32>
    %cst_78 = arith.constant 5.000000e-01 : f32
    %138 = vector.broadcast %cst_78 : f32 to vector<256x4xf32>
    %139 = arith.mulf %138, %137 : vector<256x4xf32>
    %140 = math.tanh %139 : vector<256x4xf32>
    %cst_79 = arith.constant 5.000000e-01 : f32
    %141 = vector.broadcast %cst_79 : f32 to vector<256x4xf32>
    %142 = arith.mulf %141, %140 : vector<256x4xf32>
    %cst_80 = arith.constant 5.000000e-01 : f32
    %143 = vector.broadcast %cst_80 : f32 to vector<256x4xf32>
    %144 = arith.addf %142, %143 : vector<256x4xf32>
    %145 = arith.mulf %137, %144 : vector<256x4xf32>
    %c0_81 = arith.constant 0 : index
    %c0_82 = arith.constant 0 : index
    %c0_83 = arith.constant 0 : index
    %c0_84 = arith.constant 0 : index
    %146 = vector.load %arg1[%c0_81, %c0_82, %c0_83, %c0_84] : memref<1x18x18x4xf32, #tpu.memory_space<vmem>>, vector<1x18x18x4xf32>
    %147 = vector.shape_cast %146 : vector<1x18x18x4xf32> to vector<18x18x4xf32>
    %148 = vector.extract_strided_slice %147 {offsets = [1, 1, 0], sizes = [16, 16, 4], strides = [1, 1, 1]} : vector<18x18x4xf32> to vector<16x16x4xf32>
    %149 = vector.shape_cast %148 : vector<16x16x4xf32> to vector<256x4xf32>
    %150 = arith.addf %145, %149 : vector<256x4xf32>
    %151 = vector.shape_cast %150 : vector<256x4xf32> to vector<1x16x16x4xf32>
    %c0_85 = arith.constant 0 : index
    %c0_86 = arith.constant 0 : index
    %c0_87 = arith.constant 0 : index
    %c0_88 = arith.constant 0 : index
    %152 = vector.load %arg6[%c0_85, %c0_86, %c0_87, %c0_88] : memref<1x16x16x4xf32, #tpu.memory_space<vmem>>, vector<1x16x16x4xf32>
    tpu.vector_store %arg6[%c0_85, %c0_86, %c0_87, %c0_88], %151 {strides = array<i32>} : memref<1x16x16x4xf32, #tpu.memory_space<vmem>>, vector<1x16x16x4xf32>,
    return
  }
  func.func @transform_0(%arg0: i32) -> (i32, i32, i32, i32) {
    %c0_i32 = arith.constant 0 : i32
    %c0_i32_0 = arith.constant 0 : i32
    %c0_i32_1 = arith.constant 0 : i32
    %c0_i32_2 = arith.constant 0 : i32
    return %arg0, %c0_i32, %c0_i32_0, %c0_i32_1 : i32, i32, i32, i32
  }
  func.func @transform_1(%arg0: i32) -> (i32, i32, i32) {
    %c0_i32 = arith.constant 0 : i32
    %c0_i32_0 = arith.constant 0 : i32
    %c0_i32_1 = arith.constant 0 : i32
    %c0_i32_2 = arith.constant 0 : i32
    return %c0_i32, %c0_i32_0, %c0_i32_1 : i32, i32, i32
  }
  func.func @transform_2(%arg0: i32) -> (i32, i32) {
    %c0_i32 = arith.constant 0 : i32
    %c0_i32_0 = arith.constant 0 : i32
    %c0_i32_1 = arith.constant 0 : i32
    return %c0_i32, %c0_i32_0 : i32, i32
  }
  func.func @transform_3(%arg0: i32) -> (i32, i32, i32) {
    %c0_i32 = arith.constant 0 : i32
    %c0_i32_0 = arith.constant 0 : i32
    %c0_i32_1 = arith.constant 0 : i32
    %c0_i32_2 = arith.constant 0 : i32
    return %c0_i32, %c0_i32_0, %c0_i32_1 : i32, i32, i32
  }
  func.func @transform_4(%arg0: i32) -> (i32, i32) {
    %c0_i32 = arith.constant 0 : i32
    %c0_i32_0 = arith.constant 0 : i32
    %c0_i32_1 = arith.constant 0 : i32
    return %c0_i32, %c0_i32_0 : i32, i32
  }
  func.func @transform_5(%arg0: i32) -> (i32, i32, i32, i32) {
    %c0_i32 = arith.constant 0 : i32
    %c0_i32_0 = arith.constant 0 : i32
    %c0_i32_1 = arith.constant 0 : i32
    %c0_i32_2 = arith.constant 0 : i32
    return %arg0, %c0_i32, %c0_i32_0, %c0_i32_1 : i32, i32, i32, i32
  }
}

</mosaic_0001>

<bundles_post_ra>
// kernel: repncsp_bottleneck.1
= control target key start
LH: loop header
LB: loop body
LE: loop exit
PB: predicated region body
PF: predicated region fallthrough
CT: control target
= control target key end

     0   :  { %s10045_s18 = smov 0   ;;  %s12565_s0 = inlined_call_operand.vmem [shape: f32[2,18,18,4], index: 0, kind: input, shape index: {}]   ;;  %s12566_s1 = inlined_call_operand.vmem [shape: f32[9,4,4], index: 1, kind: input, shape index: {}]   ;;  %s12567_s2 = inlined_call_operand.vmem [shape: f32[1,4], index: 2, kind: input, shape index: {}]   ;;  %s12568_s3 = inlined_call_operand.vmem [shape: f32[9,4,4], index: 3, kind: input, shape index: {}]   ;;  %s12569_s4 = inlined_call_operand.vmem [shape: f32[1,4], index: 4, kind: input, shape index: {}]   ;;  %s12570_s5 = inlined_call_operand.vmem [shape: f32[2,16,16,4], index: 5, kind: output, shape index: {}]  }
   0x1 LB: > { %s7255_s19 = sadd.s32 4294967295, %s10012_s18   ;;  %p7259_p0 = scmp.ge.s32.totalorder %s10012_s18, 1  ;;  %s10012_s18 = sphi %s10045_s18, %s15_s18  }
   0x2   : > { %p187_p1 = scmp.lt.s32.totalorder %s10012_s18, 3 }
   0x4   : > { %p188_p2 = pnand %p7259_p0, %p187_p1 }
   0x6   : > { %191 = sbr.rel (%p188_p2) target bundleno = 1584 (0x630), region = 40 }
   0xd   : > { %v280_v0 = vld [vmem:[%s12566_s1 + $0x4] sm:$0xf]  ;;  %vm491_vm0 = vcmask 1043456   ;;  %p215_p3 = scmp.lt.s32.totalorder %s7255_s19, 1  ;;  %v279_v1 = vld [vmem:[%s12566_s1] sm:$0xf] }
   0xe   : > { %8456 = vmatprep.subr.msk.mxu0 %vm491_vm0, %v280_v0  ;;  %vm345_vm1 = vcmask 1046528   ;;  %vm426_vm2 = vcmask 31744   ;;  %v10120_v24 = vld [vmem:[%s12566_s1 + $0x8] sm:$0xf]  ;;  %vm1012_vm3 = vcmask 1045504   ;;  %vm3228_vm4 = vcmask 25600  }
   0xf   : > { %8457 = vmatpush3.msk.msra.mxu0 %vm491_vm0, %v280_v0  ;;  %s12877_s19 = smov (!%p215_p3, %s7255_s19), 1  ;;  %vm3235_vm5 = vcmask 24576  }
  0x10   : > { %8506 = vmatprep.subr.msk.mxu0 %vm491_vm0, %v279_v1  ;;  %s9868_s24 = smul.u32 432, %s12877_s19  ;;  %s7861_s17 = sshll.u32 %s12877_s19, 8 }
  0x11   : > { %s12289_s21 = scalar_lea.vmem %s12570_s5, %s7861_s17 }
  0x12   : > { %s10068_s27 = scalar_lea.vmem %s12565_s0, %s9868_s24 }
  0x13   : > { %v10071_v2 = vld [vmem:[%s10068_s27] sm:$0xff]  ;;  %v10074_v3 = vld [vmem:[%s10068_s27 + $0x8] sm:$0xff]  ;;  %v10077_v4 = vld [vmem:[%s10068_s27 + $0x10] sm:$0x3] }
  0x14   : > { %v346_v5 = vrot.slane %v10071_v2, 1  ;;  %v347_v6 = vrot.slane %v10074_v3, 1  ;;  %v349_v7 = vrot.slane %v10077_v4, 1  ;;  %v10083_v8 = vld [vmem:[%s10068_s27 + $0x18] sm:$0xff]  ;;  %v10086_v9 = vld [vmem:[%s10068_s27 + $0x20] sm:$0xff]  ;;  %v10094_v13 = vld [vmem:[%s10068_s27 + $0x30] sm:$0xff] }
  0x15   : > { %v351_v10 = vrot.slane %v10083_v8, 1  ;;  %v352_v11 = vrot.slane %v10086_v9, 1  ;;  %v10091_v12 = vld [vmem:[%s10068_s27 + $0x28] sm:$0x3]  ;;  %v10097_v14 = vld [vmem:[%s10068_s27 + $0x38] sm:$0xff]  ;;  %v356_v18 = vrot.slane %v10094_v13, 1 }
  0x16   : > { %v348_v15 = vsel %vm345_vm1, %v346_v5, %v347_v6  ;;  %v350_v16 = vsel %vm345_vm1, %v347_v6, %v349_v7  ;;  %v354_v17 = vrot.slane %v10091_v12, 1  ;;  %v10104_v19 = vld [vmem:[%s10068_s27 + $0x40] sm:$0x3]  ;;  %v357_v21 = vrot.slane %v10097_v14, 1  ;;  %v10112_v22 = vld [vmem:[%s10068_s27 + $0x48] sm:$0xff]  ;;  %v10115_v23 = vld [vmem:[%s10068_s27 + $0x50] sm:$0xff] }
  0x17   : > { %8458 = vmatprep.mubr.msk.f32.mxu0 %vm426_vm2, %v348_v15  ;;  %v10108_v20 = vsel %vm345_vm1, %v351_v10, %v352_v11  ;;  %v359_v26 = vrot.slane %v10104_v19, 1  ;;  %v361_v28 = vrot.slane %v10112_v22, 1  ;;  %v362_v29 = vrot.slane %v10115_v23, 1  ;;  %v10136_v30 = vld [vmem:[%s10068_s27 + $0x58] sm:$0x3]  ;;  %v10141_v31 = vld [vmem:[%s10068_s27 + $0x60] sm:$0xff] }
  0x18   : > { %8459 = vmatmul.mubr.msk.f32.vlgmr.msra.gmra.mrb[0].mxu0 %vm426_vm2, %v350_v16  ;;  %v10127_v25 = vsel %vm345_vm1, %v352_v11, %v354_v17  ;;  %v10131_v27 = vsel %vm345_vm1, %v356_v18, %v357_v21  ;;  %v10144_v32 = vld [vmem:[%s10068_s27 + $0x68] sm:$0xff]  ;;  %v364_v34 = vrot.slane %v10136_v30, 1  ;;  %v366_v36 = vrot.slane %v10141_v31, 1  ;;  %v10160_v38 = vld [vmem:[%s10068_s27 + $0x70] sm:$0x3]  ;;  %v10163_v39 = vld [vmem:[%s10068_s27 + $0x78] sm:$0xff] }
  0x19   : > { %8507 = vmatpush3.msk.msra.mxu0 %vm491_vm0, %v279_v1  ;;  %8461 = vmatprep.mubr.msk.f32.mxu0 %vm426_vm2, %v10108_v20  ;;  %v10151_v33 = vsel %vm345_vm1, %v357_v21, %v359_v26  ;;  %v10155_v35 = vsel %vm345_vm1, %v361_v28, %v362_v29  ;;  %v367_v37 = vrot.slane %v10144_v32, 1  ;;  %v10166_v40 = vld [vmem:[%s10068_s27 + $0x80] sm:$0xff]  ;;  %v369_v42 = vrot.slane %v10160_v38, 1  ;;  %v10182_v46 = vld [vmem:[%s10068_s27 + $0x88] sm:$0x3]  ;;  %v10185_v47 = vld [vmem:[%s10068_s27 + $0x90] sm:$0xff] }
  0x1a   : > { %8556 = vmatprep.subr.msk.mxu0 %vm491_vm0, %v10120_v24  ;;  %12699 = vst [vmem:[#allocation3_spill] sm:$0xff] %v10155_v35  ;;  %v10173_v41 = vsel %vm345_vm1, %v362_v29, %v364_v34  ;;  %v371_v44 = vrot.slane %v10163_v39, 1  ;;  %v372_v45 = vrot.slane %v10166_v40, 1  ;;  %v10188_v48 = vld [vmem:[%s10068_s27 + $0x98] sm:$0xff]  ;;  %v374_v50 = vrot.slane %v10182_v46, 1  ;;  %v10207_v55 = vld [vmem:[%s10068_s27 + $0xa8] sm:$0xff] }
  0x1b   : > { %12700 = vst [vmem:[#allocation4_spill] sm:$0xff] %v10173_v41  ;;  %v10177_v43 = vsel %vm345_vm1, %v366_v36, %v367_v37  ;;  %v10195_v49 = vsel %vm345_vm1, %v367_v37, %v369_v42  ;;  %v376_v52 = vrot.slane %v10185_v47, 1  ;;  %v377_v53 = vrot.slane %v10188_v48, 1  ;;  %v10204_v54 = vld [vmem:[%s10068_s27 + $0xa0] sm:$0x3]  ;;  %v10210_v56 = vld [vmem:[%s10068_s27 + $0xb0] sm:$0xff] }
  0x1c   : > { %8462 = vmatmul.mubr.msk.f32.gmra.mrb[2].mxu0 %vm426_vm2, %v10127_v25  ;;  %12701 = vst [vmem:[#allocation5_spill] sm:$0xff] %v10177_v43  ;;  %12702 = vst [vmem:[#allocation6_spill] sm:$0xff] %v10195_v49  ;;  %v10199_v51 = vsel %vm345_vm1, %v371_v44, %v372_v45  ;;  %v10217_v57 = vsel %vm345_vm1, %v372_v45, %v374_v50  ;;  %v379_v58 = vrot.slane %v10204_v54, 1  ;;  %v381_v60 = vrot.slane %v10207_v55, 1  ;;  %v10226_v62 = vld [vmem:[%s10068_s27 + $0xb8] sm:$0x3] }
  0x1d   : > { %8464 = vmatprep.mubr.msk.f32.mxu0 %vm426_vm2, %v10131_v27  ;;  %12703 = vst [vmem:[#allocation7_spill] sm:$0xff] %v10199_v51  ;;  %12704 = vst [vmem:[#allocation8_spill] sm:$0xff] %v10217_v57  ;;  %v10221_v59 = vsel %vm345_vm1, %v376_v52, %v377_v53  ;;  %v382_v61 = vrot.slane %v10210_v56, 1  ;;  %v10229_v63 = vld [vmem:[%s10068_s27 + $0xc0] sm:$0xff]  ;;  %v10232_v0 = vld [vmem:[%s10068_s27 + $0xc8] sm:$0xff]  ;;  %v384_v5 = vrot.slane %v10226_v62, 1 }
  0x1e   : > { %12705 = vst [vmem:[#allocation9_spill] sm:$0xff] %v10221_v59  ;;  %v10239_v1 = vsel %vm345_vm1, %v377_v53, %v379_v58  ;;  %v386_v7 = vrot.slane %v10229_v63, 1  ;;  %v387_v10 = vrot.slane %v10232_v0, 1  ;;  %v10248_v11 = vld [vmem:[%s10068_s27 + $0xd0] sm:$0x3]  ;;  %v10251_v15 = vld [vmem:[%s10068_s27 + $0xd8] sm:$0xff] }
  0x1f   : > { %12706 = vst [vmem:[#allocation10_spill] sm:$0xff] %v10239_v1  ;;  %v10243_v6 = vsel %vm345_vm1, %v381_v60, %v382_v61  ;;  %v10254_v16 = vld [vmem:[%s10068_s27 + $0xe0] sm:$0xff]  ;;  %v10261_v17 = vsel %vm345_vm1, %v382_v61, %v384_v5  ;;  %v389_v18 = vrot.slane %v10248_v11, 1  ;;  %v391_v26 = vrot.slane %v10251_v15, 1  ;;  %v10270_v29 = vld [vmem:[%s10068_s27 + $0xe8] sm:$0x3] }
  0x20   : > { %8465 = vmatmul.mubr.msk.f32.gmra.mrb[4].mxu0 %vm426_vm2, %v10151_v33  ;;  %12707 = vst [vmem:[#allocation11_spill] sm:$0xff] %v10243_v6  ;;  %12708 = vst [vmem:[#allocation12_spill] sm:$0xff] %v10261_v17  ;;  %v10265_v21 = vsel %vm345_vm1, %v386_v7, %v387_v10  ;;  %v392_v28 = vrot.slane %v10254_v16, 1  ;;  %v10273_v34 = vld [vmem:[%s10068_s27 + $0xf0] sm:$0xff]  ;;  %v10276_v36 = vld [vmem:[%s10068_s27 + $0xf8] sm:$0xff]  ;;  %v394_v42 = vrot.slane %v10270_v29, 1 }
  0x21   : > { %8467 = vmatprep.mubr.msk.f32.mxu0 %vm426_vm2, %v10155_v35  ;;  %12709 = vst [vmem:[#allocation13_spill] sm:$0xff] %v10265_v21  ;;  %v10283_v37 = vsel %vm345_vm1, %v387_v10, %v389_v18  ;;  %v396_v45 = vrot.slane %v10273_v34, 1  ;;  %v397_v50 = vrot.slane %v10276_v36, 1  ;;  %v10292_v52 = vld [vmem:[%s10068_s27 + $0x100] sm:$0x3]  ;;  %v10295_v53 = vld [vmem:[%s10068_s27 + $0x108] sm:$0xff] }
  0x22   : > { %12710 = vst [vmem:[#allocation14_spill] sm:$0xff] %v10283_v37  ;;  %v10287_v44 = vsel %vm345_vm1, %v391_v26, %v392_v28  ;;  %v10298_v58 = vld [vmem:[%s10068_s27 + $0x110] sm:$0xff]  ;;  %v10305_v60 = vsel %vm345_vm1, %v392_v28, %v394_v42  ;;  %v399_v61 = vrot.slane %v10292_v52, 1  ;;  %v401_v7 = vrot.slane %v10295_v53, 1  ;;  %v10314_v18 = vld [vmem:[%s10068_s27 + $0x118] sm:$0x3] }
  0x23   : > { %12711 = vst [vmem:[#allocation15_spill] sm:$0xff] %v10287_v44  ;;  %12712 = vst [vmem:[#allocation16_spill] sm:$0xff] %v10305_v60  ;;  %v10309_v5 = vsel %vm345_vm1, %v396_v45, %v397_v50  ;;  %v402_v10 = vrot.slane %v10298_v58, 1  ;;  %v10317_v26 = vld [vmem:[%s10068_s27 + $0x120] sm:$0xff]  ;;  %v404_v42 = vrot.slane %v10314_v18, 1 }
  0x24   : > { %8468 = vmatmul.mubr.msk.f32.gmra.mrb[6].mxu0 %vm426_vm2, %v10173_v41  ;;  %12713 = vst [vmem:[#allocation17_spill] sm:$0xff] %v10309_v5  ;;  %v10327_v28 = vsel %vm345_vm1, %v397_v50, %v399_v61  ;;  %v10402_v35 = vld [vmem:[%s10068_s27 + $0x178] sm:$0x3] }
  0x25   : > { %8470 = vmatprep.mubr.msk.f32.mxu0 %vm426_vm2, %v10177_v43  ;;  %12714 = vst [vmem:[#allocation18_spill] sm:$0xff] %v10327_v28  ;;  %v10331_v45 = vsel %vm345_vm1, %v401_v7, %v402_v10  ;;  %v10349_v50 = vsel %vm345_vm1, %v402_v10, %v404_v42  ;;  %v10383_v43 = vld [vmem:[%s10068_s27 + $0x168] sm:$0xff] }
  0x26   : > { %12715 = vst [vmem:[#allocation19_spill] sm:$0xff] %v10331_v45  ;;  %12716 = vst [vmem:[#allocation20_spill] sm:$0xff] %v10349_v50 }
  0x28   : > { %8471 = vmatmul.mubr.msk.f32.gmra.mrb[8].mxu0 %vm426_vm2, %v10195_v49  ;;  %v10380_v49 = vld [vmem:[%s10068_s27 + $0x160] sm:$0x3] }
  0x29   : > { %8473 = vmatprep.mubr.msk.f32.mxu0 %vm426_vm2, %v10199_v51 }
  0x2c   : > { %8474 = vmatmul.mubr.msk.f32.gmra.mrb[10].mxu0 %vm426_vm2, %v10217_v57 }
  0x2d   : > { %8476 = vmatprep.mubr.msk.f32.mxu0 %vm426_vm2, %v10221_v59  ;;  %v10358_v59 = vld [vmem:[%s10068_s27 + $0x148] sm:$0x3] }
  0x2e   : > { %v414_v10 = vrot.slane %v10358_v59, 1 }
  0x30   : > { %8477 = vmatmul.mubr.msk.f32.gmra.mrb[12].mxu0 %vm426_vm2, %v10239_v1 }
  0x31   : > { %8479 = vmatprep.mubr.msk.f32.mxu0 %vm426_vm2, %v10243_v6 }
  0x34   : > { %8480 = vmatmul.mubr.msk.f32.gmra.mrb[14].mxu0 %vm426_vm2, %v10261_v17  ;;  %v10336_v17 = vld [vmem:[%s10068_s27 + $0x130] sm:$0x3] }
  0x35   : > { %8482 = vmatprep.mubr.msk.f32.mxu0 %vm426_vm2, %v10265_v21  ;;  %v409_v61 = vrot.slane %v10336_v17, 1 }
  0x38   : > { %8483 = vmatmul.mubr.msk.f32.gmra.mrb[16].mxu0 %vm426_vm2, %v10283_v37  ;;  %v406_v37 = vrot.slane %v10317_v26, 1 }
  0x39   : > { %8485 = vmatprep.mubr.msk.f32.mxu0 %vm426_vm2, %v10287_v44  ;;  %v10320_v44 = vld [vmem:[%s10068_s27 + $0x128] sm:$0xff] }
  0x3a   : > { %v407_v21 = vrot.slane %v10320_v44, 1 }
  0x3c   : > { %8486 = vmatmul.mubr.msk.f32.gmra.mrb[18].mxu0 %vm426_vm2, %v10305_v60  ;;  %v10339_v60 = vld [vmem:[%s10068_s27 + $0x138] sm:$0xff]  ;;  %v10353_v7 = vsel %vm345_vm1, %v406_v37, %v407_v21  ;;  %v10371_v37 = vsel %vm345_vm1, %v407_v21, %v409_v61 }
  0x3d   : > { %8488 = vmatprep.mubr.msk.f32.mxu0 %vm426_vm2, %v10309_v5  ;;  %v10342_v5 = vld [vmem:[%s10068_s27 + $0x140] sm:$0xff]  ;;  %12717 = vst [vmem:[#allocation21_spill] sm:$0xff] %v10353_v7  ;;  %v411_v6 = vrot.slane %v10339_v60, 1  ;;  %12718 = vst [vmem:[#allocation22_spill] sm:$0xff] %v10371_v37 }
  0x3e   : > { %v412_v1 = vrot.slane %v10342_v5, 1 }
  0x40   : > { %8489 = vmatmul.mubr.msk.f32.gmra.mrb[20].mxu0 %vm426_vm2, %v10327_v28  ;;  %v10361_v28 = vld [vmem:[%s10068_s27 + $0x150] sm:$0xff]  ;;  %v10375_v42 = vsel %vm345_vm1, %v411_v6, %v412_v1  ;;  %v10393_v21 = vsel %vm345_vm1, %v412_v1, %v414_v10  ;;  %v419_v6 = vrot.slane %v10380_v49, 1  ;;  %v424_v10 = vrot.slane %v10402_v35, 1 }
  0x41   : > { %8491 = vmatprep.mubr.msk.f32.mxu0 %vm426_vm2, %v10331_v45  ;;  %v10364_v45 = vld [vmem:[%s10068_s27 + $0x158] sm:$0xff]  ;;  %12719 = vst [vmem:[#allocation23_spill] sm:$0xff] %v10375_v42  ;;  %v416_v57 = vrot.slane %v10361_v28, 1 }
  0x42   : > { %v417_v51 = vrot.slane %v10364_v45, 1 }
  0x44   : > { %8492 = vmatmul.mubr.msk.f32.gmra.mrb[22].mxu0 %vm426_vm2, %v10349_v50  ;;  %v10386_v50 = vld [vmem:[%s10068_s27 + $0x170] sm:$0xff]  ;;  %v10397_v61 = vsel %vm345_vm1, %v416_v57, %v417_v51  ;;  %v10409_v1 = vsel %vm345_vm1, %v417_v51, %v419_v6  ;;  %v282_v51 = vld [vmem:[%s12566_s1 + $0xc] sm:$0xf] }
  0x45   : > { %8494 = vmatprep.mubr.msk.f32.mxu0 %vm426_vm2, %v10353_v7  ;;  %12720 = vst [vmem:[#allocation24_spill] sm:$0xff] %v10397_v61  ;;  %v421_v7 = vrot.slane %v10383_v43, 1  ;;  %v422_v41 = vrot.slane %v10386_v50, 1  ;;  %12721 = vst [vmem:[#allocation25_spill] sm:$0xff] %v10409_v1 }
  0x47   : > { %v10413_v57 = vsel %vm345_vm1, %v421_v7, %v422_v41  ;;  %v1016_v7 = vrot.slane %v10077_v4, 2 }
  0x48   : > { %8495 = vmatmul.mubr.msk.f32.gmra.mrb[24].mxu0 %vm426_vm2, %v10371_v37  ;;  %12722 = vst [vmem:[#allocation26_spill] sm:$0xff] %v10413_v57 }
  0x49   : > { %8497 = vmatprep.mubr.msk.f32.mxu0 %vm426_vm2, %v10375_v42  ;;  %v10420_v42 = vsel %vm345_vm1, %v422_v41, %v424_v10  ;;  %v1014_v41 = vrot.slane %v10074_v3, 2  ;;  %v1018_v10 = vrot.slane %v10083_v8, 2 }
  0x4a   : > { %12723 = vst [vmem:[#allocation27_spill] sm:$0xff] %v10420_v42 }
  0x4c   : > { %8498 = vmatmul.mubr.msk.f32.gmra.mrb[26].mxu0 %vm426_vm2, %v10393_v21 }
  0x4d   : > { %8500 = vmatprep.mubr.msk.f32.mxu0 %vm426_vm2, %v10397_v61 }
  0x50   : > { %8501 = vmatmul.mubr.msk.f32.gmra.mrb[28].mxu0 %vm426_vm2, %v10409_v1  ;;  %v10511_v1 = vld [vmem:[%s12566_s1 + $0x10] sm:$0xf] }
  0x51   : > { %8503 = vmatprep.mubr.msk.f32.mxu0 %vm426_vm2, %v10413_v57  ;;  %v1023_v57 = vrot.slane %v10094_v13, 2 }
  0x54   : > { %8504 = vmatmul.mubr.msk.f32.gmra.mrb[30].mxu0 %vm426_vm2, %v10420_v42  ;;  %v1019_v42 = vrot.slane %v10086_v9, 2 }
  0x55   : > { %8508 = vmatprep.mubr.msk.f32.mxu0 %vm426_vm2, %v10071_v2 }
  0x56   : > { %v10504_v4 = vsel %vm1012_vm3, %v1018_v10, %v1019_v42  ;;  %v1029_v10 = vrot.slane %v10115_v23, 2 }
  0x58   : > { %8509 = vmatmul.mubr.msk.f32.vlgmr.msra.gmra.mrb[0].mxu0 %vm426_vm2, %v10074_v3  ;;  %v1021_v3 = vrot.slane %v10091_v12, 2 }
  0x59   : > { %8557 = vmatpush3.msk.msra.mxu0 %vm491_vm0, %v10120_v24  ;;  %8511 = vmatprep.mubr.msk.f32.mxu0 %vm426_vm2, %v10083_v8  ;;  %v1013_v24 = vrot.slane %v10071_v2, 2  ;;  %v1017_v2 = vsel %vm1012_vm3, %v1014_v41, %v1016_v7 }
  0x5a   : > { %8606 = vmatprep.subr.msk.mxu0 %vm491_vm0, %v282_v51  ;;  %v10518_v12 = vsel %vm1012_vm3, %v1019_v42, %v1021_v3 }
  0x5b   : > { %v1015_v6 = vsel %vm1012_vm3, %v1013_v24, %v1014_v41  ;;  %v1024_v24 = vrot.slane %v10097_v14, 2  ;;  %v1026_v41 = vrot.slane %v10104_v19, 2  ;;  %v1031_v19 = vrot.slane %v10136_v30, 2 }
  0x5c   : > { %8512 = vmatmul.mubr.msk.f32.gmra.mrb[2].mxu0 %vm426_vm2, %v10086_v9 }
  0x5d   : > { %8514 = vmatprep.mubr.msk.f32.mxu0 %vm426_vm2, %v10094_v13  ;;  %v10522_v7 = vsel %vm1012_vm3, %v1023_v57, %v1024_v24  ;;  %v10533_v42 = vsel %vm1012_vm3, %v1024_v24, %v1026_v41  ;;  %v10546_v3 = vsel %vm1012_vm3, %v1029_v10, %v1031_v19  ;;  %v1036_v24 = vrot.slane %v10160_v38, 2 }
  0x5e   : > { %v1038_v41 = vrot.slane %v10163_v39, 2  ;;  %v1043_v19 = vrot.slane %v10185_v47, 2 }
  0x60   : > { %8515 = vmatmul.mubr.msk.f32.gmra.mrb[4].mxu0 %vm426_vm2, %v10097_v14 }
  0x61   : > { %8517 = vmatprep.mubr.msk.f32.mxu0 %vm426_vm2, %v10112_v22 }
  0x64   : > { %8518 = vmatmul.mubr.msk.f32.gmra.mrb[6].mxu0 %vm426_vm2, %v10115_v23 }
  0x65   : > { %8520 = vmatprep.mubr.msk.f32.mxu0 %vm426_vm2, %v10141_v31 }
  0x68   : > { %8521 = vmatmul.mubr.msk.f32.gmra.mrb[8].mxu0 %vm426_vm2, %v10144_v32 }
  0x69   : > { %8523 = vmatprep.mubr.msk.f32.mxu0 %vm426_vm2, %v10163_v39 }
  0x6c   : > { %8524 = vmatmul.mubr.msk.f32.gmra.mrb[10].mxu0 %vm426_vm2, %v10166_v40 }
  0x6d   : > { %8526 = vmatprep.mubr.msk.f32.mxu0 %vm426_vm2, %v10185_v47 }
  0x70   : > { %8527 = vmatmul.mubr.msk.f32.gmra.mrb[12].mxu0 %vm426_vm2, %v10188_v48 }
  0x71   : > { %8529 = vmatprep.mubr.msk.f32.mxu0 %vm426_vm2, %v10207_v55 }
  0x74   : > { %8530 = vmatmul.mubr.msk.f32.gmra.mrb[14].mxu0 %vm426_vm2, %v10210_v56 }
  0x75   : > { %8532 = vmatprep.mubr.msk.f32.mxu0 %vm426_vm2, %v10229_v63 }
  0x78   : > { %8533 = vmatmul.mubr.msk.f32.gmra.mrb[16].mxu0 %vm426_vm2, %v10232_v0 }
  0x79   : > { %8535 = vmatprep.mubr.msk.f32.mxu0 %vm426_vm2, %v10251_v15 }
  0x7c   : > { %8536 = vmatmul.mubr.msk.f32.gmra.mrb[18].mxu0 %vm426_vm2, %v10254_v16 }
  0x7d   : > { %8538 = vmatprep.mubr.msk.f32.mxu0 %vm426_vm2, %v10273_v34 }
  0x80   : > { %8539 = vmatmul.mubr.msk.f32.gmra.mrb[20].mxu0 %vm426_vm2, %v10276_v36 }
  0x81   : > { %8541 = vmatprep.mubr.msk.f32.mxu0 %vm426_vm2, %v10295_v53 }
  0x84   : > { %8542 = vmatmul.mubr.msk.f32.gmra.mrb[22].mxu0 %vm426_vm2, %v10298_v58 }
  0x85   : > { %8544 = vmatprep.mubr.msk.f32.mxu0 %vm426_vm2, %v10317_v26 }
  0x88   : > { %8545 = vmatmul.mubr.msk.f32.gmra.mrb[24].mxu0 %vm426_vm2, %v10320_v44 }
  0x89   : > { %8547 = vmatprep.mubr.msk.f32.mxu0 %vm426_vm2, %v10339_v60 }
  0x8c   : > { %8548 = vmatmul.mubr.msk.f32.gmra.mrb[26].mxu0 %vm426_vm2, %v10342_v5 }
  0x8d   : > { %8550 = vmatprep.mubr.msk.f32.mxu0 %vm426_vm2, %v10361_v28 }
  0x90   : > { %8551 = vmatmul.mubr.msk.f32.gmra.mrb[28].mxu0 %vm426_vm2, %v10364_v45 }
  0x91   : > { %8553 = vmatprep.mubr.msk.f32.mxu0 %vm426_vm2, %v10383_v43 }
  0x94   : > { %8554 = vmatmul.mubr.msk.f32.gmra.mrb[30].mxu0 %vm426_vm2, %v10386_v50 }
  0x95   : > { %8558 = vmatprep.mubr.msk.f32.mxu0 %vm426_vm2, %v1015_v6  ;;  %v1028_v6 = vrot.slane %v10112_v22, 2 }
  0x97   : > { %v10537_v57 = vsel %vm1012_vm3, %v1028_v6, %v1029_v10  ;;  %v1039_v6 = vrot.slane %v10166_v40, 2  ;;  %v1041_v10 = vrot.slane %v10182_v46, 2 }
  0x98   : > { %8559 = vmatmul.mubr.msk.f32.vlgmr.msra.gmra.mrb[0].mxu0 %vm426_vm2, %v1017_v2  ;;  %12724 = vst [vmem:[#allocation28_spill] sm:$0xff] %v10537_v57  ;;  %v1034_v2 = vrot.slane %v10144_v32, 2 }
  0x99   : > { %8607 = vmatpush3.msk.msra.mxu0 %vm491_vm0, %v282_v51  ;;  %8561 = vmatprep.mubr.msk.f32.mxu0 %vm426_vm2, %v10504_v4  ;;  %v1033_v51 = vrot.slane %v10141_v31, 2  ;;  %v10563_v38 = vsel %vm1012_vm3, %v1038_v41, %v1039_v6  ;;  %v1049_v41 = vrot.slane %v10210_v56, 2 }
  0x9a   : > { %8656 = vmatprep.subr.msk.mxu0 %vm491_vm0, %v10511_v1  ;;  %12726 = vst [vmem:[#allocation30_spill] sm:$0xff] %v10563_v38 }
  0x9b   : > { %v10550_v30 = vsel %vm1012_vm3, %v1033_v51, %v1034_v2  ;;  %v1044_v51 = vrot.slane %v10188_v48, 2 }
  0x9c   : > { %8562 = vmatmul.mubr.msk.f32.gmra.mrb[2].mxu0 %vm426_vm2, %v10518_v12  ;;  %12725 = vst [vmem:[#allocation29_spill] sm:$0xff] %v10550_v30 }
  0x9d   : > { %8564 = vmatprep.mubr.msk.f32.mxu0 %vm426_vm2, %v10522_v7  ;;  %v10576_v46 = vsel %vm1012_vm3, %v1043_v19, %v1044_v51  ;;  %v1054_v19 = vrot.slane %v10232_v0, 2 }
  0x9e   : > { %12727 = vst [vmem:[#allocation31_spill] sm:$0xff] %v10576_v46 }
  0xa0   : > { %8565 = vmatmul.mubr.msk.f32.gmra.mrb[4].mxu0 %vm426_vm2, %v10533_v42 }
  0xa1   : > { %8567 = vmatprep.mubr.msk.f32.mxu0 %vm426_vm2, %v10537_v57  ;;  %v10559_v57 = vsel %vm1012_vm3, %v1034_v2, %v1036_v24  ;;  %v1046_v2 = vrot.slane %v10204_v54, 2  ;;  %v1048_v24 = vrot.slane %v10207_v55, 2 }
  0xa3   : > { %v10589_v54 = vsel %vm1012_vm3, %v1048_v24, %v1049_v41  ;;  %v1059_v24 = vrot.slane %v10254_v16, 2 }
  0xa4   : > { %8568 = vmatmul.mubr.msk.f32.gmra.mrb[6].mxu0 %vm426_vm2, %v10546_v3  ;;  %12728 = vst [vmem:[#allocation32_spill] sm:$0xff] %v10589_v54 }
  0xa5   : > { %8570 = vmatprep.mubr.msk.f32.mxu0 %vm426_vm2, %v10550_v30  ;;  %v10572_v30 = vsel %vm1012_vm3, %v1039_v6, %v1041_v10  ;;  %v1051_v6 = vrot.slane %v10226_v62, 2  ;;  %v1053_v10 = vrot.slane %v10229_v63, 2 }
  0xa7   : > { %v10602_v62 = vsel %vm1012_vm3, %v1053_v10, %v1054_v19  ;;  %v1064_v10 = vrot.slane %v10276_v36, 2 }
  0xa8   : > { %8571 = vmatmul.mubr.msk.f32.gmra.mrb[8].mxu0 %vm426_vm2, %v10559_v57  ;;  %12729 = vst [vmem:[#allocation33_spill] sm:$0xff] %v10602_v62 }
  0xa9   : > { %8573 = vmatprep.mubr.msk.f32.mxu0 %vm426_vm2, %v10563_v38  ;;  %v10585_v38 = vsel %vm1012_vm3, %v1044_v51, %v1046_v2  ;;  %v1056_v51 = vrot.slane %v10248_v11, 2  ;;  %v1058_v2 = vrot.slane %v10251_v15, 2 }
  0xab   : > { %v10615_v11 = vsel %vm1012_vm3, %v1058_v2, %v1059_v24  ;;  %v1069_v2 = vrot.slane %v10298_v58, 2 }
  0xac   : > { %8574 = vmatmul.mubr.msk.f32.gmra.mrb[10].mxu0 %vm426_vm2, %v10572_v30  ;;  %12730 = vst [vmem:[#allocation34_spill] sm:$0xff] %v10615_v11 }
  0xad   : > { %8576 = vmatprep.mubr.msk.f32.mxu0 %vm426_vm2, %v10576_v46  ;;  %v10598_v46 = vsel %vm1012_vm3, %v1049_v41, %v1051_v6  ;;  %v1061_v41 = vrot.slane %v10270_v29, 2  ;;  %v1063_v6 = vrot.slane %v10273_v34, 2 }
  0xaf   : > { %v10628_v29 = vsel %vm1012_vm3, %v1063_v6, %v1064_v10  ;;  %v1074_v6 = vrot.slane %v10320_v44, 2 }
  0xb0   : > { %8577 = vmatmul.mubr.msk.f32.gmra.mrb[12].mxu0 %vm426_vm2, %v10585_v38  ;;  %12731 = vst [vmem:[#allocation35_spill] sm:$0xff] %v10628_v29 }
  0xb1   : > { %8579 = vmatprep.mubr.msk.f32.mxu0 %vm426_vm2, %v10589_v54  ;;  %v10611_v54 = vsel %vm1012_vm3, %v1054_v19, %v1056_v51  ;;  %v1066_v19 = vrot.slane %v10292_v52, 2  ;;  %v1068_v51 = vrot.slane %v10295_v53, 2 }
  0xb3   : > { %v10641_v52 = vsel %vm1012_vm3, %v1068_v51, %v1069_v2  ;;  %v1079_v51 = vrot.slane %v10342_v5, 2 }
  0xb4   : > { %8580 = vmatmul.mubr.msk.f32.gmra.mrb[14].mxu0 %vm426_vm2, %v10598_v46  ;;  %12733 = vst [vmem:[#allocation37_spill] sm:$0xff] %v10641_v52 }
  0xb5   : > { %8582 = vmatprep.mubr.msk.f32.mxu0 %vm426_vm2, %v10602_v62  ;;  %v10624_v62 = vsel %vm1012_vm3, %v1059_v24, %v1061_v41  ;;  %v1071_v24 = vrot.slane %v10314_v18, 2  ;;  %v1073_v41 = vrot.slane %v10317_v26, 2 }
  0xb7   : > { %v10654_v18 = vsel %vm1012_vm3, %v1073_v41, %v1074_v6  ;;  %v1084_v41 = vrot.slane %v10364_v45, 2 }
  0xb8   : > { %8583 = vmatmul.mubr.msk.f32.gmra.mrb[16].mxu0 %vm426_vm2, %v10611_v54  ;;  %12734 = vst [vmem:[#allocation38_spill] sm:$0xff] %v10654_v18 }
  0xb9   : > { %8585 = vmatprep.mubr.msk.f32.mxu0 %vm426_vm2, %v10615_v11  ;;  %v10637_v11 = vsel %vm1012_vm3, %v1064_v10, %v1066_v19  ;;  %v1076_v10 = vrot.slane %v10336_v17, 2  ;;  %v1078_v19 = vrot.slane %v10339_v60, 2 }
  0xba   : > { %12732 = vst [vmem:[#allocation36_spill] sm:$0xff] %v10637_v11 }
  0xbb   : > { %v10667_v17 = vsel %vm1012_vm3, %v1078_v19, %v1079_v51  ;;  %v1089_v19 = vrot.slane %v10386_v50, 2 }
  0xbc   : > { %8586 = vmatmul.mubr.msk.f32.gmra.mrb[18].mxu0 %vm426_vm2, %v10624_v62  ;;  %12736 = vst [vmem:[#allocation40_spill] sm:$0xff] %v10667_v17 }
  0xbd   : > { %8588 = vmatprep.mubr.msk.f32.mxu0 %vm426_vm2, %v10628_v29  ;;  %v10650_v29 = vsel %vm1012_vm3, %v1069_v2, %v1071_v24  ;;  %v1081_v2 = vrot.slane %v10358_v59, 2  ;;  %v1083_v24 = vrot.slane %v10361_v28, 2 }
  0xbf   : > { %v10680_v59 = vsel %vm1012_vm3, %v1083_v24, %v1084_v41  ;;  %v12738_v24 = vld [vmem:[#allocation3_spill] sm:$0xff] }
  0xc0   : > { %8589 = vmatmul.mubr.msk.f32.gmra.mrb[20].mxu0 %vm426_vm2, %v10637_v11  ;;  %12737 = vst [vmem:[#allocation41_spill] sm:$0xff] %v10680_v59 }
  0xc1   : > { %8591 = vmatprep.mubr.msk.f32.mxu0 %vm426_vm2, %v10641_v52  ;;  %v10663_v52 = vsel %vm1012_vm3, %v1074_v6, %v1076_v10  ;;  %v1086_v6 = vrot.slane %v10380_v49, 2  ;;  %v1088_v10 = vrot.slane %v10383_v43, 2 }
  0xc2   : > { %12735 = vst [vmem:[#allocation39_spill] sm:$0xff] %v10663_v52 }
  0xc3   : > { %v10693_v49 = vsel %vm1012_vm3, %v1088_v10, %v1089_v19  ;;  %v12743_v10 = vld [vmem:[#allocation8_spill] sm:$0xff] }
  0xc4   : > { %8592 = vmatmul.mubr.msk.f32.gmra.mrb[22].mxu0 %vm426_vm2, %v10650_v29 }
  0xc5   : > { %8594 = vmatprep.mubr.msk.f32.mxu0 %vm426_vm2, %v10654_v18  ;;  %v10676_v18 = vsel %vm1012_vm3, %v1079_v51, %v1081_v2  ;;  %v1091_v51 = vrot.slane %v10402_v35, 2  ;;  %v284_v35 = vld [vmem:[%s12566_s1 + $0x14] sm:$0xf] }
  0xc7   : > { %v10700_v2 = vsel %vm1012_vm3, %v1089_v19, %v1091_v51  ;;  %v12744_v19 = vld [vmem:[#allocation9_spill] sm:$0xff]  ;;  %v12745_v51 = vld [vmem:[#allocation10_spill] sm:$0xff] }
  0xc8   : > { %8595 = vmatmul.mubr.msk.f32.gmra.mrb[24].mxu0 %vm426_vm2, %v10663_v52 }
  0xc9   : > { %8597 = vmatprep.mubr.msk.f32.mxu0 %vm426_vm2, %v10667_v17  ;;  %v10689_v17 = vsel %vm1012_vm3, %v1084_v41, %v1086_v6  ;;  %v12740_v41 = vld [vmem:[#allocation5_spill] sm:$0xff]  ;;  %v12742_v6 = vld [vmem:[#allocation7_spill] sm:$0xff] }
  0xcc   : > { %8598 = vmatmul.mubr.msk.f32.gmra.mrb[26].mxu0 %vm426_vm2, %v10676_v18 }
  0xcd   : > { %8600 = vmatprep.mubr.msk.f32.mxu0 %vm426_vm2, %v10680_v59 }
  0xd0   : > { %8601 = vmatmul.mubr.msk.f32.gmra.mrb[28].mxu0 %vm426_vm2, %v10689_v17 }
  0xd1   : > { %8603 = vmatprep.mubr.msk.f32.mxu0 %vm426_vm2, %v10693_v49 }
  0xd4   : > { %8604 = vmatmul.mubr.msk.f32.gmra.mrb[30].mxu0 %vm426_vm2, %v10700_v2 }
  0xd5   : > { %8608 = vmatprep.mubr.msk.f32.mxu0 %vm426_vm2, %v10083_v8  ;;  %v10769_v8 = vld [vmem:[%s10068_s27 + $0x180] sm:$0xff] }
  0xd8   : > { %8609 = vmatmul.mubr.msk.f32.vlgmr.msra.gmra.mrb[0].mxu0 %vm426_vm2, %v10086_v9  ;;  %v10776_v9 = vld [vmem:[%s10068_s27 + $0x188] sm:$0xff] }
  0xd9   : > { %8657 = vmatpush3.msk.msra.mxu0 %vm491_vm0, %v10511_v1  ;;  %8611 = vmatprep.mubr.msk.f32.mxu0 %vm426_vm2, %v10094_v13  ;;  %v285_v1 = vld [vmem:[%s12566_s1 + $0x18] sm:$0xf] }
  0xda   : > { %8706 = vmatprep.subr.msk.mxu0 %vm491_vm0, %v284_v35 }
  0xdc   : > { %8612 = vmatmul.mubr.msk.f32.gmra.mrb[2].mxu0 %vm426_vm2, %v10097_v14 }
  0xdd   : > { %8614 = vmatprep.mubr.msk.f32.mxu0 %vm426_vm2, %v10112_v22 }
  0xe0   : > { %8615 = vmatmul.mubr.msk.f32.gmra.mrb[4].mxu0 %vm426_vm2, %v10115_v23 }
  0xe1   : > { %8617 = vmatprep.mubr.msk.f32.mxu0 %vm426_vm2, %v10141_v31 }
  0xe4   : > { %8618 = vmatmul.mubr.msk.f32.gmra.mrb[6].mxu0 %vm426_vm2, %v10144_v32 }
  0xe5   : > { %8620 = vmatprep.mubr.msk.f32.mxu0 %vm426_vm2, %v10163_v39 }
  0xe8   : > { %8621 = vmatmul.mubr.msk.f32.gmra.mrb[8].mxu0 %vm426_vm2, %v10166_v40 }
  0xe9   : > { %8623 = vmatprep.mubr.msk.f32.mxu0 %vm426_vm2, %v10185_v47 }
  0xec   : > { %8624 = vmatmul.mubr.msk.f32.gmra.mrb[10].mxu0 %vm426_vm2, %v10188_v48 }
  0xed   : > { %8626 = vmatprep.mubr.msk.f32.mxu0 %vm426_vm2, %v10207_v55 }
  0xf0   : > { %8627 = vmatmul.mubr.msk.f32.gmra.mrb[12].mxu0 %vm426_vm2, %v10210_v56 }
  0xf1   : > { %8629 = vmatprep.mubr.msk.f32.mxu0 %vm426_vm2, %v10229_v63 }
  0xf4   : > { %8630 = vmatmul.mubr.msk.f32.gmra.mrb[14].mxu0 %vm426_vm2, %v10232_v0 }
  0xf5   : > { %8632 = vmatprep.mubr.msk.f32.mxu0 %vm426_vm2, %v10251_v15 }
  0xf8   : > { %8633 = vmatmul.mubr.msk.f32.gmra.mrb[16].mxu0 %vm426_vm2, %v10254_v16 }
  0xf9   : > { %8635 = vmatprep.mubr.msk.f32.mxu0 %vm426_vm2, %v10273_v34 }
  0xfc   : > { %8636 = vmatmul.mubr.msk.f32.gmra.mrb[18].mxu0 %vm426_vm2, %v10276_v36 }
  0xfd   : > { %8638 = vmatprep.mubr.msk.f32.mxu0 %vm426_vm2, %v10295_v53 }
 0x100   : > { %8639 = vmatmul.mubr.msk.f32.gmra.mrb[20].mxu0 %vm426_vm2, %v10298_v58 }
 0x101   : > { %8641 = vmatprep.mubr.msk.f32.mxu0 %vm426_vm2, %v10317_v26 }
 0x104   : > { %8642 = vmatmul.mubr.msk.f32.gmra.mrb[22].mxu0 %vm426_vm2, %v10320_v44 }
 0x105   : > { %8644 = vmatprep.mubr.msk.f32.mxu0 %vm426_vm2, %v10339_v60 }
 0x108   : > { %8645 = vmatmul.mubr.msk.f32.gmra.mrb[24].mxu0 %vm426_vm2, %v10342_v5 }
 0x109   : > { %8647 = vmatprep.mubr.msk.f32.mxu0 %vm426_vm2, %v10361_v28 }
 0x10c   : > { %8648 = vmatmul.mubr.msk.f32.gmra.mrb[26].mxu0 %vm426_vm2, %v10364_v45 }
 0x10d   : > { %8650 = vmatprep.mubr.msk.f32.mxu0 %vm426_vm2, %v10383_v43 }
 0x110   : > { %8651 = vmatmul.mubr.msk.f32.gmra.mrb[28].mxu0 %vm426_vm2, %v10386_v50 }
 0x111   : > { %8653 = vmatprep.mubr.msk.f32.mxu0 %vm426_vm2, %v10769_v8 }
 0x114   : > { %8654 = vmatmul.mubr.msk.f32.gmra.mrb[30].mxu0 %vm426_vm2, %v10776_v9 }
 0x115   : > { %8658 = vmatprep.mubr.msk.f32.mxu0 %vm426_vm2, %v10108_v20  ;;  %v12739_v20 = vld [vmem:[#allocation4_spill] sm:$0xff] }
 0x118   : > { %8659 = vmatmul.mubr.msk.f32.vlgmr.msra.gmra.mrb[0].mxu0 %vm426_vm2, %v10127_v25  ;;  %v12741_v25 = vld [vmem:[#allocation6_spill] sm:$0xff] }
 0x119   : > { %8707 = vmatpush3.msk.msra.mxu0 %vm491_vm0, %v284_v35  ;;  %8661 = vmatprep.mubr.msk.f32.mxu0 %vm426_vm2, %v10131_v27  ;;  %v12746_v35 = vld [vmem:[#allocation11_spill] sm:$0xff] }
 0x11a   : > { %8756 = vmatprep.subr.msk.mxu0 %vm491_vm0, %v285_v1 }
 0x11c   : > { %8662 = vmatmul.mubr.msk.f32.gmra.mrb[2].mxu0 %vm426_vm2, %v10151_v33 }
 0x11d   : > { %8664 = vmatprep.mubr.msk.f32.mxu0 %vm426_vm2, %v12738_v24 }
 0x120   : > { %8665 = vmatmul.mubr.msk.f32.gmra.mrb[4].mxu0 %vm426_vm2, %v12739_v20  ;;  %v12747_v20 = vld [vmem:[#allocation12_spill] sm:$0xff] }
 0x121   : > { %8667 = vmatprep.mubr.msk.f32.mxu0 %vm426_vm2, %v12740_v41  ;;  %v12748_v41 = vld [vmem:[#allocation13_spill] sm:$0xff] }
 0x124   : > { %8668 = vmatmul.mubr.msk.f32.gmra.mrb[6].mxu0 %vm426_vm2, %v12741_v25  ;;  %v12755_v25 = vld [vmem:[#allocation20_spill] sm:$0xff] }
 0x125   : > { %8670 = vmatprep.mubr.msk.f32.mxu0 %vm426_vm2, %v12742_v6  ;;  %v12749_v6 = vld [vmem:[#allocation14_spill] sm:$0xff] }
 0x128   : > { %8671 = vmatmul.mubr.msk.f32.gmra.mrb[8].mxu0 %vm426_vm2, %v12743_v10  ;;  %v12750_v10 = vld [vmem:[#allocation15_spill] sm:$0xff] }
 0x129   : > { %8673 = vmatprep.mubr.msk.f32.mxu0 %vm426_vm2, %v12744_v19  ;;  %v12751_v19 = vld [vmem:[#allocation16_spill] sm:$0xff] }
 0x12c   : > { %8674 = vmatmul.mubr.msk.f32.gmra.mrb[10].mxu0 %vm426_vm2, %v12745_v51  ;;  %v12752_v51 = vld [vmem:[#allocation17_spill] sm:$0xff] }
 0x12d   : > { %8676 = vmatprep.mubr.msk.f32.mxu0 %vm426_vm2, %v12746_v35  ;;  %v12753_v35 = vld [vmem:[#allocation18_spill] sm:$0xff] }
 0x130   : > { %8677 = vmatmul.mubr.msk.f32.gmra.mrb[12].mxu0 %vm426_vm2, %v12747_v20  ;;  %v12754_v20 = vld [vmem:[#allocation19_spill] sm:$0xff] }
 0x131   : > { %8679 = vmatprep.mubr.msk.f32.mxu0 %vm426_vm2, %v12748_v41  ;;  %v12756_v41 = vld [vmem:[#allocation21_spill] sm:$0xff] }
 0x134   : > { %8680 = vmatmul.mubr.msk.f32.gmra.mrb[14].mxu0 %vm426_vm2, %v12749_v6 }
 0x135   : > { %8682 = vmatprep.mubr.msk.f32.mxu0 %vm426_vm2, %v12750_v10  ;;  %v12757_v10 = vld [vmem:[#allocation23_spill] sm:$0xff] }
 0x138   : > { %8683 = vmatmul.mubr.msk.f32.gmra.mrb[16].mxu0 %vm426_vm2, %v12751_v19  ;;  %v12760_v19 = vld [vmem:[#allocation27_spill] sm:$0xff] }
 0x139   : > { %8685 = vmatprep.mubr.msk.f32.mxu0 %vm426_vm2, %v12752_v51  ;;  %v12758_v51 = vld [vmem:[#allocation25_spill] sm:$0xff] }
 0x13c   : > { %8686 = vmatmul.mubr.msk.f32.gmra.mrb[18].mxu0 %vm426_vm2, %v12753_v35  ;;  %v1685_v35 = vrot.slane %v10776_v9, 1 }
 0x13d   : > { %8688 = vmatprep.mubr.msk.f32.mxu0 %vm426_vm2, %v12754_v20  ;;  %v1684_v20 = vrot.slane %v10769_v8, 1 }
 0x140   : > { %8689 = vmatmul.mubr.msk.f32.gmra.mrb[20].mxu0 %vm426_vm2, %v12755_v25  ;;  %v275_v25 = vld [vmem:[%s10068_s27 + $0x190] sm:$0x3] }
 0x141   : > { %8691 = vmatprep.mubr.msk.f32.mxu0 %vm426_vm2, %v12756_v41  ;;  %v12759_v41 = vld [vmem:[#allocation26_spill] sm:$0xff] }
 0x144   : > { %8692 = vmatmul.mubr.msk.f32.gmra.mrb[22].mxu0 %vm426_vm2, %v10371_v37  ;;  %v1687_v37 = vrot.slane %v275_v25, 1 }
 0x145   : > { %8694 = vmatprep.mubr.msk.f32.mxu0 %vm426_vm2, %v12757_v10  ;;  %v10847_v10 = vsel %vm345_vm1, %v1684_v20, %v1685_v35  ;;  %v286_v20 = vld [vmem:[%s12566_s1 + $0x1c] sm:$0xf] }
 0x148   : > { %8695 = vmatmul.mubr.msk.f32.gmra.mrb[24].mxu0 %vm426_vm2, %v10393_v21 }
 0x149   : > { %8697 = vmatprep.mubr.msk.f32.mxu0 %vm426_vm2, %v10397_v61  ;;  %v10854_v61 = vsel %vm345_vm1, %v1685_v35, %v1687_v37  ;;  %v12761_v37 = vld [vmem:[#allocation28_spill] sm:$0xff] }
 0x14a   : > { %v12765_v35 = vld [vmem:[#allocation32_spill] sm:$0xff] }
 0x14c   : > { %8698 = vmatmul.mubr.msk.f32.gmra.mrb[26].mxu0 %vm426_vm2, %v12758_v51 }
 0x14d   : > { %8700 = vmatprep.mubr.msk.f32.mxu0 %vm426_vm2, %v12759_v41 }
 0x150   : > { %8701 = vmatmul.mubr.msk.f32.gmra.mrb[28].mxu0 %vm426_vm2, %v12760_v19 }
 0x151   : > { %8703 = vmatprep.mubr.msk.f32.mxu0 %vm426_vm2, %v10847_v10 }
 0x154   : > { %8704 = vmatmul.mubr.msk.f32.gmra.mrb[30].mxu0 %vm426_vm2, %v10854_v61 }
 0x155   : > { %8708 = vmatprep.mubr.msk.f32.mxu0 %vm426_vm2, %v10504_v4  ;;  %v12762_v4 = vld [vmem:[#allocation29_spill] sm:$0xff] }
 0x158   : > { %8709 = vmatmul.mubr.msk.f32.vlgmr.msra.gmra.mrb[0].mxu0 %vm426_vm2, %v10518_v12  ;;  %v12763_v12 = vld [vmem:[#allocation30_spill] sm:$0xff] }
 0x159   : > { %8757 = vmatpush3.msk.msra.mxu0 %vm491_vm0, %v285_v1  ;;  %8711 = vmatprep.mubr.msk.f32.mxu0 %vm426_vm2, %v10522_v7  ;;  %v12764_v1 = vld [vmem:[#allocation31_spill] sm:$0xff] }
 0x15a   : > { %8806 = vmatprep.subr.msk.mxu0 %vm491_vm0, %v286_v20 }
 0x15c   : > { %8712 = vmatmul.mubr.msk.f32.gmra.mrb[2].mxu0 %vm426_vm2, %v10533_v42 }
 0x15d   : > { %8714 = vmatprep.mubr.msk.f32.mxu0 %vm426_vm2, %v12761_v37 }
 0x160   : > { %8715 = vmatmul.mubr.msk.f32.gmra.mrb[4].mxu0 %vm426_vm2, %v10546_v3 }
 0x161   : > { %8717 = vmatprep.mubr.msk.f32.mxu0 %vm426_vm2, %v12762_v4  ;;  %v12766_v4 = vld [vmem:[#allocation33_spill] sm:$0xff] }
 0x164   : > { %8718 = vmatmul.mubr.msk.f32.gmra.mrb[6].mxu0 %vm426_vm2, %v10559_v57 }
 0x165   : > { %8720 = vmatprep.mubr.msk.f32.mxu0 %vm426_vm2, %v12763_v12  ;;  %v12767_v12 = vld [vmem:[#allocation34_spill] sm:$0xff] }
 0x168   : > { %8721 = vmatmul.mubr.msk.f32.gmra.mrb[8].mxu0 %vm426_vm2, %v10572_v30 }
 0x169   : > { %8723 = vmatprep.mubr.msk.f32.mxu0 %vm426_vm2, %v12764_v1  ;;  %v12768_v1 = vld [vmem:[#allocation35_spill] sm:$0xff] }
 0x16c   : > { %8724 = vmatmul.mubr.msk.f32.gmra.mrb[10].mxu0 %vm426_vm2, %v10585_v38 }
 0x16d   : > { %8726 = vmatprep.mubr.msk.f32.mxu0 %vm426_vm2, %v12765_v35  ;;  %v12769_v35 = vld [vmem:[#allocation37_spill] sm:$0xff] }
 0x170   : > { %8727 = vmatmul.mubr.msk.f32.gmra.mrb[12].mxu0 %vm426_vm2, %v10598_v46 }
 0x171   : > { %8729 = vmatprep.mubr.msk.f32.mxu0 %vm426_vm2, %v12766_v4  ;;  %v12770_v4 = vld [vmem:[#allocation38_spill] sm:$0xff] }
 0x174   : > { %8730 = vmatmul.mubr.msk.f32.gmra.mrb[14].mxu0 %vm426_vm2, %v10611_v54 }
 0x175   : > { %8732 = vmatprep.mubr.msk.f32.mxu0 %vm426_vm2, %v12767_v12  ;;  %v12771_v12 = vld [vmem:[#allocation40_spill] sm:$0xff] }
 0x178   : > { %8733 = vmatmul.mubr.msk.f32.gmra.mrb[16].mxu0 %vm426_vm2, %v10624_v62 }
 0x179   : > { %8735 = vmatprep.mubr.msk.f32.mxu0 %vm426_vm2, %v12768_v1 }
 0x17c   : > { %8736 = vmatmul.mubr.msk.f32.gmra.mrb[18].mxu0 %vm426_vm2, %v10637_v11  ;;  %v1954_v11 = vrot.slane %v10776_v9, 2 }
 0x17d   : > { %8738 = vmatprep.mubr.msk.f32.mxu0 %vm426_vm2, %v12769_v35  ;;  %v1953_v35 = vrot.slane %v10769_v8, 2 }
 0x180   : > { %8739 = vmatmul.mubr.msk.f32.gmra.mrb[20].mxu0 %vm426_vm2, %v10650_v29 }
 0x181   : > { %8741 = vmatprep.mubr.msk.f32.mxu0 %vm426_vm2, %v12770_v4  ;;  %v10924_v4 = vsel %vm1012_vm3, %v1953_v35, %v1954_v11 }
 0x184   : > { %8742 = vmatmul.mubr.msk.f32.gmra.mrb[22].mxu0 %vm426_vm2, %v10663_v52  ;;  %v1956_v52 = vrot.slane %v275_v25, 2  ;;  %v287_v25 = vld [vmem:[%s12566_s1 + $0x20] sm:$0xf] }
 0x185   : > { %8744 = vmatprep.mubr.msk.f32.mxu0 %vm426_vm2, %v12771_v12 }
 0x188   : > { %8745 = vmatmul.mubr.msk.f32.gmra.mrb[24].mxu0 %vm426_vm2, %v10676_v18 }
 0x189   : > { %8747 = vmatprep.mubr.msk.f32.mxu0 %vm426_vm2, %v10680_v59  ;;  %v10931_v59 = vsel %vm1012_vm3, %v1954_v11, %v1956_v52 }
 0x18c   : > { %8748 = vmatmul.mubr.msk.f32.gmra.mrb[26].mxu0 %vm426_vm2, %v10689_v17 }
 0x18d   : > { %8750 = vmatprep.mubr.msk.f32.mxu0 %vm426_vm2, %v10693_v49 }
 0x190   : > { %8751 = vmatmul.mubr.msk.f32.gmra.mrb[28].mxu0 %vm426_vm2, %v10700_v2 }
 0x191   : > { %8753 = vmatprep.mubr.msk.f32.mxu0 %vm426_vm2, %v10924_v4 }
 0x194   : > { %8754 = vmatmul.mubr.msk.f32.gmra.mrb[30].mxu0 %vm426_vm2, %v10931_v59 }
 0x195   : > { %8758 = vmatprep.mubr.msk.f32.mxu0 %vm426_vm2, %v10094_v13  ;;  %v10999_v13 = vld [vmem:[%s10068_s27 + $0x198] sm:$0xff] }
 0x198   : > { %8759 = vmatmul.mubr.msk.f32.vlgmr.msra.gmra.mrb[0].mxu0 %vm426_vm2, %v10097_v14  ;;  %v11006_v14 = vld [vmem:[%s10068_s27 + $0x1a0] sm:$0xff] }
 0x199   : > { %8807 = vmatpush3.msk.msra.mxu0 %vm491_vm0, %v286_v20  ;;  %8761 = vmatprep.mubr.msk.f32.mxu0 %vm426_vm2, %v10112_v22  ;;  %v12772_v22 = vld [vmem:[#allocation4_spill] sm:$0xff] }
 0x19a   : > { %8856 = vmatprep.subr.msk.mxu0 %vm491_vm0, %v287_v25 }
 0x19c   : > { %8762 = vmatmul.mubr.msk.f32.gmra.mrb[2].mxu0 %vm426_vm2, %v10115_v23  ;;  %v12773_v23 = vld [vmem:[#allocation5_spill] sm:$0xff] }
 0x19d   : > { %8764 = vmatprep.mubr.msk.f32.mxu0 %vm426_vm2, %v10141_v31  ;;  %v12774_v31 = vld [vmem:[#allocation6_spill] sm:$0xff] }
 0x1a0   : > { %8765 = vmatmul.mubr.msk.f32.gmra.mrb[4].mxu0 %vm426_vm2, %v10144_v32  ;;  %v12775_v32 = vld [vmem:[#allocation7_spill] sm:$0xff] }
 0x1a1   : > { %8767 = vmatprep.mubr.msk.f32.mxu0 %vm426_vm2, %v10163_v39  ;;  %v12778_v39 = vld [vmem:[#allocation10_spill] sm:$0xff] }
 0x1a4   : > { %8768 = vmatmul.mubr.msk.f32.gmra.mrb[6].mxu0 %vm426_vm2, %v10166_v40  ;;  %v12779_v40 = vld [vmem:[#allocation11_spill] sm:$0xff] }
 0x1a5   : > { %8770 = vmatprep.mubr.msk.f32.mxu0 %vm426_vm2, %v10185_v47  ;;  %v12781_v47 = vld [vmem:[#allocation13_spill] sm:$0xff] }
 0x1a8   : > { %8771 = vmatmul.mubr.msk.f32.gmra.mrb[8].mxu0 %vm426_vm2, %v10188_v48  ;;  %v12782_v48 = vld [vmem:[#allocation15_spill] sm:$0xff] }
 0x1a9   : > { %8773 = vmatprep.mubr.msk.f32.mxu0 %vm426_vm2, %v10207_v55  ;;  %v12783_v55 = vld [vmem:[#allocation16_spill] sm:$0xff] }
 0x1ac   : > { %8774 = vmatmul.mubr.msk.f32.gmra.mrb[10].mxu0 %vm426_vm2, %v10210_v56  ;;  %v12784_v56 = vld [vmem:[#allocation17_spill] sm:$0xff] }
 0x1ad   : > { %8776 = vmatprep.mubr.msk.f32.mxu0 %vm426_vm2, %v10229_v63  ;;  %v12785_v63 = vld [vmem:[#allocation18_spill] sm:$0xff] }
 0x1b0   : > { %8777 = vmatmul.mubr.msk.f32.gmra.mrb[12].mxu0 %vm426_vm2, %v10232_v0  ;;  %v12786_v0 = vld [vmem:[#allocation19_spill] sm:$0xff] }
 0x1b1   : > { %8779 = vmatprep.mubr.msk.f32.mxu0 %vm426_vm2, %v10251_v15  ;;  %v12787_v15 = vld [vmem:[#allocation20_spill] sm:$0xff] }
 0x1b4   : > { %8780 = vmatmul.mubr.msk.f32.gmra.mrb[14].mxu0 %vm426_vm2, %v10254_v16  ;;  %v12788_v16 = vld [vmem:[#allocation21_spill] sm:$0xff] }
 0x1b5   : > { %8782 = vmatprep.mubr.msk.f32.mxu0 %vm426_vm2, %v10273_v34  ;;  %v12789_v34 = vld [vmem:[#allocation22_spill] sm:$0xff] }
 0x1b8   : > { %8783 = vmatmul.mubr.msk.f32.gmra.mrb[16].mxu0 %vm426_vm2, %v10276_v36  ;;  %v12790_v36 = vld [vmem:[#allocation23_spill] sm:$0xff] }
 0x1b9   : > { %8785 = vmatprep.mubr.msk.f32.mxu0 %vm426_vm2, %v10295_v53  ;;  %v2489_v53 = vrot.slane %v10999_v13, 1 }
 0x1bc   : > { %8786 = vmatmul.mubr.msk.f32.gmra.mrb[18].mxu0 %vm426_vm2, %v10298_v58  ;;  %v2490_v58 = vrot.slane %v11006_v14, 1 }
 0x1bd   : > { %8788 = vmatprep.mubr.msk.f32.mxu0 %vm426_vm2, %v10317_v26 }
 0x1be   : > { %v2491_v26 = vsel %vm345_vm1, %v2489_v53, %v2490_v58 }
 0x1c0   : > { %8789 = vmatmul.mubr.msk.f32.gmra.mrb[20].mxu0 %vm426_vm2, %v10320_v44  ;;  %v12791_v44 = vld [vmem:[#allocation24_spill] sm:$0xff] }
 0x1c1   : > { %8791 = vmatprep.mubr.msk.f32.mxu0 %vm426_vm2, %v10339_v60  ;;  %v278_v60 = vld [vmem:[%s10068_s27 + $0x1a8] sm:$0x3] }
 0x1c2   : > { %v2761_v11 = vrot.slane %v278_v60, 2 }
 0x1c4   : > { %8792 = vmatmul.mubr.msk.f32.gmra.mrb[22].mxu0 %vm426_vm2, %v10342_v5  ;;  %v2492_v5 = vrot.slane %v278_v60, 1 }
 0x1c5   : > { %8794 = vmatprep.mubr.msk.f32.mxu0 %vm426_vm2, %v10361_v28 }
 0x1c6   : > { %v2493_v28 = vsel %vm345_vm1, %v2490_v58, %v2492_v5 }
 0x1c8   : > { %8795 = vmatmul.mubr.msk.f32.gmra.mrb[24].mxu0 %vm426_vm2, %v10364_v45  ;;  %v12792_v45 = vld [vmem:[#allocation29_spill] sm:$0xff] }
 0x1c9   : > { %8797 = vmatprep.mubr.msk.f32.mxu0 %vm426_vm2, %v10383_v43  ;;  %v12780_v43 = vld [vmem:[#allocation12_spill] sm:$0xff] }
 0x1cc   : > { %8798 = vmatmul.mubr.msk.f32.gmra.mrb[26].mxu0 %vm426_vm2, %v10386_v50  ;;  %v12793_v50 = vld [vmem:[#allocation30_spill] sm:$0xff] }
 0x1cd   : > { %8800 = vmatprep.mubr.msk.f32.mxu0 %vm426_vm2, %v10769_v8  ;;  %v11195_v8 = vld [vmem:[%s12568_s3 + $0x8] sm:$0xf] }
 0x1d0   : > { %8801 = vmatmul.mubr.msk.f32.gmra.mrb[28].mxu0 %vm426_vm2, %v10776_v9  ;;  %v11202_v9 = vld [vmem:[%s12567_s2] ss:$0 sm:$0xff] }
 0x1d1   : > { %8803 = vmatprep.mubr.msk.f32.mxu0 %vm426_vm2, %v10999_v13 }
 0x1d4   : > { %8804 = vmatmul.mubr.msk.f32.gmra.mrb[30].mxu0 %vm426_vm2, %v11006_v14 }
 0x1d5   : > { %8808 = vmatprep.mubr.msk.f32.mxu0 %vm426_vm2, %v10131_v27  ;;  %v12776_v27 = vld [vmem:[#allocation8_spill] sm:$0xff] }
 0x1d8   : > { %8809 = vmatmul.mubr.msk.f32.vlgmr.msra.gmra.mrb[0].mxu0 %vm426_vm2, %v10151_v33  ;;  %v12777_v33 = vld [vmem:[#allocation9_spill] sm:$0xff] }
 0x1d9   : > { %8857 = vmatpush3.msk.msra.mxu0 %vm491_vm0, %v287_v25  ;;  %8811 = vmatprep.mubr.msk.f32.mxu0 %vm426_vm2, %v12738_v24 }
 0x1dc   : > { %8812 = vmatmul.mubr.msk.f32.gmra.mrb[2].mxu0 %vm426_vm2, %v12772_v22 }
 0x1dd   : > { %8814 = vmatprep.mubr.msk.f32.mxu0 %vm426_vm2, %v12773_v23 }
 0x1e0   : > { %8815 = vmatmul.mubr.msk.f32.gmra.mrb[4].mxu0 %vm426_vm2, %v12774_v31 }
 0x1e1   : > { %8817 = vmatprep.mubr.msk.f32.mxu0 %vm426_vm2, %v12775_v32 }
 0x1e4   : > { %8818 = vmatmul.mubr.msk.f32.gmra.mrb[6].mxu0 %vm426_vm2, %v12776_v27 }
 0x1e5   : > { %8820 = vmatprep.mubr.msk.f32.mxu0 %vm426_vm2, %v12777_v33 }
 0x1e8   : > { %8821 = vmatmul.mubr.msk.f32.gmra.mrb[8].mxu0 %vm426_vm2, %v12778_v39 }
 0x1e9   : > { %8823 = vmatprep.mubr.msk.f32.mxu0 %vm426_vm2, %v12779_v40 }
 0x1ec   : > { %8824 = vmatmul.mubr.msk.f32.gmra.mrb[10].mxu0 %vm426_vm2, %v12780_v43 }
 0x1ed   : > { %8826 = vmatprep.mubr.msk.f32.mxu0 %vm426_vm2, %v12781_v47 }
 0x1f0   : > { %8827 = vmatmul.mubr.msk.f32.gmra.mrb[12].mxu0 %vm426_vm2, %v12749_v6 }
 0x1f1   : > { %8829 = vmatprep.mubr.msk.f32.mxu0 %vm426_vm2, %v12782_v48 }
 0x1f4   : > { %8830 = vmatmul.mubr.msk.f32.gmra.mrb[14].mxu0 %vm426_vm2, %v12783_v55 }
 0x1f5   : > { %8832 = vmatprep.mubr.msk.f32.mxu0 %vm426_vm2, %v12784_v56 }
 0x1f8   : > { %8833 = vmatmul.mubr.msk.f32.gmra.mrb[16].mxu0 %vm426_vm2, %v12785_v63 }
 0x1f9   : > { %8835 = vmatprep.mubr.msk.f32.mxu0 %vm426_vm2, %v12786_v0 }
 0x1fc   : > { %8836 = vmatmul.mubr.msk.f32.gmra.mrb[18].mxu0 %vm426_vm2, %v12787_v15 }
 0x1fd   : > { %8838 = vmatprep.mubr.msk.f32.mxu0 %vm426_vm2, %v12788_v16 }
 0x200   : > { %8839 = vmatmul.mubr.msk.f32.gmra.mrb[20].mxu0 %vm426_vm2, %v12789_v34 }
 0x201   : > { %8841 = vmatprep.mubr.msk.f32.mxu0 %vm426_vm2, %v12790_v36 }
 0x204   : > { %8842 = vmatmul.mubr.msk.f32.gmra.mrb[22].mxu0 %vm426_vm2, %v10393_v21  ;;  %v12794_v21 = vld [vmem:[#allocation31_spill] sm:$0xff] }
 0x205   : > { %8844 = vmatprep.mubr.msk.f32.mxu0 %vm426_vm2, %v12791_v44 }
 0x208   : > { %8845 = vmatmul.mubr.msk.f32.gmra.mrb[24].mxu0 %vm426_vm2, %v12758_v51 }
 0x209   : > { %8847 = vmatprep.mubr.msk.f32.mxu0 %vm426_vm2, %v12759_v41 }
 0x20c   : > { %8848 = vmatmul.mubr.msk.f32.gmra.mrb[26].mxu0 %vm426_vm2, %v12760_v19 }
 0x20d   : > { %8850 = vmatprep.mubr.msk.f32.mxu0 %vm426_vm2, %v10847_v10 }
 0x210   : > { %8851 = vmatmul.mubr.msk.f32.gmra.mrb[28].mxu0 %vm426_vm2, %v10854_v61  ;;  %v12795_v61 = vld [vmem:[#allocation32_spill] sm:$0xff] }
 0x211   : > { %8853 = vmatprep.mubr.msk.f32.mxu0 %vm426_vm2, %v2491_v26 }
 0x214   : > { %8854 = vmatmul.mubr.msk.f32.gmra.mrb[30].mxu0 %vm426_vm2, %v2493_v28 }
 0x215   : > { %8858 = vmatprep.mubr.msk.f32.mxu0 %vm426_vm2, %v10522_v7  ;;  %v12796_v7 = vld [vmem:[#allocation33_spill] sm:$0xff] }
 0x218   : > { %8859 = vmatmul.mubr.msk.f32.vlgmr.msra.gmra.mrb[0].mxu0 %vm426_vm2, %v10533_v42  ;;  %v12797_v42 = vld [vmem:[#allocation34_spill] sm:$0xff] }
 0x219   : > { %8861 = vmatprep.mubr.msk.f32.mxu0 %vm426_vm2, %v12761_v37 }
 0x21c   : > { %8862 = vmatmul.mubr.msk.f32.gmra.mrb[2].mxu0 %vm426_vm2, %v10546_v3  ;;  %v12799_v3 = vld [vmem:[#allocation37_spill] sm:$0xff] }
 0x21d   : > { %8864 = vmatprep.mubr.msk.f32.mxu0 %vm426_vm2, %v12792_v45 }
 0x220   : > { %8865 = vmatmul.mubr.msk.f32.gmra.mrb[4].mxu0 %vm426_vm2, %v10559_v57  ;;  %v12798_v57 = vld [vmem:[#allocation36_spill] sm:$0xff] }
 0x221   : > { %8867 = vmatprep.mubr.msk.f32.mxu0 %vm426_vm2, %v12793_v50 }
 0x224   : > { %8868 = vmatmul.mubr.msk.f32.gmra.mrb[6].mxu0 %vm426_vm2, %v10572_v30  ;;  %v12800_v30 = vld [vmem:[#allocation38_spill] sm:$0xff] }
 0x225   : > { %8870 = vmatprep.mubr.msk.f32.mxu0 %vm426_vm2, %v12794_v21 }
 0x228   : > { %8871 = vmatmul.mubr.msk.f32.gmra.mrb[8].mxu0 %vm426_vm2, %v10585_v38  ;;  %v12801_v38 = vld [vmem:[#allocation39_spill] sm:$0xff] }
 0x229   : > { %8873 = vmatprep.mubr.msk.f32.mxu0 %vm426_vm2, %v12795_v61 }
 0x22c   : > { %8874 = vmatmul.mubr.msk.f32.gmra.mrb[10].mxu0 %vm426_vm2, %v10598_v46  ;;  %v12802_v46 = vld [vmem:[#allocation41_spill] sm:$0xff] }
 0x22d   : > { %8876 = vmatprep.mubr.msk.f32.mxu0 %vm426_vm2, %v12796_v7 }
 0x230   : > { %8877 = vmatmul.mubr.msk.f32.gmra.mrb[12].mxu0 %vm426_vm2, %v10611_v54  ;;  %v2758_v54 = vrot.slane %v10999_v13, 2 }
 0x231   : > { %8879 = vmatprep.mubr.msk.f32.mxu0 %vm426_vm2, %v12797_v42 }
 0x234   : > { %8880 = vmatmul.mubr.msk.f32.gmra.mrb[14].mxu0 %vm426_vm2, %v10624_v62  ;;  %v2759_v62 = vrot.slane %v11006_v14, 2 }
 0x235   : > { %8882 = vmatprep.mubr.msk.f32.mxu0 %vm426_vm2, %v12768_v1 }
 0x236   : > { %v2762_v52 = vsel %vm1012_vm3, %v2759_v62, %v2761_v11 }
 0x238   : > { %8883 = vmatmul.mubr.msk.f32.gmra.mrb[16].mxu0 %vm426_vm2, %v12798_v57 }
 0x239   : > { %8885 = vmatprep.mubr.msk.f32.mxu0 %vm426_vm2, %v12799_v3 }
 0x23c   : > { %8886 = vmatmul.mubr.msk.f32.gmra.mrb[18].mxu0 %vm426_vm2, %v10650_v29  ;;  %v2760_v29 = vsel %vm1012_vm3, %v2758_v54, %v2759_v62 }
 0x23d   : > { %8888 = vmatprep.mubr.msk.f32.mxu0 %vm426_vm2, %v12800_v30 }
 0x240   : > { %8889 = vmatmul.mubr.msk.f32.gmra.mrb[20].mxu0 %vm426_vm2, %v12801_v38 }
 0x241   : > { %8891 = vmatprep.mubr.msk.f32.mxu0 %vm426_vm2, %v12771_v12 }
 0x244   : > { %8892 = vmatmul.mubr.msk.f32.gmra.mrb[22].mxu0 %vm426_vm2, %v10676_v18  ;;  %v10014_v18 = vmov 0.0  }
 0x245   : > { %8894 = vmatprep.mubr.msk.f32.mxu0 %vm426_vm2, %v12802_v46  ;;  %3226 = vst.msk [vmem:[#allocation2] sm:$0xff] %vm426_vm2, %v10014_v18  ;;  %3227 = vst.msk [vmem:[#allocation2 + $0x8] sm:$0xff] %vm426_vm2, %v10014_v18 }
 0x246   : > { %3231 = vst.msk [vmem:[#allocation2 + $0x198] sm:$0xff] %vm426_vm2, %v10014_v18  ;;  %3232 = vst.msk [vmem:[#allocation2 + $0x1a0] sm:$0xff] %vm426_vm2, %v10014_v18 }
 0x247   : > { %3229 = vst.msk [vmem:[#allocation2 + $0x10] sm:$0x3] %vm3228_vm4, %v10014_v18  ;;  %3233 = vst.msk [vmem:[#allocation2 + $0x1a8] sm:$0x3] %vm3228_vm4, %v10014_v18 }
 0x248   : > { %8895 = vmatmul.mubr.msk.f32.gmra.mrb[24].mxu0 %vm426_vm2, %v10689_v17  ;;  %3236 = vst.msk [vmem:[#allocation2 + $0x18] sm:$0x1] %vm3235_vm5, %v10014_v18  ;;  %3237 = vst.msk [vmem:[#allocation2 + $0x30] sm:$0x1] %vm3235_vm5, %v10014_v18  ;;  %v289_v17 = vld [vmem:[%s12568_s3 + $0x4] sm:$0xf] }
 0x249   : > { %8897 = vmatprep.mubr.msk.f32.mxu0 %vm426_vm2, %v10693_v49  ;;  %3238 = vst.msk [vmem:[#allocation2 + $0x48] sm:$0x1] %vm3235_vm5, %v10014_v18  ;;  %3239 = vst.msk [vmem:[#allocation2 + $0x60] sm:$0x1] %vm3235_vm5, %v10014_v18  ;;  %8906 = vmatprep.subr.msk.mxu1 %vm491_vm0, %v289_v17 }
 0x24a   : > { %3240 = vst.msk [vmem:[#allocation2 + $0x78] sm:$0x1] %vm3235_vm5, %v10014_v18  ;;  %3241 = vst.msk [vmem:[#allocation2 + $0x90] sm:$0x1] %vm3235_vm5, %v10014_v18  ;;  %8907 = vmatpush3.msk.msra.mxu1 %vm491_vm0, %v289_v17 }
 0x24b   : > { %3242 = vst.msk [vmem:[#allocation2 + $0xa8] sm:$0x1] %vm3235_vm5, %v10014_v18  ;;  %3243 = vst.msk [vmem:[#allocation2 + $0xc0] sm:$0x1] %vm3235_vm5, %v10014_v18 }
 0x24c   : > { %8898 = vmatmul.mubr.msk.f32.gmra.mrb[26].mxu0 %vm426_vm2, %v10700_v2  ;;  %3244 = vst.msk [vmem:[#allocation2 + $0xd8] sm:$0x1] %vm3235_vm5, %v10014_v18  ;;  %3245 = vst.msk [vmem:[#allocation2 + $0xf0] sm:$0x1] %vm3235_vm5, %v10014_v18  ;;  %v288_v2 = vld [vmem:[%s12568_s3] sm:$0xf] }
 0x24d   : > { %8900 = vmatprep.mubr.msk.f32.mxu0 %vm426_vm2, %v10924_v4  ;;  %3246 = vst.msk [vmem:[#allocation2 + $0x108] sm:$0x1] %vm3235_vm5, %v10014_v18  ;;  %3247 = vst.msk [vmem:[#allocation2 + $0x120] sm:$0x1] %vm3235_vm5, %v10014_v18  ;;  %8956 = vmatprep.subr.msk.mxu1 %vm491_vm0, %v288_v2 }
 0x24e   : > { %3248 = vst.msk [vmem:[#allocation2 + $0x138] sm:$0x1] %vm3235_vm5, %v10014_v18  ;;  %3249 = vst.msk [vmem:[#allocation2 + $0x150] sm:$0x1] %vm3235_vm5, %v10014_v18  ;;  %v3333_v49 = vld [vmem:[#allocation2 + $0x9] sm:$0xff] }
 0x24f   : > { %3250 = vst.msk [vmem:[#allocation2 + $0x168] sm:$0x1] %vm3235_vm5, %v10014_v18  ;;  %3251 = vst.msk [vmem:[#allocation2 + $0x180] sm:$0x1] %vm3235_vm5, %v10014_v18 }
 0x250   : > { %8901 = vmatmul.mubr.msk.f32.gmra.mrb[28].mxu0 %vm426_vm2, %v10931_v59  ;;  %3252 = vst.msk [vmem:[#allocation2 + $0x29] sm:$0x1] %vm3235_vm5, %v10014_v18  ;;  %3253 = vst.msk [vmem:[#allocation2 + $0x41] sm:$0x1] %vm3235_vm5, %v10014_v18  ;;  %v3332_v59 = vld [vmem:[#allocation2 + $0x1] sm:$0xff] }
 0x251   : > { %8903 = vmatprep.mubr.msk.f32.mxu0 %vm426_vm2, %v2760_v29  ;;  %3254 = vst.msk [vmem:[#allocation2 + $0x59] sm:$0x1] %vm3235_vm5, %v10014_v18  ;;  %3255 = vst.msk [vmem:[#allocation2 + $0x71] sm:$0x1] %vm3235_vm5, %v10014_v18  ;;  %8908 = vmatprep.mubr.msk.f32.mxu1 %vm426_vm2, %v3332_v59 }
 0x252   : > { %3256 = vst.msk [vmem:[#allocation2 + $0x89] sm:$0x1] %vm3235_vm5, %v10014_v18  ;;  %3257 = vst.msk [vmem:[#allocation2 + $0xa1] sm:$0x1] %vm3235_vm5, %v10014_v18  ;;  %8909 = vmatmul.mubr.msk.f32.vlgmr.msra.gmra.mrb[0].mxu1 %vm426_vm2, %v3333_v49 }
 0x253   : > { %3258 = vst.msk [vmem:[#allocation2 + $0xb9] sm:$0x1] %vm3235_vm5, %v10014_v18  ;;  %3259 = vst.msk [vmem:[#allocation2 + $0xd1] sm:$0x1] %vm3235_vm5, %v10014_v18  ;;  %8957 = vmatpush3.msk.msra.mxu1 %vm491_vm0, %v288_v2 }
 0x254   : > { %8904 = vmatmul.mubr.msk.f32.gmra.mrb[30].mxu0 %vm426_vm2, %v2762_v52  ;;  %3260 = vst.msk [vmem:[#allocation2 + $0xe9] sm:$0x1] %vm3235_vm5, %v10014_v18  ;;  %3261 = vst.msk [vmem:[#allocation2 + $0x101] sm:$0x1] %vm3235_vm5, %v10014_v18  ;;  %9006 = vmatprep.subr.msk.mxu1 %vm491_vm0, %v11195_v8 }
 0x255   : > { %3262 = vst.msk [vmem:[#allocation2 + $0x119] sm:$0x1] %vm3235_vm5, %v10014_v18  ;;  %3263 = vst.msk [vmem:[#allocation2 + $0x131] sm:$0x1] %vm3235_vm5, %v10014_v18 }
 0x256   : > { %3264 = vst.msk [vmem:[#allocation2 + $0x149] sm:$0x1] %vm3235_vm5, %v10014_v18  ;;  %3265 = vst.msk [vmem:[#allocation2 + $0x161] sm:$0x1] %vm3235_vm5, %v10014_v18 }
 0x257   : > { %3266 = vst.msk [vmem:[#allocation2 + $0x179] sm:$0x1] %vm3235_vm5, %v10014_v18  ;;  %3267 = vst.msk [vmem:[#allocation2 + $0x191] sm:$0x1] %vm3235_vm5, %v10014_v18 }
 0x2eb   : > { %v8860_v24 = vpop.f32.mrb[0].mxu0 }
 0x2ec   : > { %v3035_v41 = vadd.f32 %v8860_v24, %v11202_v9  ;;  %v2836_v6 = vpop.f32.mrb[1].mxu0 }
 0x2ed   : > { %v3034_v10 = vadd.f32 %v11202_v9, %v2836_v6 }
 0x2ee   : > { %v3067_v19 = vmul.f32 0.5, %v3035_v41 }
 0x2ef   : > { %v3066_v51 = vmul.f32 0.5, %v3034_v10  ;;  %v8863_v20 = vpop.f32.mrb[2].mxu0 }
 0x2f0   : > { %9878 = vtanh.f32 %v3067_v19  ;;  %v3037_v37 = vadd.f32 %v8863_v20, %v11202_v9  ;;  %v2846_v4 = vpop.f32.mrb[3].mxu0 }
 0x2f1   : > { %9880 = vtanh.f32 %v3066_v51  ;;  %v3036_v12 = vadd.f32 %v11202_v9, %v2846_v4 }
 0x2f2   : > { %v3069_v1 = vmul.f32 0.5, %v3037_v37 }
 0x2f3   : > { %v3068_v35 = vmul.f32 0.5, %v3036_v12  ;;  %v8866_v25 = vpop.f32.mrb[4].mxu0 }
 0x2f4   : > { %9882 = vtanh.f32 %v3069_v1  ;;  %v11209_v13 = vadd.f32 %v8866_v25, %v11202_v9  ;;  %v2856_v14 = vpop.f32.mrb[5].mxu0 }
 0x2f5   : > { %9884 = vtanh.f32 %v3068_v35  ;;  %v11212_v22 = vadd.f32 %v11202_v9, %v2856_v14 }
 0x2f6   : > { %v3071_v23 = vmul.f32 0.5, %v11209_v13 }
 0x2f7   : > { %v3070_v31 = vmul.f32 0.5, %v11212_v22  ;;  %v8869_v32 = vpop.f32.mrb[6].mxu0 }
 0x2f8   : > { %9886 = vtanh.f32 %v3071_v23  ;;  %v11217_v27 = vadd.f32 %v8869_v32, %v11202_v9  ;;  %v2866_v33 = vpop.f32.mrb[7].mxu0 }
 0x2f9   : > { %9888 = vtanh.f32 %v3070_v31  ;;  %v11220_v39 = vadd.f32 %v11202_v9, %v2866_v33 }
 0x2fa   : > { %v9879_v40 = vpop.eup %9878  ;;  %v3073_v43 = vmul.f32 0.5, %v11217_v27 }
 0x2fb   : > { %v9881_v47 = vpop.eup %9880  ;;  %v3131_v48 = vmul.f32 0.5, %v9879_v40  ;;  %v3072_v55 = vmul.f32 0.5, %v11220_v39  ;;  %v8872_v56 = vpop.f32.mrb[8].mxu0 }
 0x2fc   : > { %v3130_v63 = vmul.f32 0.5, %v9881_v47  ;;  %9890 = vtanh.f32 %v3073_v43  ;;  %v11225_v0 = vadd.f32 %v8872_v56, %v11202_v9  ;;  %v2876_v15 = vpop.f32.mrb[9].mxu0 }
 0x2fd   : > { %v3163_v16 = vadd.f32 0.5, %v3131_v48  ;;  %9892 = vtanh.f32 %v3072_v55  ;;  %v11228_v34 = vadd.f32 %v11202_v9, %v2876_v15 }
 0x2fe   : > { %v9883_v36 = vpop.eup %9882  ;;  %v3162_v44 = vadd.f32 0.5, %v3130_v63  ;;  %v3075_v53 = vmul.f32 0.5, %v11225_v0 }
 0x2ff   : > { %v9885_v58 = vpop.eup %9884  ;;  %v3195_v60 = vmul.f32 %v3163_v16, %v3035_v41  ;;  %v3133_v5 = vmul.f32 0.5, %v9883_v36  ;;  %v3074_v26 = vmul.f32 0.5, %v11228_v34  ;;  %v8875_v28 = vpop.f32.mrb[10].mxu0 }
 0x300   : > { %v3194_v45 = vmul.f32 %v3162_v44, %v3034_v10  ;;  %v3132_v50 = vmul.f32 0.5, %v9885_v58  ;;  %9894 = vtanh.f32 %v3075_v53  ;;  %v11233_v21 = vadd.f32 %v8875_v28, %v11202_v9  ;;  %v2886_v61 = vpop.f32.mrb[11].mxu0 }
 0x301   : > { %3269 = vst.msk [vmem:[#allocation2 + $0x21] sm:$0xff] %vm426_vm2, %v3195_v60  ;;  %v3165_v7 = vadd.f32 0.5, %v3133_v5  ;;  %9896 = vtanh.f32 %v3074_v26  ;;  %v11237_v42 = vadd.f32 %v11202_v9, %v2886_v61 }
 0x302   : > { %v9887_v57 = vpop.eup %9886  ;;  %3268 = vst.msk [vmem:[#allocation2 + $0x19] sm:$0xff] %vm426_vm2, %v3194_v45  ;;  %v3164_v3 = vadd.f32 0.5, %v3132_v50  ;;  %v3077_v30 = vmul.f32 0.5, %v11233_v21 }
 0x303   : > { %v9889_v38 = vpop.eup %9888  ;;  %v3197_v46 = vmul.f32 %v3165_v7, %v3037_v37  ;;  %v3135_v54 = vmul.f32 0.5, %v9887_v57  ;;  %v3076_v62 = vmul.f32 0.5, %v11237_v42  ;;  %v8878_v11 = vpop.f32.mrb[12].mxu0 }
 0x304   : > { %v3196_v29 = vmul.f32 %v3164_v3, %v3036_v12  ;;  %v3134_v52 = vmul.f32 0.5, %v9889_v38  ;;  %9898 = vtanh.f32 %v3077_v30  ;;  %v11243_v18 = vadd.f32 %v8878_v11, %v11202_v9  ;;  %v2896_v17 = vpop.f32.mrb[13].mxu0 }
 0x305   : > { %3271 = vst.msk [vmem:[#allocation2 + $0x39] sm:$0xff] %vm426_vm2, %v3197_v46  ;;  %v3167_v59 = vadd.f32 0.5, %v3135_v54  ;;  %9900 = vtanh.f32 %v3076_v62  ;;  %v11247_v49 = vadd.f32 %v11202_v9, %v2896_v17 }
 0x306   : > { %v9891_v2 = vpop.eup %9890  ;;  %3270 = vst.msk [vmem:[#allocation2 + $0x31] sm:$0xff] %vm426_vm2, %v3196_v29  ;;  %v3166_v24 = vadd.f32 0.5, %v3134_v52  ;;  %v3079_v41 = vmul.f32 0.5, %v11243_v18 }
 0x307   : > { %v9893_v6 = vpop.eup %9892  ;;  %v3199_v10 = vmul.f32 %v3167_v59, %v11209_v13  ;;  %v3137_v19 = vmul.f32 0.5, %v9891_v2  ;;  %v3078_v51 = vmul.f32 0.5, %v11247_v49  ;;  %v8881_v20 = vpop.f32.mrb[14].mxu0 }
 0x308   : > { %v3198_v37 = vmul.f32 %v3166_v24, %v11212_v22  ;;  %v3136_v4 = vmul.f32 0.5, %v9893_v6  ;;  %9902 = vtanh.f32 %v3079_v41  ;;  %v11255_v12 = vadd.f32 %v8881_v20, %v11202_v9  ;;  %v2906_v1 = vpop.f32.mrb[15].mxu0  ;;  %v11267_v31 = vld [vmem:[#allocation2 + $0x21] sm:$0xff] }
 0x309   : > { %3273 = vst.msk [vmem:[#allocation2 + $0x51] sm:$0xff] %vm426_vm2, %v3199_v10  ;;  %v3169_v35 = vadd.f32 0.5, %v3137_v19  ;;  %9904 = vtanh.f32 %v3078_v51  ;;  %v11259_v25 = vadd.f32 %v11202_v9, %v2906_v1  ;;  %v11261_v13 = vld [vmem:[#allocation2 + $0x19] sm:$0xff] }
 0x30a   : > { %v9895_v14 = vpop.eup %9894  ;;  %3272 = vst.msk [vmem:[#allocation2 + $0x49] sm:$0xff] %vm426_vm2, %v3198_v37  ;;  %v3168_v23 = vadd.f32 0.5, %v3136_v4  ;;  %v3081_v22 = vmul.f32 0.5, %v11255_v12  ;;  %8911 = vmatprep.mubr.msk.f32.mxu1 %vm426_vm2, %v11261_v13 }
 0x30b   : > { %v9897_v32 = vpop.eup %9896  ;;  %v3201_v33 = vmul.f32 %v3169_v35, %v11217_v27  ;;  %v3139_v40 = vmul.f32 0.5, %v9895_v14  ;;  %v3080_v43 = vmul.f32 0.5, %v11259_v25  ;;  %v8884_v47 = vpop.f32.mrb[16].mxu0  ;;  %8912 = vmatmul.mubr.msk.f32.gmra.mrb[2].mxu1 %vm426_vm2, %v11267_v31 }
 0x30c   : > { %v3200_v48 = vmul.f32 %v3168_v23, %v11220_v39  ;;  %v3138_v55 = vmul.f32 0.5, %v9897_v32  ;;  %9906 = vtanh.f32 %v3081_v22  ;;  %v11275_v56 = vadd.f32 %v8884_v47, %v11202_v9  ;;  %v2916_v63 = vpop.f32.mrb[17].mxu0  ;;  %v11287_v53 = vld [vmem:[#allocation2 + $0x39] sm:$0xff] }
 0x30d   : > { %3275 = vst.msk [vmem:[#allocation2 + $0x69] sm:$0xff] %vm426_vm2, %v3201_v33  ;;  %v3171_v15 = vadd.f32 0.5, %v3139_v40  ;;  %9908 = vtanh.f32 %v3080_v43  ;;  %v11279_v27 = vadd.f32 %v11202_v9, %v2916_v63  ;;  %v11281_v16 = vld [vmem:[#allocation2 + $0x31] sm:$0xff] }
 0x30e   : > { %v9899_v36 = vpop.eup %9898  ;;  %3274 = vst.msk [vmem:[#allocation2 + $0x61] sm:$0xff] %vm426_vm2, %v3200_v48  ;;  %v3170_v44 = vadd.f32 0.5, %v3138_v55  ;;  %v3083_v39 = vmul.f32 0.5, %v11275_v56  ;;  %8914 = vmatprep.mubr.msk.f32.mxu1 %vm426_vm2, %v11281_v16 }
 0x30f   : > { %v9901_v58 = vpop.eup %9900  ;;  %v3203_v60 = vmul.f32 %v3171_v15, %v11225_v0  ;;  %v3141_v5 = vmul.f32 0.5, %v9899_v36  ;;  %v3082_v26 = vmul.f32 0.5, %v11279_v27  ;;  %v8887_v28 = vpop.f32.mrb[18].mxu0  ;;  %8915 = vmatmul.mubr.msk.f32.gmra.mrb[4].mxu1 %vm426_vm2, %v11287_v53 }
 0x310   : > { %v3202_v45 = vmul.f32 %v3170_v44, %v11228_v34  ;;  %v3140_v50 = vmul.f32 0.5, %v9901_v58  ;;  %9910 = vtanh.f32 %v3083_v39  ;;  %v11295_v61 = vadd.f32 %v8887_v28, %v11202_v9  ;;  %v2926_v7 = vpop.f32.mrb[19].mxu0  ;;  %v11307_v46 = vld [vmem:[#allocation2 + $0x51] sm:$0xff] }
 0x311   : > { %3277 = vst.msk [vmem:[#allocation2 + $0x81] sm:$0xff] %vm426_vm2, %v3203_v60  ;;  %v3173_v57 = vadd.f32 0.5, %v3141_v5  ;;  %9912 = vtanh.f32 %v3082_v26  ;;  %v11299_v0 = vadd.f32 %v11202_v9, %v2926_v7  ;;  %v11301_v3 = vld [vmem:[#allocation2 + $0x49] sm:$0xff] }
 0x312   : > { %v9903_v30 = vpop.eup %9902  ;;  %3276 = vst.msk [vmem:[#allocation2 + $0x79] sm:$0xff] %vm426_vm2, %v3202_v45  ;;  %v3172_v38 = vadd.f32 0.5, %v3140_v50  ;;  %v3085_v34 = vmul.f32 0.5, %v11295_v61  ;;  %8917 = vmatprep.mubr.msk.f32.mxu1 %vm426_vm2, %v11301_v3 }
 0x313   : > { %v9905_v54 = vpop.eup %9904  ;;  %v3205_v62 = vmul.f32 %v3173_v57, %v11233_v21  ;;  %v3143_v11 = vmul.f32 0.5, %v9903_v30  ;;  %v3084_v29 = vmul.f32 0.5, %v11299_v0  ;;  %v8890_v52 = vpop.f32.mrb[20].mxu0  ;;  %8918 = vmatmul.mubr.msk.f32.gmra.mrb[6].mxu1 %vm426_vm2, %v11307_v46 }
 0x314   : > { %v3204_v17 = vmul.f32 %v3172_v38, %v11237_v42  ;;  %v3142_v59 = vmul.f32 0.5, %v9905_v54  ;;  %9914 = vtanh.f32 %v3085_v34  ;;  %v11315_v2 = vadd.f32 %v8890_v52, %v11202_v9  ;;  %v2936_v24 = vpop.f32.mrb[21].mxu0  ;;  %v11327_v51 = vld [vmem:[#allocation2 + $0x69] sm:$0xff] }
 0x315   : > { %3279 = vst.msk [vmem:[#allocation2 + $0x99] sm:$0xff] %vm426_vm2, %v3205_v62  ;;  %v3175_v41 = vadd.f32 0.5, %v3143_v11  ;;  %9916 = vtanh.f32 %v3084_v29  ;;  %v11319_v21 = vadd.f32 %v11202_v9, %v2936_v24  ;;  %v11321_v6 = vld [vmem:[#allocation2 + $0x61] sm:$0xff] }
 0x316   : > { %v9907_v10 = vpop.eup %9906  ;;  %3278 = vst.msk [vmem:[#allocation2 + $0x91] sm:$0xff] %vm426_vm2, %v3204_v17  ;;  %v3174_v19 = vadd.f32 0.5, %v3142_v59  ;;  %v3087_v42 = vmul.f32 0.5, %v11315_v2  ;;  %8920 = vmatprep.mubr.msk.f32.mxu1 %vm426_vm2, %v11321_v6 }
 0x317   : > { %v9909_v20 = vpop.eup %9908  ;;  %v3207_v37 = vmul.f32 %v3175_v41, %v11243_v18  ;;  %v3145_v4 = vmul.f32 0.5, %v9907_v10  ;;  %v3086_v1 = vmul.f32 0.5, %v11319_v21  ;;  %v8893_v35 = vpop.f32.mrb[22].mxu0  ;;  %8921 = vmatmul.mubr.msk.f32.gmra.mrb[8].mxu1 %vm426_vm2, %v11327_v51 }
 0x318   : > { %v3206_v14 = vmul.f32 %v3174_v19, %v11247_v49  ;;  %v3144_v23 = vmul.f32 0.5, %v9909_v20  ;;  %9918 = vtanh.f32 %v3087_v42  ;;  %v11335_v22 = vadd.f32 %v8893_v35, %v11202_v9  ;;  %v2946_v32 = vpop.f32.mrb[23].mxu0  ;;  %v11347_v48 = vld [vmem:[#allocation2 + $0x81] sm:$0xff] }
 0x319   : > { %3281 = vst.msk [vmem:[#allocation2 + $0xb1] sm:$0xff] %vm426_vm2, %v3207_v37  ;;  %v3177_v33 = vadd.f32 0.5, %v3145_v4  ;;  %9920 = vtanh.f32 %v3086_v1  ;;  %v11339_v18 = vadd.f32 %v11202_v9, %v2946_v32  ;;  %v11341_v40 = vld [vmem:[#allocation2 + $0x79] sm:$0xff] }
 0x31a   : > { %v9911_v43 = vpop.eup %9910  ;;  %3280 = vst.msk [vmem:[#allocation2 + $0xa9] sm:$0xff] %vm426_vm2, %v3206_v14  ;;  %v3176_v47 = vadd.f32 0.5, %v3144_v23  ;;  %v3089_v49 = vmul.f32 0.5, %v11335_v22  ;;  %8923 = vmatprep.mubr.msk.f32.mxu1 %vm426_vm2, %v11341_v40 }
 0x31b   : > { %v9913_v55 = vpop.eup %9912  ;;  %v3209_v63 = vmul.f32 %v3177_v33, %v11255_v12  ;;  %v3147_v15 = vmul.f32 0.5, %v9911_v43  ;;  %v3088_v36 = vmul.f32 0.5, %v11339_v18  ;;  %v8896_v44 = vpop.f32.mrb[24].mxu0  ;;  %8924 = vmatmul.mubr.msk.f32.gmra.mrb[10].mxu1 %vm426_vm2, %v11347_v48 }
 0x31c   : > { %v3208_v39 = vmul.f32 %v3176_v47, %v11259_v25  ;;  %v3146_v58 = vmul.f32 0.5, %v9913_v55  ;;  %9922 = vtanh.f32 %v3089_v49  ;;  %v11355_v60 = vadd.f32 %v8896_v44, %v11202_v9  ;;  %v2956_v5 = vpop.f32.mrb[25].mxu0  ;;  %v11367_v7 = vld [vmem:[#allocation2 + $0x99] sm:$0xff] }
 0x31d   : > { %3283 = vst.msk [vmem:[#allocation2 + $0xc9] sm:$0xff] %vm426_vm2, %v3209_v63  ;;  %v3179_v26 = vadd.f32 0.5, %v3147_v15  ;;  %9924 = vtanh.f32 %v3088_v36  ;;  %v11359_v12 = vadd.f32 %v11202_v9, %v2956_v5  ;;  %v11361_v28 = vld [vmem:[#allocation2 + $0x91] sm:$0xff] }
 0x31e   : > { %v9915_v45 = vpop.eup %9914  ;;  %3282 = vst.msk [vmem:[#allocation2 + $0xc1] sm:$0xff] %vm426_vm2, %v3208_v39  ;;  %v3178_v50 = vadd.f32 0.5, %v3146_v58  ;;  %v3091_v25 = vmul.f32 0.5, %v11355_v60  ;;  %8926 = vmatprep.mubr.msk.f32.mxu1 %vm426_vm2, %v11361_v28 }
 0x31f   : > { %v9917_v57 = vpop.eup %9916  ;;  %v3211_v30 = vmul.f32 %v3179_v26, %v11275_v56  ;;  %v3149_v38 = vmul.f32 0.5, %v9915_v45  ;;  %v3090_v34 = vmul.f32 0.5, %v11359_v12  ;;  %v8899_v54 = vpop.f32.mrb[26].mxu0  ;;  %8927 = vmatmul.mubr.msk.f32.gmra.mrb[12].mxu1 %vm426_vm2, %v11367_v7 }
 0x320   : > { %v3210_v62 = vmul.f32 %v3178_v50, %v11279_v27  ;;  %v3148_v11 = vmul.f32 0.5, %v9917_v57  ;;  %9926 = vtanh.f32 %v3091_v25  ;;  %v11375_v29 = vadd.f32 %v8899_v54, %v11202_v9  ;;  %v2966_v52 = vpop.f32.mrb[27].mxu0  ;;  %v11387_v10 = vld [vmem:[#allocation2 + $0xb1] sm:$0xff] }
 0x321   : > { %3285 = vst.msk [vmem:[#allocation2 + $0xe1] sm:$0xff] %vm426_vm2, %v3211_v30  ;;  %v3181_v17 = vadd.f32 0.5, %v3149_v38  ;;  %9928 = vtanh.f32 %v3090_v34  ;;  %v11379_v56 = vadd.f32 %v11202_v9, %v2966_v52  ;;  %v11381_v59 = vld [vmem:[#allocation2 + $0xa9] sm:$0xff] }
 0x322   : > { %v9919_v24 = vpop.eup %9918  ;;  %3284 = vst.msk [vmem:[#allocation2 + $0xd9] sm:$0xff] %vm426_vm2, %v3210_v62  ;;  %v3180_v41 = vadd.f32 0.5, %v3148_v11  ;;  %v3093_v27 = vmul.f32 0.5, %v11375_v29  ;;  %8929 = vmatprep.mubr.msk.f32.mxu1 %vm426_vm2, %v11381_v59 }
 0x323   : > { %v9921_v19 = vpop.eup %9920  ;;  %v3213_v42 = vmul.f32 %v3181_v17, %v11295_v61  ;;  %v3151_v20 = vmul.f32 0.5, %v9919_v24  ;;  %v3092_v37 = vmul.f32 0.5, %v11379_v56  ;;  %v8902_v4 = vpop.f32.mrb[28].mxu0  ;;  %8930 = vmatmul.mubr.msk.f32.gmra.mrb[14].mxu1 %vm426_vm2, %v11387_v10 }
 0x324   : > { %v3212_v1 = vmul.f32 %v3180_v41, %v11299_v0  ;;  %v3150_v35 = vmul.f32 0.5, %v9921_v19  ;;  %9930 = vtanh.f32 %v3093_v27  ;;  %v11395_v14 = vadd.f32 %v8902_v4, %v11202_v9  ;;  %v2976_v23 = vpop.f32.mrb[29].mxu0  ;;  %v11407_v49 = vld [vmem:[#allocation2 + $0xc9] sm:$0xff] }
 0x325   : > { %3287 = vst.msk [vmem:[#allocation2 + $0xf9] sm:$0xff] %vm426_vm2, %v3213_v42  ;;  %v3183_v32 = vadd.f32 0.5, %v3151_v20  ;;  %9932 = vtanh.f32 %v3092_v37  ;;  %v11399_v61 = vadd.f32 %v11202_v9, %v2976_v23  ;;  %v11401_v33 = vld [vmem:[#allocation2 + $0xc1] sm:$0xff] }
 0x326   : > { %v9923_v43 = vpop.eup %9922  ;;  %3286 = vst.msk [vmem:[#allocation2 + $0xf1] sm:$0xff] %vm426_vm2, %v3212_v1  ;;  %v3182_v47 = vadd.f32 0.5, %v3150_v35  ;;  %v3095_v0 = vmul.f32 0.5, %v11395_v14  ;;  %8932 = vmatprep.mubr.msk.f32.mxu1 %vm426_vm2, %v11401_v33 }
 0x327   : > { %v9925_v55 = vpop.eup %9924  ;;  %v3215_v63 = vmul.f32 %v3183_v32, %v11315_v2  ;;  %v3153_v15 = vmul.f32 0.5, %v9923_v43  ;;  %v3094_v36 = vmul.f32 0.5, %v11399_v61  ;;  %v8905_v44 = vpop.f32.mrb[30].mxu0  ;;  %8933 = vmatmul.mubr.msk.f32.gmra.mrb[16].mxu1 %vm426_vm2, %v11407_v49 }
 0x328   : > { %v3214_v39 = vmul.f32 %v3182_v47, %v11319_v21  ;;  %v3152_v58 = vmul.f32 0.5, %v9925_v55  ;;  %9934 = vtanh.f32 %v3095_v0  ;;  %v11415_v5 = vadd.f32 %v8905_v44, %v11202_v9  ;;  %v2986_v26 = vpop.f32.mrb[31].mxu0  ;;  %v11427_v30 = vld [vmem:[#allocation2 + $0xe1] sm:$0xff] }
 0x329   : > { %3289 = vst.msk [vmem:[#allocation2 + $0x111] sm:$0xff] %vm426_vm2, %v3215_v63  ;;  %v3185_v45 = vadd.f32 0.5, %v3153_v15  ;;  %9936 = vtanh.f32 %v3094_v36  ;;  %v11419_v2 = vadd.f32 %v11202_v9, %v2986_v26  ;;  %v11421_v50 = vld [vmem:[#allocation2 + $0xd9] sm:$0xff] }
 0x32a   : > { %v9927_v25 = vpop.eup %9926  ;;  %3288 = vst.msk [vmem:[#allocation2 + $0x109] sm:$0xff] %vm426_vm2, %v3214_v39  ;;  %v3184_v57 = vadd.f32 0.5, %v3152_v58  ;;  %v3097_v21 = vmul.f32 0.5, %v11415_v5  ;;  %8935 = vmatprep.mubr.msk.f32.mxu1 %vm426_vm2, %v11421_v50 }
 0x32b   : > { %v9929_v38 = vpop.eup %9928  ;;  %v3217_v34 = vmul.f32 %v3185_v45, %v11335_v22  ;;  %v3155_v54 = vmul.f32 0.5, %v9927_v25  ;;  %v3096_v9 = vmul.f32 0.5, %v11419_v2  ;;  %8936 = vmatmul.mubr.msk.f32.gmra.mrb[18].mxu1 %vm426_vm2, %v11427_v30 }
 0x32c   : > { %v3216_v62 = vmul.f32 %v3184_v57, %v11339_v18  ;;  %v3154_v11 = vmul.f32 0.5, %v9929_v38  ;;  %9938 = vtanh.f32 %v3097_v21  ;;  %v11440_v41 = vld [vmem:[#allocation2 + $0xf9] sm:$0xff] }
 0x32d   : > { %3291 = vst.msk [vmem:[#allocation2 + $0x129] sm:$0xff] %vm426_vm2, %v3217_v34  ;;  %v3187_v52 = vadd.f32 0.5, %v3155_v54  ;;  %9940 = vtanh.f32 %v3096_v9  ;;  %v11435_v17 = vld [vmem:[#allocation2 + $0xf1] sm:$0xff]  ;;  %v3300_v34 = vld [vmem:[#allocation2] sm:$0xff]  ;;  %v3301_v54 = vld [vmem:[#allocation2 + $0x8] sm:$0xff] }
 0x32e   : > { %v9931_v24 = vpop.eup %9930  ;;  %3290 = vst.msk [vmem:[#allocation2 + $0x121] sm:$0xff] %vm426_vm2, %v3216_v62  ;;  %v3186_v22 = vadd.f32 0.5, %v3154_v11  ;;  %8938 = vmatprep.mubr.msk.f32.mxu1 %vm426_vm2, %v11435_v17  ;;  %v11504_v9 = vld [vmem:[%s12568_s3 + $0xc] sm:$0xf]  ;;  %v11507_v62 = vld [vmem:[#allocation2 + $0x18] sm:$0xff]  ;;  %v11515_v11 = vld [vmem:[#allocation2 + $0x20] sm:$0xff] }
 0x32f   : > { %v9933_v27 = vpop.eup %9932  ;;  %v3219_v18 = vmul.f32 %v3187_v52, %v11355_v60  ;;  %v3157_v19 = vmul.f32 0.5, %v9931_v24  ;;  %8939 = vmatmul.mubr.msk.f32.gmra.mrb[20].mxu1 %vm426_vm2, %v11440_v41  ;;  %v11519_v52 = vld [vmem:[#allocation2 + $0x30] sm:$0xff]  ;;  %v11523_v24 = vld [vmem:[#allocation2 + $0x38] sm:$0xff] }
 0x330   : > { %v3218_v42 = vmul.f32 %v3186_v22, %v11359_v12  ;;  %v3156_v20 = vmul.f32 0.5, %v9933_v27  ;;  %v11452_v60 = vld [vmem:[#allocation2 + $0x111] sm:$0xff]  ;;  %v11535_v27 = vld [vmem:[#allocation2 + $0x60] sm:$0xff] }
 0x331   : > { %3293 = vst.msk [vmem:[#allocation2 + $0x141] sm:$0xff] %vm426_vm2, %v3219_v18  ;;  %v3189_v37 = vadd.f32 0.5, %v3157_v19  ;;  %v11447_v4 = vld [vmem:[#allocation2 + $0x109] sm:$0xff]  ;;  %v11543_v19 = vld [vmem:[#allocation2 + $0x78] sm:$0xff] }
 0x332   : > { %v9935_v1 = vpop.eup %9934  ;;  %3292 = vst.msk [vmem:[#allocation2 + $0x139] sm:$0xff] %vm426_vm2, %v3218_v42  ;;  %v3188_v35 = vadd.f32 0.5, %v3156_v20  ;;  %8941 = vmatprep.mubr.msk.f32.mxu1 %vm426_vm2, %v11447_v4  ;;  %v11531_v22 = vld [vmem:[#allocation2 + $0x50] sm:$0xff]  ;;  %v11539_v18 = vld [vmem:[#allocation2 + $0x68] sm:$0xff]  ;;  %v11547_v42 = vld [vmem:[#allocation2 + $0x80] sm:$0xff] }
 0x333   : > { %v9937_v23 = vpop.eup %9936  ;;  %v3221_v32 = vmul.f32 %v3189_v37, %v11375_v29  ;;  %v3159_v43 = vmul.f32 0.5, %v9935_v1  ;;  %8942 = vmatmul.mubr.msk.f32.gmra.mrb[22].mxu1 %vm426_vm2, %v11452_v60  ;;  %v11551_v20 = vld [vmem:[#allocation2 + $0x90] sm:$0xff]  ;;  %v11555_v37 = vld [vmem:[#allocation2 + $0x98] sm:$0xff]  ;;  %v11559_v1 = vld [vmem:[#allocation2 + $0xa8] sm:$0xff] }
 0x334   : > { %v3220_v12 = vmul.f32 %v3188_v35, %v11379_v56  ;;  %v3158_v47 = vmul.f32 0.5, %v9937_v23  ;;  %v11464_v29 = vld [vmem:[#allocation2 + $0x129] sm:$0xff]  ;;  %v11567_v23 = vld [vmem:[#allocation2 + $0xc0] sm:$0xff] }
 0x335   : > { %3295 = vst.msk [vmem:[#allocation2 + $0x159] sm:$0xff] %vm426_vm2, %v3221_v32  ;;  %v3191_v0 = vadd.f32 0.5, %v3159_v43  ;;  %v11459_v55 = vld [vmem:[#allocation2 + $0x121] sm:$0xff]  ;;  %v11563_v35 = vld [vmem:[#allocation2 + $0xb0] sm:$0xff]  ;;  %v11575_v43 = vld [vmem:[#allocation2 + $0xd8] sm:$0xff] }
 0x336   : > { %v9939_v63 = vpop.eup %9938  ;;  %3294 = vst.msk [vmem:[#allocation2 + $0x151] sm:$0xff] %vm426_vm2, %v3220_v12  ;;  %v3190_v15 = vadd.f32 0.5, %v3158_v47  ;;  %8944 = vmatprep.mubr.msk.f32.mxu1 %vm426_vm2, %v11459_v55  ;;  %v11571_v32 = vld [vmem:[#allocation2 + $0xc8] sm:$0xff]  ;;  %v11579_v12 = vld [vmem:[#allocation2 + $0xe0] sm:$0xff]  ;;  %v11583_v47 = vld [vmem:[#allocation2 + $0xf0] sm:$0xff] }
 0x337   : > { %v9941_v36 = vpop.eup %9940  ;;  %v3223_v44 = vmul.f32 %v3191_v0, %v11395_v14  ;;  %v3161_v39 = vmul.f32 0.5, %v9939_v63  ;;  %8945 = vmatmul.mubr.msk.f32.gmra.mrb[24].mxu1 %vm426_vm2, %v11464_v29  ;;  %v11587_v0 = vld [vmem:[#allocation2 + $0xf8] sm:$0xff]  ;;  %v11591_v63 = vld [vmem:[#allocation2 + $0x108] sm:$0xff] }
 0x338   : > { %v3222_v56 = vmul.f32 %v3190_v15, %v11399_v61  ;;  %v3160_v58 = vmul.f32 0.5, %v9941_v36  ;;  %v11476_v57 = vld [vmem:[#allocation2 + $0x141] sm:$0xff]  ;;  %v11595_v15 = vld [vmem:[#allocation2 + $0x110] sm:$0xff] }
 0x339   : > { %3297 = vst.msk [vmem:[#allocation2 + $0x171] sm:$0xff] %vm426_vm2, %v3223_v44  ;;  %v3193_v26 = vadd.f32 0.5, %v3161_v39  ;;  %v11471_v45 = vld [vmem:[#allocation2 + $0x139] sm:$0xff]  ;;  %v11603_v44 = vld [vmem:[#allocation2 + $0x128] sm:$0xff] }
 0x33a   : > { %3296 = vst.msk [vmem:[#allocation2 + $0x169] sm:$0xff] %vm426_vm2, %v3222_v56  ;;  %v3192_v25 = vadd.f32 0.5, %v3160_v58  ;;  %8947 = vmatprep.mubr.msk.f32.mxu1 %vm426_vm2, %v11471_v45  ;;  %v11599_v36 = vld [vmem:[#allocation2 + $0x120] sm:$0xff]  ;;  %v11607_v39 = vld [vmem:[#allocation2 + $0x138] sm:$0xff] }
 0x33b   : > { %v3225_v14 = vmul.f32 %v3193_v26, %v11415_v5  ;;  %8948 = vmatmul.mubr.msk.f32.gmra.mrb[26].mxu1 %vm426_vm2, %v11476_v57  ;;  %v11611_v56 = vld [vmem:[#allocation2 + $0x140] sm:$0xff] }
 0x33c   : > { %v3224_v61 = vmul.f32 %v3192_v25, %v11419_v2  ;;  %v11488_v38 = vld [vmem:[#allocation2 + $0x159] sm:$0xff] }
 0x33d   : > { %3299 = vst.msk [vmem:[#allocation2 + $0x189] sm:$0xff] %vm426_vm2, %v3225_v14  ;;  %v11483_v21 = vld [vmem:[#allocation2 + $0x151] sm:$0xff]  ;;  %v4012_v14 = vld [vmem:[#allocation2 + $0x2] sm:$0xff] }
 0x33e   : > { %3298 = vst.msk [vmem:[#allocation2 + $0x181] sm:$0xff] %vm426_vm2, %v3224_v61  ;;  %8950 = vmatprep.mubr.msk.f32.mxu1 %vm426_vm2, %v11483_v21  ;;  %v11615_v58 = vld [vmem:[#allocation2 + $0x150] sm:$0xff]  ;;  %v11619_v26 = vld [vmem:[#allocation2 + $0x158] sm:$0xff] }
 0x33f   : > { %8951 = vmatmul.mubr.msk.f32.gmra.mrb[28].mxu1 %vm426_vm2, %v11488_v38 }
 0x340   : > { %v11496_v2 = vld [vmem:[#allocation2 + $0x171] sm:$0xff] }
 0x341   : > { %v11492_v5 = vld [vmem:[#allocation2 + $0x169] sm:$0xff]  ;;  %12804 = vst [vmem:[#allocation14_spill] sm:$0xff] %v11496_v2 }
 0x342   : > { %12803 = vst [vmem:[#allocation3_spill] sm:$0xff] %v11492_v5  ;;  %8953 = vmatprep.mubr.msk.f32.mxu1 %vm426_vm2, %v11492_v5  ;;  %v11623_v25 = vld [vmem:[#allocation2 + $0x168] sm:$0xff]  ;;  %v11627_v61 = vld [vmem:[#allocation2 + $0x170] sm:$0xff] }
 0x343   : > { %8954 = vmatmul.mubr.msk.f32.gmra.mrb[30].mxu1 %vm426_vm2, %v11496_v2  ;;  %v11638_v2 = vld [vmem:[#allocation2 + $0x1a] sm:$0xff]  ;;  %v11650_v5 = vld [vmem:[#allocation2 + $0x32] sm:$0xff] }
 0x344   : > { %8958 = vmatprep.mubr.msk.f32.mxu1 %vm426_vm2, %v3300_v34  ;;  %v4013_v34 = vld [vmem:[#allocation2 + $0xa] sm:$0xff]  ;;  %12805 = vst [vmem:[#allocation25_spill] sm:$0xff] %v11638_v2  ;;  %12807 = vst [vmem:[#allocation27_spill] sm:$0xff] %v11650_v5 }
 0x347   : > { %8959 = vmatmul.mubr.msk.f32.vlgmr.msra.gmra.mrb[0].mxu1 %vm426_vm2, %v3301_v54  ;;  %v11635_v54 = vld [vmem:[%s12568_s3 + $0x10] sm:$0xf] }
 0x348   : > { %9007 = vmatpush3.msk.msra.mxu1 %vm491_vm0, %v11195_v8  ;;  %8961 = vmatprep.mubr.msk.f32.mxu1 %vm426_vm2, %v11507_v62  ;;  %v11527_v8 = vld [vmem:[#allocation2 + $0x48] sm:$0xff] }
 0x349   : > { %9056 = vmatprep.subr.msk.mxu1 %vm491_vm0, %v11504_v9 }
 0x34b   : > { %8962 = vmatmul.mubr.msk.f32.gmra.mrb[2].mxu1 %vm426_vm2, %v11515_v11 }
 0x34c   : > { %8964 = vmatprep.mubr.msk.f32.mxu1 %vm426_vm2, %v11519_v52 }
 0x34f   : > { %8965 = vmatmul.mubr.msk.f32.gmra.mrb[4].mxu1 %vm426_vm2, %v11523_v24 }
 0x350   : > { %8967 = vmatprep.mubr.msk.f32.mxu1 %vm426_vm2, %v11527_v8 }
 0x353   : > { %8968 = vmatmul.mubr.msk.f32.gmra.mrb[6].mxu1 %vm426_vm2, %v11531_v22 }
 0x354   : > { %8970 = vmatprep.mubr.msk.f32.mxu1 %vm426_vm2, %v11535_v27 }
 0x357   : > { %8971 = vmatmul.mubr.msk.f32.gmra.mrb[8].mxu1 %vm426_vm2, %v11539_v18 }
 0x358   : > { %8973 = vmatprep.mubr.msk.f32.mxu1 %vm426_vm2, %v11543_v19 }
 0x35b   : > { %8974 = vmatmul.mubr.msk.f32.gmra.mrb[10].mxu1 %vm426_vm2, %v11547_v42 }
 0x35c   : > { %8976 = vmatprep.mubr.msk.f32.mxu1 %vm426_vm2, %v11551_v20 }
 0x35f   : > { %8977 = vmatmul.mubr.msk.f32.gmra.mrb[12].mxu1 %vm426_vm2, %v11555_v37 }
 0x360   : > { %8979 = vmatprep.mubr.msk.f32.mxu1 %vm426_vm2, %v11559_v1 }
 0x363   : > { %8980 = vmatmul.mubr.msk.f32.gmra.mrb[14].mxu1 %vm426_vm2, %v11563_v35 }
 0x364   : > { %8982 = vmatprep.mubr.msk.f32.mxu1 %vm426_vm2, %v11567_v23 }
 0x367   : > { %8983 = vmatmul.mubr.msk.f32.gmra.mrb[16].mxu1 %vm426_vm2, %v11571_v32 }
 0x368   : > { %8985 = vmatprep.mubr.msk.f32.mxu1 %vm426_vm2, %v11575_v43 }
 0x36b   : > { %8986 = vmatmul.mubr.msk.f32.gmra.mrb[18].mxu1 %vm426_vm2, %v11579_v12 }
 0x36c   : > { %8988 = vmatprep.mubr.msk.f32.mxu1 %vm426_vm2, %v11583_v47 }
 0x36f   : > { %8989 = vmatmul.mubr.msk.f32.gmra.mrb[20].mxu1 %vm426_vm2, %v11587_v0 }
 0x370   : > { %8991 = vmatprep.mubr.msk.f32.mxu1 %vm426_vm2, %v11591_v63 }
 0x373   : > { %8992 = vmatmul.mubr.msk.f32.gmra.mrb[22].mxu1 %vm426_vm2, %v11595_v15 }
 0x374   : > { %8994 = vmatprep.mubr.msk.f32.mxu1 %vm426_vm2, %v11599_v36 }
 0x377   : > { %8995 = vmatmul.mubr.msk.f32.gmra.mrb[24].mxu1 %vm426_vm2, %v11603_v44 }
 0x378   : > { %8997 = vmatprep.mubr.msk.f32.mxu1 %vm426_vm2, %v11607_v39 }
 0x37b   : > { %8998 = vmatmul.mubr.msk.f32.gmra.mrb[26].mxu1 %vm426_vm2, %v11611_v56 }
 0x37c   : > { %9000 = vmatprep.mubr.msk.f32.mxu1 %vm426_vm2, %v11615_v58 }
 0x37f   : > { %9001 = vmatmul.mubr.msk.f32.gmra.mrb[28].mxu1 %vm426_vm2, %v11619_v26 }
 0x380   : > { %9003 = vmatprep.mubr.msk.f32.mxu1 %vm426_vm2, %v11623_v25 }
 0x383   : > { %9004 = vmatmul.mubr.msk.f32.gmra.mrb[30].mxu1 %vm426_vm2, %v11627_v61 }
 0x384   : > { %9008 = vmatprep.mubr.msk.f32.mxu1 %vm426_vm2, %v4012_v14  ;;  %v11646_v14 = vld [vmem:[#allocation2 + $0x22] sm:$0xff] }
 0x385   : > { %12806 = vst [vmem:[#allocation26_spill] sm:$0xff] %v11646_v14 }
 0x387   : > { %9009 = vmatmul.mubr.msk.f32.vlgmr.msra.gmra.mrb[0].mxu1 %vm426_vm2, %v4013_v34  ;;  %v11654_v34 = vld [vmem:[#allocation2 + $0x3a] sm:$0xff] }
 0x388   : > { %9057 = vmatpush3.msk.msra.mxu1 %vm491_vm0, %v11504_v9  ;;  %9011 = vmatprep.mubr.msk.f32.mxu1 %vm426_vm2, %v11638_v2  ;;  %12808 = vst [vmem:[#allocation28_spill] sm:$0xff] %v11654_v34  ;;  %v11658_v9 = vld [vmem:[#allocation2 + $0x4a] sm:$0xff]  ;;  %v11662_v2 = vld [vmem:[#allocation2 + $0x52] sm:$0xff] }
 0x389   : > { %9106 = vmatprep.subr.msk.mxu1 %vm491_vm0, %v11635_v54  ;;  %12809 = vst [vmem:[#allocation35_spill] sm:$0xff] %v11658_v9  ;;  %12810 = vst [vmem:[#allocation40_spill] sm:$0xff] %v11662_v2 }
 0x38b   : > { %9012 = vmatmul.mubr.msk.f32.gmra.mrb[2].mxu1 %vm426_vm2, %v11646_v14  ;;  %v11666_v14 = vld [vmem:[#allocation2 + $0x62] sm:$0xff] }
 0x38c   : > { %9014 = vmatprep.mubr.msk.f32.mxu1 %vm426_vm2, %v11650_v5  ;;  %12811 = vst [vmem:[#allocation4_spill] sm:$0xff] %v11666_v14  ;;  %v11670_v5 = vld [vmem:[#allocation2 + $0x6a] sm:$0xff] }
 0x38d   : > { %12812 = vst [vmem:[#allocation5_spill] sm:$0xff] %v11670_v5 }
 0x38f   : > { %9015 = vmatmul.mubr.msk.f32.gmra.mrb[4].mxu1 %vm426_vm2, %v11654_v34  ;;  %v11674_v34 = vld [vmem:[#allocation2 + $0x7a] sm:$0xff] }
 0x390   : > { %9017 = vmatprep.mubr.msk.f32.mxu1 %vm426_vm2, %v11658_v9  ;;  %12813 = vst [vmem:[#allocation6_spill] sm:$0xff] %v11674_v34  ;;  %v11678_v9 = vld [vmem:[#allocation2 + $0x82] sm:$0xff] }
 0x391   : > { %12814 = vst [vmem:[#allocation7_spill] sm:$0xff] %v11678_v9 }
 0x393   : > { %9018 = vmatmul.mubr.msk.f32.gmra.mrb[6].mxu1 %vm426_vm2, %v11662_v2  ;;  %v11682_v2 = vld [vmem:[#allocation2 + $0x92] sm:$0xff] }
 0x394   : > { %9020 = vmatprep.mubr.msk.f32.mxu1 %vm426_vm2, %v11666_v14  ;;  %12815 = vst [vmem:[#allocation8_spill] sm:$0xff] %v11682_v2  ;;  %v11686_v14 = vld [vmem:[#allocation2 + $0x9a] sm:$0xff] }
 0x395   : > { %12816 = vst [vmem:[#allocation9_spill] sm:$0xff] %v11686_v14 }
 0x397   : > { %9021 = vmatmul.mubr.msk.f32.gmra.mrb[8].mxu1 %vm426_vm2, %v11670_v5  ;;  %v11690_v5 = vld [vmem:[#allocation2 + $0xaa] sm:$0xff] }
 0x398   : > { %9023 = vmatprep.mubr.msk.f32.mxu1 %vm426_vm2, %v11674_v34  ;;  %12817 = vst [vmem:[#allocation10_spill] sm:$0xff] %v11690_v5  ;;  %v11694_v34 = vld [vmem:[#allocation2 + $0xb2] sm:$0xff] }
 0x399   : > { %12818 = vst [vmem:[#allocation11_spill] sm:$0xff] %v11694_v34 }
 0x39b   : > { %9024 = vmatmul.mubr.msk.f32.gmra.mrb[10].mxu1 %vm426_vm2, %v11678_v9  ;;  %v11698_v9 = vld [vmem:[#allocation2 + $0xc2] sm:$0xff] }
 0x39c   : > { %9026 = vmatprep.mubr.msk.f32.mxu1 %vm426_vm2, %v11682_v2  ;;  %12819 = vst [vmem:[#allocation12_spill] sm:$0xff] %v11698_v9  ;;  %v11702_v2 = vld [vmem:[#allocation2 + $0xca] sm:$0xff] }
 0x39d   : > { %12820 = vst [vmem:[#allocation13_spill] sm:$0xff] %v11702_v2 }
 0x39f   : > { %9027 = vmatmul.mubr.msk.f32.gmra.mrb[12].mxu1 %vm426_vm2, %v11686_v14  ;;  %v11706_v14 = vld [vmem:[#allocation2 + $0xda] sm:$0xff] }
 0x3a0   : > { %9029 = vmatprep.mubr.msk.f32.mxu1 %vm426_vm2, %v11690_v5  ;;  %12821 = vst [vmem:[#allocation15_spill] sm:$0xff] %v11706_v14  ;;  %v11710_v5 = vld [vmem:[#allocation2 + $0xe2] sm:$0xff] }
 0x3a1   : > { %12822 = vst [vmem:[#allocation16_spill] sm:$0xff] %v11710_v5 }
 0x3a3   : > { %9030 = vmatmul.mubr.msk.f32.gmra.mrb[14].mxu1 %vm426_vm2, %v11694_v34  ;;  %v11714_v34 = vld [vmem:[#allocation2 + $0xf2] sm:$0xff] }
 0x3a4   : > { %9032 = vmatprep.mubr.msk.f32.mxu1 %vm426_vm2, %v11698_v9  ;;  %12823 = vst [vmem:[#allocation17_spill] sm:$0xff] %v11714_v34  ;;  %v11718_v9 = vld [vmem:[#allocation2 + $0xfa] sm:$0xff] }
 0x3a5   : > { %12824 = vst [vmem:[#allocation18_spill] sm:$0xff] %v11718_v9 }
 0x3a7   : > { %9033 = vmatmul.mubr.msk.f32.gmra.mrb[16].mxu1 %vm426_vm2, %v11702_v2  ;;  %v11722_v2 = vld [vmem:[#allocation2 + $0x10a] sm:$0xff] }
 0x3a8   : > { %9035 = vmatprep.mubr.msk.f32.mxu1 %vm426_vm2, %v11706_v14  ;;  %12825 = vst [vmem:[#allocation19_spill] sm:$0xff] %v11722_v2  ;;  %v11726_v14 = vld [vmem:[#allocation2 + $0x112] sm:$0xff] }
 0x3a9   : > { %12826 = vst [vmem:[#allocation20_spill] sm:$0xff] %v11726_v14 }
 0x3ab   : > { %9036 = vmatmul.mubr.msk.f32.gmra.mrb[18].mxu1 %vm426_vm2, %v11710_v5  ;;  %v11730_v5 = vld [vmem:[#allocation2 + $0x122] sm:$0xff] }
 0x3ac   : > { %9038 = vmatprep.mubr.msk.f32.mxu1 %vm426_vm2, %v11714_v34  ;;  %12827 = vst [vmem:[#allocation21_spill] sm:$0xff] %v11730_v5  ;;  %v11734_v34 = vld [vmem:[#allocation2 + $0x12a] sm:$0xff] }
 0x3ad   : > { %12828 = vst [vmem:[#allocation22_spill] sm:$0xff] %v11734_v34 }
 0x3af   : > { %9039 = vmatmul.mubr.msk.f32.gmra.mrb[20].mxu1 %vm426_vm2, %v11718_v9  ;;  %v11738_v9 = vld [vmem:[#allocation2 + $0x13a] sm:$0xff] }
 0x3b0   : > { %9041 = vmatprep.mubr.msk.f32.mxu1 %vm426_vm2, %v11722_v2  ;;  %12829 = vst [vmem:[#allocation23_spill] sm:$0xff] %v11738_v9  ;;  %v11742_v2 = vld [vmem:[#allocation2 + $0x142] sm:$0xff] }
 0x3b3   : > { %9042 = vmatmul.mubr.msk.f32.gmra.mrb[22].mxu1 %vm426_vm2, %v11726_v14  ;;  %v11746_v14 = vld [vmem:[#allocation2 + $0x152] sm:$0xff] }
 0x3b4   : > { %9044 = vmatprep.mubr.msk.f32.mxu1 %vm426_vm2, %v11730_v5  ;;  %12830 = vst [vmem:[#allocation24_spill] sm:$0xff] %v11746_v14  ;;  %v11750_v5 = vld [vmem:[#allocation2 + $0x15a] sm:$0xff] }
 0x3b7   : > { %9045 = vmatmul.mubr.msk.f32.gmra.mrb[24].mxu1 %vm426_vm2, %v11734_v34  ;;  %v11754_v34 = vld [vmem:[#allocation2 + $0x16a] sm:$0xff] }
 0x3b8   : > { %9047 = vmatprep.mubr.msk.f32.mxu1 %vm426_vm2, %v11738_v9  ;;  %12831 = vst [vmem:[#allocation29_spill] sm:$0xff] %v11754_v34  ;;  %v11758_v9 = vld [vmem:[#allocation2 + $0x172] sm:$0xff] }
 0x3bb   : > { %9048 = vmatmul.mubr.msk.f32.gmra.mrb[26].mxu1 %vm426_vm2, %v11742_v2 }
 0x3bc   : > { %9050 = vmatprep.mubr.msk.f32.mxu1 %vm426_vm2, %v11746_v14  ;;  %v293_v14 = vld [vmem:[%s12568_s3 + $0x14] sm:$0xf] }
 0x3bf   : > { %9051 = vmatmul.mubr.msk.f32.gmra.mrb[28].mxu1 %vm426_vm2, %v11750_v5 }
 0x3c0   : > { %9053 = vmatprep.mubr.msk.f32.mxu1 %vm426_vm2, %v11754_v34 }
 0x3c3   : > { %9054 = vmatmul.mubr.msk.f32.gmra.mrb[30].mxu1 %vm426_vm2, %v11758_v9 }
 0x3c4   : > { %9058 = vmatprep.mubr.msk.f32.mxu1 %vm426_vm2, %v11507_v62  ;;  %v11828_v62 = vld [vmem:[#allocation2 + $0x180] sm:$0xff] }
 0x3c7   : > { %9059 = vmatmul.mubr.msk.f32.vlgmr.msra.gmra.mrb[0].mxu1 %vm426_vm2, %v11515_v11  ;;  %v11832_v11 = vld [vmem:[#allocation2 + $0x188] sm:$0xff] }
 0x3c8   : > { %9107 = vmatpush3.msk.msra.mxu1 %vm491_vm0, %v11635_v54  ;;  %9061 = vmatprep.mubr.msk.f32.mxu1 %vm426_vm2, %v11519_v52  ;;  %v294_v54 = vld [vmem:[%s12568_s3 + $0x18] sm:$0xf] }
 0x3c9   : > { %9156 = vmatprep.subr.msk.mxu1 %vm491_vm0, %v293_v14 }
 0x3cb   : > { %9062 = vmatmul.mubr.msk.f32.gmra.mrb[2].mxu1 %vm426_vm2, %v11523_v24 }
 0x3cc   : > { %9064 = vmatprep.mubr.msk.f32.mxu1 %vm426_vm2, %v11527_v8 }
 0x3cf   : > { %9065 = vmatmul.mubr.msk.f32.gmra.mrb[4].mxu1 %vm426_vm2, %v11531_v22 }
 0x3d0   : > { %9067 = vmatprep.mubr.msk.f32.mxu1 %vm426_vm2, %v11535_v27 }
 0x3d3   : > { %9068 = vmatmul.mubr.msk.f32.gmra.mrb[6].mxu1 %vm426_vm2, %v11539_v18 }
 0x3d4   : > { %9070 = vmatprep.mubr.msk.f32.mxu1 %vm426_vm2, %v11543_v19 }
 0x3d7   : > { %9071 = vmatmul.mubr.msk.f32.gmra.mrb[8].mxu1 %vm426_vm2, %v11547_v42 }
 0x3d8   : > { %9073 = vmatprep.mubr.msk.f32.mxu1 %vm426_vm2, %v11551_v20 }
 0x3db   : > { %9074 = vmatmul.mubr.msk.f32.gmra.mrb[10].mxu1 %vm426_vm2, %v11555_v37 }
 0x3dc   : > { %9076 = vmatprep.mubr.msk.f32.mxu1 %vm426_vm2, %v11559_v1 }
 0x3df   : > { %9077 = vmatmul.mubr.msk.f32.gmra.mrb[12].mxu1 %vm426_vm2, %v11563_v35 }
 0x3e0   : > { %9079 = vmatprep.mubr.msk.f32.mxu1 %vm426_vm2, %v11567_v23 }
 0x3e3   : > { %9080 = vmatmul.mubr.msk.f32.gmra.mrb[14].mxu1 %vm426_vm2, %v11571_v32 }
 0x3e4   : > { %9082 = vmatprep.mubr.msk.f32.mxu1 %vm426_vm2, %v11575_v43 }
 0x3e7   : > { %9083 = vmatmul.mubr.msk.f32.gmra.mrb[16].mxu1 %vm426_vm2, %v11579_v12 }
 0x3e8   : > { %9085 = vmatprep.mubr.msk.f32.mxu1 %vm426_vm2, %v11583_v47 }
 0x3eb   : > { %9086 = vmatmul.mubr.msk.f32.gmra.mrb[18].mxu1 %vm426_vm2, %v11587_v0 }
 0x3ec   : > { %9088 = vmatprep.mubr.msk.f32.mxu1 %vm426_vm2, %v11591_v63 }
 0x3ef   : > { %9089 = vmatmul.mubr.msk.f32.gmra.mrb[20].mxu1 %vm426_vm2, %v11595_v15 }
 0x3f0   : > { %9091 = vmatprep.mubr.msk.f32.mxu1 %vm426_vm2, %v11599_v36 }
 0x3f3   : > { %9092 = vmatmul.mubr.msk.f32.gmra.mrb[22].mxu1 %vm426_vm2, %v11603_v44 }
 0x3f4   : > { %9094 = vmatprep.mubr.msk.f32.mxu1 %vm426_vm2, %v11607_v39 }
 0x3f7   : > { %9095 = vmatmul.mubr.msk.f32.gmra.mrb[24].mxu1 %vm426_vm2, %v11611_v56 }
 0x3f8   : > { %9097 = vmatprep.mubr.msk.f32.mxu1 %vm426_vm2, %v11615_v58 }
 0x3fb   : > { %9098 = vmatmul.mubr.msk.f32.gmra.mrb[26].mxu1 %vm426_vm2, %v11619_v26 }
 0x3fc   : > { %9100 = vmatprep.mubr.msk.f32.mxu1 %vm426_vm2, %v11623_v25 }
 0x3ff   : > { %9101 = vmatmul.mubr.msk.f32.gmra.mrb[28].mxu1 %vm426_vm2, %v11627_v61 }
 0x400   : > { %9103 = vmatprep.mubr.msk.f32.mxu1 %vm426_vm2, %v11828_v62 }
 0x403   : > { %9104 = vmatmul.mubr.msk.f32.gmra.mrb[30].mxu1 %vm426_vm2, %v11832_v11 }
 0x404   : > { %9108 = vmatprep.mubr.msk.f32.mxu1 %vm426_vm2, %v11261_v13  ;;  %v12832_v13 = vld [vmem:[#allocation3_spill] sm:$0xff] }
 0x407   : > { %9109 = vmatmul.mubr.msk.f32.vlgmr.msra.gmra.mrb[0].mxu1 %vm426_vm2, %v11267_v31  ;;  %v12833_v31 = vld [vmem:[#allocation14_spill] sm:$0xff] }
 0x408   : > { %9157 = vmatpush3.msk.msra.mxu1 %vm491_vm0, %v293_v14  ;;  %9111 = vmatprep.mubr.msk.f32.mxu1 %vm426_vm2, %v11281_v16  ;;  %v11901_v16 = vld [vmem:[#allocation2 + $0x181] sm:$0xff]  ;;  %v12843_v14 = vld [vmem:[#allocation7_spill] sm:$0xff] }
 0x409   : > { %9206 = vmatprep.subr.msk.mxu1 %vm491_vm0, %v294_v54 }
 0x40b   : > { %9112 = vmatmul.mubr.msk.f32.gmra.mrb[2].mxu1 %vm426_vm2, %v11287_v53  ;;  %v11905_v53 = vld [vmem:[#allocation2 + $0x189] sm:$0xff] }
 0x40c   : > { %9114 = vmatprep.mubr.msk.f32.mxu1 %vm426_vm2, %v11301_v3  ;;  %v12834_v3 = vld [vmem:[#allocation25_spill] sm:$0xff] }
 0x40f   : > { %9115 = vmatmul.mubr.msk.f32.gmra.mrb[4].mxu1 %vm426_vm2, %v11307_v46  ;;  %v295_v46 = vld [vmem:[%s12568_s3 + $0x1c] sm:$0xf] }
 0x410   : > { %9117 = vmatprep.mubr.msk.f32.mxu1 %vm426_vm2, %v11321_v6  ;;  %v12835_v6 = vld [vmem:[#allocation26_spill] sm:$0xff] }
 0x413   : > { %9118 = vmatmul.mubr.msk.f32.gmra.mrb[6].mxu1 %vm426_vm2, %v11327_v51  ;;  %v12836_v51 = vld [vmem:[#allocation27_spill] sm:$0xff] }
 0x414   : > { %9120 = vmatprep.mubr.msk.f32.mxu1 %vm426_vm2, %v11341_v40  ;;  %v12837_v40 = vld [vmem:[#allocation28_spill] sm:$0xff] }
 0x417   : > { %9121 = vmatmul.mubr.msk.f32.gmra.mrb[8].mxu1 %vm426_vm2, %v11347_v48  ;;  %v12838_v48 = vld [vmem:[#allocation35_spill] sm:$0xff] }
 0x418   : > { %9123 = vmatprep.mubr.msk.f32.mxu1 %vm426_vm2, %v11361_v28  ;;  %v12839_v28 = vld [vmem:[#allocation40_spill] sm:$0xff] }
 0x41b   : > { %9124 = vmatmul.mubr.msk.f32.gmra.mrb[10].mxu1 %vm426_vm2, %v11367_v7  ;;  %v12840_v7 = vld [vmem:[#allocation4_spill] sm:$0xff] }
 0x41c   : > { %9126 = vmatprep.mubr.msk.f32.mxu1 %vm426_vm2, %v11381_v59  ;;  %v12841_v59 = vld [vmem:[#allocation5_spill] sm:$0xff] }
 0x41f   : > { %9127 = vmatmul.mubr.msk.f32.gmra.mrb[12].mxu1 %vm426_vm2, %v11387_v10  ;;  %v12842_v10 = vld [vmem:[#allocation6_spill] sm:$0xff] }
 0x420   : > { %9129 = vmatprep.mubr.msk.f32.mxu1 %vm426_vm2, %v11401_v33 }
 0x423   : > { %9130 = vmatmul.mubr.msk.f32.gmra.mrb[14].mxu1 %vm426_vm2, %v11407_v49 }
 0x424   : > { %9132 = vmatprep.mubr.msk.f32.mxu1 %vm426_vm2, %v11421_v50 }
 0x427   : > { %9133 = vmatmul.mubr.msk.f32.gmra.mrb[16].mxu1 %vm426_vm2, %v11427_v30 }
 0x428   : > { %9135 = vmatprep.mubr.msk.f32.mxu1 %vm426_vm2, %v11435_v17 }
 0x42b   : > { %9136 = vmatmul.mubr.msk.f32.gmra.mrb[18].mxu1 %vm426_vm2, %v11440_v41 }
 0x42c   : > { %9138 = vmatprep.mubr.msk.f32.mxu1 %vm426_vm2, %v11447_v4 }
 0x42f   : > { %9139 = vmatmul.mubr.msk.f32.gmra.mrb[20].mxu1 %vm426_vm2, %v11452_v60 }
 0x430   : > { %9141 = vmatprep.mubr.msk.f32.mxu1 %vm426_vm2, %v11459_v55 }
 0x433   : > { %9142 = vmatmul.mubr.msk.f32.gmra.mrb[22].mxu1 %vm426_vm2, %v11464_v29 }
 0x434   : > { %9144 = vmatprep.mubr.msk.f32.mxu1 %vm426_vm2, %v11471_v45 }
 0x437   : > { %9145 = vmatmul.mubr.msk.f32.gmra.mrb[24].mxu1 %vm426_vm2, %v11476_v57 }
 0x438   : > { %9147 = vmatprep.mubr.msk.f32.mxu1 %vm426_vm2, %v11483_v21 }
 0x43b   : > { %9148 = vmatmul.mubr.msk.f32.gmra.mrb[26].mxu1 %vm426_vm2, %v11488_v38 }
 0x43c   : > { %9150 = vmatprep.mubr.msk.f32.mxu1 %vm426_vm2, %v12832_v13 }
 0x43f   : > { %9151 = vmatmul.mubr.msk.f32.gmra.mrb[28].mxu1 %vm426_vm2, %v12833_v31 }
 0x440   : > { %9153 = vmatprep.mubr.msk.f32.mxu1 %vm426_vm2, %v11901_v16 }
 0x443   : > { %9154 = vmatmul.mubr.msk.f32.gmra.mrb[30].mxu1 %vm426_vm2, %v11905_v53 }
 0x444   : > { %9158 = vmatprep.mubr.msk.f32.mxu1 %vm426_vm2, %v12834_v3  ;;  %v12845_v3 = vld [vmem:[#allocation9_spill] sm:$0xff] }
 0x447   : > { %9159 = vmatmul.mubr.msk.f32.vlgmr.msra.gmra.mrb[0].mxu1 %vm426_vm2, %v12835_v6  ;;  %v12846_v6 = vld [vmem:[#allocation10_spill] sm:$0xff] }
 0x448   : > { %9207 = vmatpush3.msk.msra.mxu1 %vm491_vm0, %v294_v54  ;;  %9161 = vmatprep.mubr.msk.f32.mxu1 %vm426_vm2, %v12836_v51  ;;  %v12844_v54 = vld [vmem:[#allocation8_spill] sm:$0xff] }
 0x449   : > { %9256 = vmatprep.subr.msk.mxu1 %vm491_vm0, %v295_v46 }
 0x44b   : > { %9162 = vmatmul.mubr.msk.f32.gmra.mrb[2].mxu1 %vm426_vm2, %v12837_v40 }
 0x44c   : > { %9164 = vmatprep.mubr.msk.f32.mxu1 %vm426_vm2, %v12838_v48 }
 0x44f   : > { %9165 = vmatmul.mubr.msk.f32.gmra.mrb[4].mxu1 %vm426_vm2, %v12839_v28  ;;  %v12847_v28 = vld [vmem:[#allocation11_spill] sm:$0xff] }
 0x450   : > { %9167 = vmatprep.mubr.msk.f32.mxu1 %vm426_vm2, %v12840_v7  ;;  %v12848_v7 = vld [vmem:[#allocation12_spill] sm:$0xff] }
 0x453   : > { %9168 = vmatmul.mubr.msk.f32.gmra.mrb[6].mxu1 %vm426_vm2, %v12841_v59  ;;  %v12849_v59 = vld [vmem:[#allocation13_spill] sm:$0xff] }
 0x454   : > { %9170 = vmatprep.mubr.msk.f32.mxu1 %vm426_vm2, %v12842_v10  ;;  %v12850_v10 = vld [vmem:[#allocation15_spill] sm:$0xff] }
 0x457   : > { %9171 = vmatmul.mubr.msk.f32.gmra.mrb[8].mxu1 %vm426_vm2, %v12843_v14  ;;  %v12851_v14 = vld [vmem:[#allocation16_spill] sm:$0xff] }
 0x458   : > { %9173 = vmatprep.mubr.msk.f32.mxu1 %vm426_vm2, %v12844_v54  ;;  %v12852_v54 = vld [vmem:[#allocation17_spill] sm:$0xff] }
 0x45b   : > { %9174 = vmatmul.mubr.msk.f32.gmra.mrb[10].mxu1 %vm426_vm2, %v12845_v3  ;;  %v12853_v3 = vld [vmem:[#allocation18_spill] sm:$0xff] }
 0x45c   : > { %9176 = vmatprep.mubr.msk.f32.mxu1 %vm426_vm2, %v12846_v6  ;;  %v12854_v6 = vld [vmem:[#allocation19_spill] sm:$0xff] }
 0x45f   : > { %9177 = vmatmul.mubr.msk.f32.gmra.mrb[12].mxu1 %vm426_vm2, %v12847_v28  ;;  %v12855_v28 = vld [vmem:[#allocation20_spill] sm:$0xff] }
 0x460   : > { %9179 = vmatprep.mubr.msk.f32.mxu1 %vm426_vm2, %v12848_v7  ;;  %v12856_v7 = vld [vmem:[#allocation21_spill] sm:$0xff] }
 0x463   : > { %9180 = vmatmul.mubr.msk.f32.gmra.mrb[14].mxu1 %vm426_vm2, %v12849_v59  ;;  %v12857_v59 = vld [vmem:[#allocation22_spill] sm:$0xff] }
 0x464   : > { %9182 = vmatprep.mubr.msk.f32.mxu1 %vm426_vm2, %v12850_v10  ;;  %v12858_v10 = vld [vmem:[#allocation23_spill] sm:$0xff] }
 0x467   : > { %9183 = vmatmul.mubr.msk.f32.gmra.mrb[16].mxu1 %vm426_vm2, %v12851_v14 }
 0x468   : > { %9185 = vmatprep.mubr.msk.f32.mxu1 %vm426_vm2, %v12852_v54  ;;  %v12859_v54 = vld [vmem:[#allocation24_spill] sm:$0xff] }
 0x46b   : > { %9186 = vmatmul.mubr.msk.f32.gmra.mrb[18].mxu1 %vm426_vm2, %v12853_v3 }
 0x46c   : > { %9188 = vmatprep.mubr.msk.f32.mxu1 %vm426_vm2, %v12854_v6 }
 0x46f   : > { %9189 = vmatmul.mubr.msk.f32.gmra.mrb[20].mxu1 %vm426_vm2, %v12855_v28 }
 0x470   : > { %9191 = vmatprep.mubr.msk.f32.mxu1 %vm426_vm2, %v12856_v7  ;;  %v11974_v7 = vld [vmem:[#allocation2 + $0x182] sm:$0xff] }
 0x473   : > { %9192 = vmatmul.mubr.msk.f32.gmra.mrb[22].mxu1 %vm426_vm2, %v12857_v59 }
 0x474   : > { %9194 = vmatprep.mubr.msk.f32.mxu1 %vm426_vm2, %v12858_v10  ;;  %v11978_v10 = vld [vmem:[#allocation2 + $0x18a] sm:$0xff] }
 0x477   : > { %9195 = vmatmul.mubr.msk.f32.gmra.mrb[24].mxu1 %vm426_vm2, %v11742_v2 }
 0x478   : > { %9197 = vmatprep.mubr.msk.f32.mxu1 %vm426_vm2, %v12859_v54 }
 0x47b   : > { %9198 = vmatmul.mubr.msk.f32.gmra.mrb[26].mxu1 %vm426_vm2, %v11750_v5 }
 0x47c   : > { %9200 = vmatprep.mubr.msk.f32.mxu1 %vm426_vm2, %v11754_v34  ;;  %v296_v34 = vld [vmem:[%s12568_s3 + $0x20] sm:$0xf] }
 0x47f   : > { %9201 = vmatmul.mubr.msk.f32.gmra.mrb[28].mxu1 %vm426_vm2, %v11758_v9 }
 0x480   : > { %9203 = vmatprep.mubr.msk.f32.mxu1 %vm426_vm2, %v11974_v7 }
 0x483   : > { %9204 = vmatmul.mubr.msk.f32.gmra.mrb[30].mxu1 %vm426_vm2, %v11978_v10 }
 0x484   : > { %9208 = vmatprep.mubr.msk.f32.mxu1 %vm426_vm2, %v11519_v52  ;;  %v5595_v52 = vld [vmem:[#allocation2 + $0x198] sm:$0xff] }
 0x487   : > { %9209 = vmatmul.mubr.msk.f32.vlgmr.msra.gmra.mrb[0].mxu1 %vm426_vm2, %v11523_v24  ;;  %v5596_v24 = vld [vmem:[#allocation2 + $0x1a0] sm:$0xff] }
 0x488   : > { %9257 = vmatpush3.msk.msra.mxu1 %vm491_vm0, %v295_v46  ;;  %9211 = vmatprep.mubr.msk.f32.mxu1 %vm426_vm2, %v11527_v8  ;;  %v5953_v8 = vld [vmem:[#allocation2 + $0x31] sm:$0xff]  ;;  %v6934_v46 = vld [vmem:[%s10068_s27 + $0x48] sm:$0xff] }
 0x489   : > { %9306 = vmatprep.subr.msk.mxu1 %vm491_vm0, %v296_v34 }
 0x48b   : > { %9212 = vmatmul.mubr.msk.f32.gmra.mrb[2].mxu1 %vm426_vm2, %v11531_v22  ;;  %v5954_v22 = vld [vmem:[#allocation2 + $0x39] sm:$0xff] }
 0x48c   : > { %9214 = vmatprep.mubr.msk.f32.mxu1 %vm426_vm2, %v11535_v27  ;;  %v5955_v27 = vld [vmem:[#allocation2 + $0x49] sm:$0xff] }
 0x48f   : > { %9215 = vmatmul.mubr.msk.f32.gmra.mrb[4].mxu1 %vm426_vm2, %v11539_v18  ;;  %v5956_v18 = vld [vmem:[#allocation2 + $0x51] sm:$0xff] }
 0x490   : > { %9217 = vmatprep.mubr.msk.f32.mxu1 %vm426_vm2, %v11543_v19  ;;  %v5957_v19 = vld [vmem:[#allocation2 + $0x61] sm:$0xff] }
 0x493   : > { %9218 = vmatmul.mubr.msk.f32.gmra.mrb[6].mxu1 %vm426_vm2, %v11547_v42  ;;  %v5958_v42 = vld [vmem:[#allocation2 + $0x69] sm:$0xff] }
 0x494   : > { %9220 = vmatprep.mubr.msk.f32.mxu1 %vm426_vm2, %v11551_v20  ;;  %v5959_v20 = vld [vmem:[#allocation2 + $0x79] sm:$0xff] }
 0x497   : > { %9221 = vmatmul.mubr.msk.f32.gmra.mrb[8].mxu1 %vm426_vm2, %v11555_v37  ;;  %v5960_v37 = vld [vmem:[#allocation2 + $0x81] sm:$0xff] }
 0x498   : > { %9223 = vmatprep.mubr.msk.f32.mxu1 %vm426_vm2, %v11559_v1  ;;  %v5961_v1 = vld [vmem:[#allocation2 + $0x91] sm:$0xff] }
 0x49b   : > { %9224 = vmatmul.mubr.msk.f32.gmra.mrb[10].mxu1 %vm426_vm2, %v11563_v35  ;;  %v5962_v35 = vld [vmem:[#allocation2 + $0x99] sm:$0xff] }
 0x49c   : > { %9226 = vmatprep.mubr.msk.f32.mxu1 %vm426_vm2, %v11567_v23  ;;  %v5963_v23 = vld [vmem:[#allocation2 + $0xa9] sm:$0xff] }
 0x49f   : > { %9227 = vmatmul.mubr.msk.f32.gmra.mrb[12].mxu1 %vm426_vm2, %v11571_v32  ;;  %v5964_v32 = vld [vmem:[#allocation2 + $0xb1] sm:$0xff] }
 0x4a0   : > { %9229 = vmatprep.mubr.msk.f32.mxu1 %vm426_vm2, %v11575_v43  ;;  %v12872_v43 = vld [vmem:[#allocation17_spill] sm:$0xff] }
 0x4a3   : > { %9230 = vmatmul.mubr.msk.f32.gmra.mrb[14].mxu1 %vm426_vm2, %v11579_v12  ;;  %v12873_v12 = vld [vmem:[#allocation21_spill] sm:$0xff] }
 0x4a4   : > { %9232 = vmatprep.mubr.msk.f32.mxu1 %vm426_vm2, %v11583_v47  ;;  %v12874_v47 = vld [vmem:[#allocation23_spill] sm:$0xff] }
 0x4a7   : > { %9233 = vmatmul.mubr.msk.f32.gmra.mrb[16].mxu1 %vm426_vm2, %v11587_v0  ;;  %v12875_v0 = vld [vmem:[#allocation29_spill] sm:$0xff] }
 0x4a8   : > { %9235 = vmatprep.mubr.msk.f32.mxu1 %vm426_vm2, %v11591_v63  ;;  %v6371_v63 = vld [vmem:[#allocation2 + $0x19a] sm:$0xff] }
 0x4ab   : > { %9236 = vmatmul.mubr.msk.f32.gmra.mrb[18].mxu1 %vm426_vm2, %v11595_v15  ;;  %v6929_v15 = vld [vmem:[%s10068_s27 + $0x20] sm:$0xff] }
 0x4ac   : > { %9238 = vmatprep.mubr.msk.f32.mxu1 %vm426_vm2, %v11599_v36  ;;  %v6930_v36 = vld [vmem:[%s10068_s27 + $0x28] sm:$0x3] }
 0x4af   : > { %9239 = vmatmul.mubr.msk.f32.gmra.mrb[20].mxu1 %vm426_vm2, %v11603_v44  ;;  %v6928_v44 = vld [vmem:[%s10068_s27 + $0x18] sm:$0xff] }
 0x4b0   : > { %9241 = vmatprep.mubr.msk.f32.mxu1 %vm426_vm2, %v11607_v39  ;;  %v6932_v39 = vld [vmem:[%s10068_s27 + $0x38] sm:$0xff] }
 0x4b3   : > { %9242 = vmatmul.mubr.msk.f32.gmra.mrb[22].mxu1 %vm426_vm2, %v11611_v56  ;;  %v6933_v56 = vld [vmem:[%s10068_s27 + $0x40] sm:$0x3] }
 0x4b4   : > { %9244 = vmatprep.mubr.msk.f32.mxu1 %vm426_vm2, %v11615_v58 }
 0x4b7   : > { %9245 = vmatmul.mubr.msk.f32.gmra.mrb[24].mxu1 %vm426_vm2, %v11619_v26  ;;  %v6931_v26 = vld [vmem:[%s10068_s27 + $0x30] sm:$0xff] }
 0x4b8   : > { %9247 = vmatprep.mubr.msk.f32.mxu1 %vm426_vm2, %v11623_v25  ;;  %v6935_v25 = vld [vmem:[%s10068_s27 + $0x50] sm:$0xff] }
 0x4bb   : > { %9248 = vmatmul.mubr.msk.f32.gmra.mrb[26].mxu1 %vm426_vm2, %v11627_v61 }
 0x4bc   : > { %9250 = vmatprep.mubr.msk.f32.mxu1 %vm426_vm2, %v11828_v62 }
 0x4bf   : > { %9251 = vmatmul.mubr.msk.f32.gmra.mrb[28].mxu1 %vm426_vm2, %v11832_v11 }
 0x4c0   : > { %9253 = vmatprep.mubr.msk.f32.mxu1 %vm426_vm2, %v5595_v52 }
 0x4c3   : > { %9254 = vmatmul.mubr.msk.f32.gmra.mrb[30].mxu1 %vm426_vm2, %v5596_v24 }
 0x4c4   : > { %9258 = vmatprep.mubr.msk.f32.mxu1 %vm426_vm2, %v5953_v8  ;;  %v7034_v8 = vrot.slane %v6934_v46, 1 }
 0x4c7   : > { %9259 = vmatmul.mubr.msk.f32.vlgmr.msra.gmra.mrb[0].mxu1 %vm426_vm2, %v5954_v22 }
 0x4c8   : > { %9307 = vmatpush3.msk.msra.mxu1 %vm491_vm0, %v296_v34  ;;  %9261 = vmatprep.mubr.msk.f32.mxu1 %vm426_vm2, %v5955_v27  ;;  %v7025_v34 = vrot.slane %v6929_v15, 1 }
 0x4cb   : > { %9262 = vmatmul.mubr.msk.f32.gmra.mrb[2].mxu1 %vm426_vm2, %v5956_v18 }
 0x4cc   : > { %9264 = vmatprep.mubr.msk.f32.mxu1 %vm426_vm2, %v5957_v19 }
 0x4cf   : > { %9265 = vmatmul.mubr.msk.f32.gmra.mrb[4].mxu1 %vm426_vm2, %v5958_v42 }
 0x4d0   : > { %9267 = vmatprep.mubr.msk.f32.mxu1 %vm426_vm2, %v5959_v20 }
 0x4d3   : > { %9268 = vmatmul.mubr.msk.f32.gmra.mrb[6].mxu1 %vm426_vm2, %v5960_v37 }
 0x4d4   : > { %9270 = vmatprep.mubr.msk.f32.mxu1 %vm426_vm2, %v5961_v1  ;;  %v6940_v1 = vld [vmem:[%s10068_s27 + $0x78] sm:$0xff] }
 0x4d7   : > { %9271 = vmatmul.mubr.msk.f32.gmra.mrb[8].mxu1 %vm426_vm2, %v5962_v35 }
 0x4d8   : > { %9273 = vmatprep.mubr.msk.f32.mxu1 %vm426_vm2, %v5963_v23 }
 0x4db   : > { %9274 = vmatmul.mubr.msk.f32.gmra.mrb[10].mxu1 %vm426_vm2, %v5964_v32 }
 0x4dc   : > { %9276 = vmatprep.mubr.msk.f32.mxu1 %vm426_vm2, %v11401_v33  ;;  %v5983_v33 = vld [vmem:[#allocation2 + $0x199] sm:$0xff] }
 0x4df   : > { %9277 = vmatmul.mubr.msk.f32.gmra.mrb[12].mxu1 %vm426_vm2, %v11407_v49  ;;  %v5984_v49 = vld [vmem:[#allocation2 + $0x1a1] sm:$0xff] }
 0x4e0   : > { %9279 = vmatprep.mubr.msk.f32.mxu1 %vm426_vm2, %v11421_v50  ;;  %v12860_v50 = vld [vmem:[#allocation40_spill] sm:$0xff] }
 0x4e3   : > { %9280 = vmatmul.mubr.msk.f32.gmra.mrb[14].mxu1 %vm426_vm2, %v11427_v30  ;;  %v12861_v30 = vld [vmem:[#allocation4_spill] sm:$0xff] }
 0x4e4   : > { %9282 = vmatprep.mubr.msk.f32.mxu1 %vm426_vm2, %v11435_v17  ;;  %v12862_v17 = vld [vmem:[#allocation5_spill] sm:$0xff] }
 0x4e7   : > { %9283 = vmatmul.mubr.msk.f32.gmra.mrb[16].mxu1 %vm426_vm2, %v11440_v41  ;;  %v12863_v41 = vld [vmem:[#allocation6_spill] sm:$0xff] }
 0x4e8   : > { %9285 = vmatprep.mubr.msk.f32.mxu1 %vm426_vm2, %v11447_v4  ;;  %v12864_v4 = vld [vmem:[#allocation7_spill] sm:$0xff] }
 0x4eb   : > { %9286 = vmatmul.mubr.msk.f32.gmra.mrb[18].mxu1 %vm426_vm2, %v11452_v60  ;;  %v12865_v60 = vld [vmem:[#allocation8_spill] sm:$0xff] }
 0x4ec   : > { %9288 = vmatprep.mubr.msk.f32.mxu1 %vm426_vm2, %v11459_v55  ;;  %v12866_v55 = vld [vmem:[#allocation9_spill] sm:$0xff] }
 0x4ef   : > { %9289 = vmatmul.mubr.msk.f32.gmra.mrb[20].mxu1 %vm426_vm2, %v11464_v29  ;;  %v12867_v29 = vld [vmem:[#allocation10_spill] sm:$0xff] }
 0x4f0   : > { %9291 = vmatprep.mubr.msk.f32.mxu1 %vm426_vm2, %v11471_v45  ;;  %v12868_v45 = vld [vmem:[#allocation11_spill] sm:$0xff] }
 0x4f3   : > { %9292 = vmatmul.mubr.msk.f32.gmra.mrb[22].mxu1 %vm426_vm2, %v11476_v57  ;;  %v12869_v57 = vld [vmem:[#allocation12_spill] sm:$0xff] }
 0x4f4   : > { %9294 = vmatprep.mubr.msk.f32.mxu1 %vm426_vm2, %v11483_v21  ;;  %v12870_v21 = vld [vmem:[#allocation13_spill] sm:$0xff] }
 0x4f7   : > { %9295 = vmatmul.mubr.msk.f32.gmra.mrb[24].mxu1 %vm426_vm2, %v11488_v38  ;;  %v12871_v38 = vld [vmem:[#allocation15_spill] sm:$0xff] }
 0x4f8   : > { %9297 = vmatprep.mubr.msk.f32.mxu1 %vm426_vm2, %v12832_v13  ;;  %v7024_v13 = vrot.slane %v6928_v44, 1 }
 0x4fa   : > { %v12201_v23 = vsel %vm345_vm1, %v7024_v13, %v7025_v34 }
 0x4fb   : > { %9298 = vmatmul.mubr.msk.f32.gmra.mrb[26].mxu1 %vm426_vm2, %v12833_v31  ;;  %v7030_v31 = vrot.slane %v6932_v39, 1 }
 0x4fc   : > { %9300 = vmatprep.mubr.msk.f32.mxu1 %vm426_vm2, %v11901_v16  ;;  %v7032_v16 = vrot.slane %v6933_v56, 1  ;;  %v6950_v56 = vld [vmem:[%s10068_s27 + $0xc8] sm:$0xff] }
 0x4fe   : > { %v12204_v32 = vsel %vm345_vm1, %v7030_v31, %v7032_v16 }
 0x4ff   : > { %9301 = vmatmul.mubr.msk.f32.gmra.mrb[28].mxu1 %vm426_vm2, %v11905_v53  ;;  %v6936_v53 = vld [vmem:[%s10068_s27 + $0x58] sm:$0x3] }
 0x500   : > { %9303 = vmatprep.mubr.msk.f32.mxu1 %vm426_vm2, %v5983_v33  ;;  %v7037_v24 = vrot.slane %v6936_v53, 1 }
 0x503   : > { %9304 = vmatmul.mubr.msk.f32.gmra.mrb[30].mxu1 %vm426_vm2, %v5984_v49 }
 0x504   : > { %9308 = vmatprep.mubr.msk.f32.mxu1 %vm426_vm2, %v12836_v51 }
 0x507   : > { %9309 = vmatmul.mubr.msk.f32.vlgmr.msra.gmra.mrb[0].mxu1 %vm426_vm2, %v12837_v40  ;;  %v7029_v40 = vrot.slane %v6931_v26, 1  ;;  %v6949_v26 = vld [vmem:[%s10068_s27 + $0xc0] sm:$0xff] }
 0x508   : > { %9311 = vmatprep.mubr.msk.f32.mxu1 %vm426_vm2, %v12838_v48  ;;  %v7035_v48 = vrot.slane %v6935_v25, 1 }
 0x50b   : > { %9312 = vmatmul.mubr.msk.f32.gmra.mrb[2].mxu1 %vm426_vm2, %v12860_v50  ;;  %v6944_v50 = vld [vmem:[%s10068_s27 + $0x98] sm:$0xff] }
 0x50c   : > { %9314 = vmatprep.mubr.msk.f32.mxu1 %vm426_vm2, %v12861_v30  ;;  %v6945_v30 = vld [vmem:[%s10068_s27 + $0xa0] sm:$0x3] }
 0x50f   : > { %9315 = vmatmul.mubr.msk.f32.gmra.mrb[4].mxu1 %vm426_vm2, %v12862_v17  ;;  %v6943_v17 = vld [vmem:[%s10068_s27 + $0x90] sm:$0xff] }
 0x510   : > { %9317 = vmatprep.mubr.msk.f32.mxu1 %vm426_vm2, %v12863_v41  ;;  %v12211_v41 = vsel %vm345_vm1, %v7029_v40, %v7030_v31 }
 0x513   : > { %9318 = vmatmul.mubr.msk.f32.gmra.mrb[6].mxu1 %vm426_vm2, %v12864_v4 }
 0x514   : > { %9320 = vmatprep.mubr.msk.f32.mxu1 %vm426_vm2, %v12865_v60  ;;  %v12217_v60 = vsel %vm345_vm1, %v7035_v48, %v7037_v24 }
 0x517   : > { %9321 = vmatmul.mubr.msk.f32.gmra.mrb[8].mxu1 %vm426_vm2, %v12866_v55 }
 0x518   : > { %9323 = vmatprep.mubr.msk.f32.mxu1 %vm426_vm2, %v12867_v29 }
 0x51b   : > { %9324 = vmatmul.mubr.msk.f32.gmra.mrb[10].mxu1 %vm426_vm2, %v12868_v45  ;;  %v12223_v45 = vsel %vm345_vm1, %v7034_v8, %v7035_v48  ;;  %v7059_v48 = vrot.slane %v6949_v26, 1 }
 0x51c   : > { %9326 = vmatprep.mubr.msk.f32.mxu1 %vm426_vm2, %v12869_v57  ;;  %v7044_v57 = vrot.slane %v6940_v1, 1 }
 0x51f   : > { %9327 = vmatmul.mubr.msk.f32.gmra.mrb[12].mxu1 %vm426_vm2, %v12870_v21  ;;  %v6947_v21 = vld [vmem:[%s10068_s27 + $0xb0] sm:$0xff] }
 0x520   : > { %9329 = vmatprep.mubr.msk.f32.mxu1 %vm426_vm2, %v12871_v38  ;;  %v6948_v38 = vld [vmem:[%s10068_s27 + $0xb8] sm:$0x3] }
 0x523   : > { %9330 = vmatmul.mubr.msk.f32.gmra.mrb[14].mxu1 %vm426_vm2, %v12851_v14  ;;  %v6937_v14 = vld [vmem:[%s10068_s27 + $0x60] sm:$0xff] }
 0x524   : > { %9332 = vmatprep.mubr.msk.f32.mxu1 %vm426_vm2, %v12872_v43  ;;  %v7039_v42 = vrot.slane %v6937_v14, 1 }
 0x527   : > { %9333 = vmatmul.mubr.msk.f32.gmra.mrb[16].mxu1 %vm426_vm2, %v12853_v3  ;;  %v6942_v3 = vld [vmem:[%s10068_s27 + $0x88] sm:$0x3] }
 0x528   : > { %9335 = vmatprep.mubr.msk.f32.mxu1 %vm426_vm2, %v12854_v6  ;;  %v7047_v37 = vrot.slane %v6942_v3, 1 }
 0x52b   : > { %9336 = vmatmul.mubr.msk.f32.gmra.mrb[18].mxu1 %vm426_vm2, %v12855_v28  ;;  %v6938_v28 = vld [vmem:[%s10068_s27 + $0x68] sm:$0xff] }
 0x52c   : > { %9338 = vmatprep.mubr.msk.f32.mxu1 %vm426_vm2, %v12873_v12  ;;  %v7040_v27 = vrot.slane %v6938_v28, 1  ;;  %v7050_v12 = vrot.slane %v6944_v50, 1 }
 0x52e   : > { %v12234_v44 = vsel %vm345_vm1, %v7039_v42, %v7040_v27 }
 0x52f   : > { %9339 = vmatmul.mubr.msk.f32.gmra.mrb[20].mxu1 %vm426_vm2, %v12857_v59 }
 0x530   : > { %9341 = vmatprep.mubr.msk.f32.mxu1 %vm426_vm2, %v12874_v47  ;;  %v7052_v47 = vrot.slane %v6945_v30, 1 }
 0x532   : > { %v12254_v14 = vsel %vm345_vm1, %v7050_v12, %v7052_v47 }
 0x533   : > { %9342 = vmatmul.mubr.msk.f32.gmra.mrb[22].mxu1 %vm426_vm2, %v11742_v2  ;;  %v6372_v2 = vld [vmem:[#allocation2 + $0x1a2] sm:$0xff] }
 0x534   : > { %9344 = vmatprep.mubr.msk.f32.mxu1 %vm426_vm2, %v12859_v54  ;;  %v6941_v54 = vld [vmem:[%s10068_s27 + $0x80] sm:$0xff] }
 0x535   : > { %v7045_v20 = vrot.slane %v6941_v54, 1 }
 0x537   : > { %9345 = vmatmul.mubr.msk.f32.gmra.mrb[24].mxu1 %vm426_vm2, %v11750_v5  ;;  %v12165_v5 = vld [vmem:[%s12569_s4] ss:$0 sm:$0xff]  ;;  %v12237_v39 = vsel %vm345_vm1, %v7045_v20, %v7047_v37  ;;  %v12249_v31 = vsel %vm345_vm1, %v7044_v57, %v7045_v20 }
 0x538   : > { %9347 = vmatprep.mubr.msk.f32.mxu1 %vm426_vm2, %v12875_v0  ;;  %v7049_v0 = vrot.slane %v6943_v17, 1 }
 0x53a   : > { %v12257_v54 = vsel %vm345_vm1, %v7049_v0, %v7050_v12  ;;  %v6952_v0 = vld [vmem:[%s10068_s27 + $0xd8] sm:$0xff] }
 0x53b   : > { %9348 = vmatmul.mubr.msk.f32.gmra.mrb[26].mxu1 %vm426_vm2, %v11758_v9  ;;  %v7027_v9 = vrot.slane %v6930_v36, 1 }
 0x53c   : > { %9350 = vmatprep.mubr.msk.f32.mxu1 %vm426_vm2, %v11974_v7  ;;  %v6939_v7 = vld [vmem:[%s10068_s27 + $0x70] sm:$0x3] }
 0x53d   : > { %v7042_v18 = vrot.slane %v6939_v7, 1  ;;  %v12198_v35 = vsel %vm345_vm1, %v7025_v34, %v7027_v9  ;;  %v7055_v9 = vrot.slane %v6947_v21, 1  ;;  %v6954_v21 = vld [vmem:[%s10068_s27 + $0xe8] sm:$0x3] }
 0x53f   : > { %9351 = vmatmul.mubr.msk.f32.gmra.mrb[28].mxu1 %vm426_vm2, %v11978_v10  ;;  %v12231_v36 = vsel %vm345_vm1, %v7040_v27, %v7042_v18  ;;  %v12266_v27 = vld [vmem:[%s10068_s27 + $0xe0] sm:$0xff] }
 0x540   : > { %9353 = vmatprep.mubr.msk.f32.mxu1 %vm426_vm2, %v6371_v63  ;;  %v6946_v63 = vld [vmem:[%s10068_s27 + $0xa8] sm:$0xff] }
 0x541   : > { %v7054_v16 = vrot.slane %v6946_v63, 1 }
 0x543   : > { %9354 = vmatmul.mubr.msk.f32.gmra.mrb[30].mxu1 %vm426_vm2, %v6372_v2  ;;  %v12273_v42 = vsel %vm345_vm1, %v7054_v16, %v7055_v9 }
 0x5da   : > { %v9310_v58 = vpop.f32.mrb[0].mxu1 }
 0x5db   : > { %v12175_v61 = vadd.f32 %v9310_v58, %v12165_v5  ;;  %v6538_v62 = vpop.f32.mrb[1].mxu1  ;;  %v6951_v58 = vld [vmem:[%s10068_s27 + $0xd0] sm:$0x3] }
 0x5dc   : > { %v12178_v11 = vadd.f32 %v12165_v5, %v6538_v62  ;;  %v7057_v62 = vrot.slane %v6948_v38, 1  ;;  %v7062_v40 = vrot.slane %v6951_v58, 1  ;;  %v7065_v38 = vrot.slane %v12266_v27, 1 }
 0x5dd   : > { %v6769_v51 = vmul.f32 0.5, %v12175_v61 }
 0x5de   : > { %v6768_v59 = vmul.f32 0.5, %v12178_v11  ;;  %v9313_v10 = vpop.f32.mrb[2].mxu1  ;;  %v12263_v8 = vsel %vm345_vm1, %v7055_v9, %v7057_v62 }
 0x5df   : > { %9942 = vtanh.f32 %v6769_v51  ;;  %v12190_v6 = vadd.f32 %v9313_v10, %v12165_v5  ;;  %v6548_v52 = vpop.f32.mrb[3].mxu1  ;;  %v7060_v51 = vrot.slane %v6950_v56, 1 }
 0x5e0   : > { %9944 = vtanh.f32 %v6768_v59  ;;  %v12193_v22 = vadd.f32 %v12165_v5, %v6548_v52 }
 0x5e1   : > { %v6771_v19 = vmul.f32 0.5, %v12190_v6 }
 0x5e2   : > { %v6770_v33 = vmul.f32 0.5, %v12193_v22  ;;  %v9316_v49 = vpop.f32.mrb[4].mxu1 }
 0x5e3   : > { %9946 = vtanh.f32 %v6771_v19  ;;  %v12214_v4 = vadd.f32 %v9316_v49, %v12165_v5  ;;  %v6558_v55 = vpop.f32.mrb[5].mxu1  ;;  %v12280_v49 = vsel %vm345_vm1, %v7059_v48, %v7060_v51 }
 0x5e4   : > { %9948 = vtanh.f32 %v6770_v33  ;;  %v12220_v29 = vadd.f32 %v12165_v5, %v6558_v55  ;;  %v12277_v33 = vsel %vm345_vm1, %v7060_v51, %v7062_v40 }
 0x5e5   : > { %v6773_v43 = vmul.f32 0.5, %v12214_v4 }
 0x5e6   : > { %v6772_v2 = vmul.f32 0.5, %v12220_v29  ;;  %v9319_v15 = vpop.f32.mrb[6].mxu1 }
 0x5e7   : > { %9950 = vtanh.f32 %v6773_v43  ;;  %v12243_v25 = vadd.f32 %v9319_v15, %v12165_v5  ;;  %v6568_v34 = vpop.f32.mrb[7].mxu1 }
 0x5e8   : > { %9952 = vtanh.f32 %v6772_v2  ;;  %v12246_v13 = vadd.f32 %v12165_v5, %v6568_v34  ;;  %v7067_v34 = vrot.slane %v6954_v21, 1 }
 0x5e9   : > { %v9943_v53 = vpop.eup %9942  ;;  %v6775_v46 = vmul.f32 0.5, %v12243_v25 }
 0x5ea   : > { %v9945_v28 = vpop.eup %9944  ;;  %v6833_v7 = vmul.f32 0.5, %v9943_v53  ;;  %v6774_v59 = vmul.f32 0.5, %v12246_v13  ;;  %v9322_v10 = vpop.f32.mrb[8].mxu1 }
 0x5eb   : > { %v6832_v3 = vmul.f32 0.5, %v9945_v28  ;;  %9954 = vtanh.f32 %v6775_v46  ;;  %v12260_v52 = vadd.f32 %v9322_v10, %v12165_v5  ;;  %v6578_v24 = vpop.f32.mrb[9].mxu1  ;;  %v7064_v46 = vrot.slane %v6952_v0, 1 }
 0x5ec   : > { %v6865_v18 = vadd.f32 0.5, %v6833_v7  ;;  %9956 = vtanh.f32 %v6774_v59  ;;  %v12270_v19 = vadd.f32 %v12165_v5, %v6578_v24  ;;  %v12319_v24 = vsel %vm345_vm1, %v7065_v38, %v7067_v34 }
 0x5ed   : > { %v9947_v20 = vpop.eup %9946  ;;  %v6864_v37 = vadd.f32 0.5, %v6832_v3  ;;  %v6777_v1 = vmul.f32 0.5, %v12260_v52 }
 0x5ee   : > { %v9949_v50 = vpop.eup %9948  ;;  %v6897_v30 = vmul.f32 %v6865_v18, %v12175_v61  ;;  %v6835_v17 = vmul.f32 0.5, %v9947_v20  ;;  %v6776_v55 = vmul.f32 0.5, %v12270_v19  ;;  %v9325_v57 = vpop.f32.mrb[10].mxu1 }
 0x5ef   : > { %v6896_v43 = vmul.f32 %v6864_v37, %v12178_v11  ;;  %v6834_v12 = vmul.f32 0.5, %v9949_v50  ;;  %9958 = vtanh.f32 %v6777_v1  ;;  %v12293_v47 = vadd.f32 %v9325_v57, %v12165_v5  ;;  %v6588_v61 = vpop.f32.mrb[11].mxu1 }
 0x5f0   : > { %v7137_v63 = vadd.f32 %v12198_v35, %v6897_v30  ;;  %v6867_v2 = vadd.f32 0.5, %v6835_v17  ;;  %9960 = vtanh.f32 %v6776_v55  ;;  %v12298_v15 = vadd.f32 %v12165_v5, %v6588_v61  ;;  %v6957_v55 = vld [vmem:[%s10068_s27 + $0x100] sm:$0x3] }
 0x5f1   : > { %v9951_v56 = vpop.eup %9950  ;;  %v7136_v58 = vadd.f32 %v12201_v23, %v6896_v43  ;;  %v6866_v11 = vadd.f32 0.5, %v6834_v12  ;;  %v6779_v26 = vmul.f32 0.5, %v12293_v47  ;;  %v12326_v1 = vsel %vm345_vm1, %v7064_v46, %v7065_v38 }
 0x5f2   : > { %v9953_v9 = vpop.eup %9952  ;;  %7169 = vst.msk [vmem:[%s12289_s21 + $0x8] sm:$0xff] %vm426_vm2, %v7137_v63  ;;  %v6899_v62 = vmul.f32 %v6867_v2, %v12190_v6  ;;  %v6837_v16 = vmul.f32 0.5, %v9951_v56  ;;  %v6778_v35 = vmul.f32 0.5, %v12298_v15  ;;  %v9328_v53 = vpop.f32.mrb[12].mxu1 }
 0x5f3   : > { %7168 = vst.msk [vmem:[%s12289_s21] sm:$0xff] %vm426_vm2, %v7136_v58  ;;  %v6898_v51 = vmul.f32 %v6866_v11, %v12193_v22  ;;  %v6836_v23 = vmul.f32 0.5, %v9953_v9  ;;  %9962 = vtanh.f32 %v6779_v26  ;;  %v12310_v40 = vadd.f32 %v9328_v53, %v12165_v5  ;;  %v6598_v48 = vpop.f32.mrb[13].mxu1  ;;  %v6955_v26 = vld [vmem:[%s10068_s27 + $0xf0] sm:$0xff] }
 0x5f4   : > { %v7139_v28 = vadd.f32 %v12204_v32, %v6899_v62  ;;  %v6869_v6 = vadd.f32 0.5, %v6837_v16  ;;  %9964 = vtanh.f32 %v6778_v35  ;;  %v12314_v7 = vadd.f32 %v12165_v5, %v6598_v48 }
 0x5f5   : > { %v9955_v59 = vpop.eup %9954  ;;  %v7138_v10 = vadd.f32 %v12211_v41, %v6898_v51  ;;  %v6868_v3 = vadd.f32 0.5, %v6836_v23  ;;  %v6781_v22 = vmul.f32 0.5, %v12310_v40  ;;  %v12329_v41 = vld [vmem:[%s10068_s27 + $0xf8] sm:$0xff]  ;;  %v7072_v11 = vrot.slane %v6957_v55, 1 }
 0x5f6   : > { %v9957_v27 = vpop.eup %9956  ;;  %7171 = vst.msk [vmem:[%s12289_s21 + $0x18] sm:$0xff] %vm426_vm2, %v7139_v28  ;;  %v6901_v32 = vmul.f32 %v6869_v6, %v12214_v4  ;;  %v6839_v18 = vmul.f32 0.5, %v9955_v59  ;;  %v6780_v20 = vmul.f32 0.5, %v12314_v7  ;;  %v9331_v37 = vpop.f32.mrb[14].mxu1  ;;  %v7070_v0 = vrot.slane %v12329_v41, 1 }
 0x5f7   : > { %7170 = vst.msk [vmem:[%s12289_s21 + $0x10] sm:$0xff] %vm426_vm2, %v7138_v10  ;;  %v6900_v50 = vmul.f32 %v6868_v3, %v12220_v29  ;;  %v6838_v30 = vmul.f32 0.5, %v9957_v27  ;;  %9966 = vtanh.f32 %v6781_v22  ;;  %v12335_v17 = vadd.f32 %v9331_v37, %v12165_v5  ;;  %v6608_v4 = vpop.f32.mrb[15].mxu1 }
 0x5f8   : > { %v7141_v57 = vadd.f32 %v12217_v60, %v6901_v32  ;;  %v6871_v21 = vadd.f32 0.5, %v6839_v18  ;;  %9968 = vtanh.f32 %v6780_v20  ;;  %v12340_v38 = vadd.f32 %v12165_v5, %v6608_v4  ;;  %v6959_v32 = vld [vmem:[%s10068_s27 + $0x110] sm:$0xff] }
 0x5f9   : > { %v9959_v43 = vpop.eup %9958  ;;  %v7140_v29 = vadd.f32 %v12223_v45, %v6900_v50  ;;  %v6870_v12 = vadd.f32 0.5, %v6838_v30  ;;  %v6783_v61 = vmul.f32 0.5, %v12335_v17  ;;  %v7069_v23 = vrot.slane %v6955_v26, 1 }
 0x5fa   : > { %v9961_v63 = vpop.eup %9960  ;;  %7173 = vst.msk [vmem:[%s12289_s21 + $0x28] sm:$0xff] %vm426_vm2, %v7141_v57  ;;  %v6903_v60 = vmul.f32 %v6871_v21, %v12243_v25  ;;  %v6841_v2 = vmul.f32 0.5, %v9959_v43  ;;  %v6782_v56 = vmul.f32 0.5, %v12340_v38  ;;  %v9334_v58 = vpop.f32.mrb[16].mxu1  ;;  %v12367_v10 = vsel %vm345_vm1, %v7070_v0, %v7072_v11  ;;  %v6960_v43 = vld [vmem:[%s10068_s27 + $0x118] sm:$0x3] }
 0x5fb   : > { %7172 = vst.msk [vmem:[%s12289_s21 + $0x20] sm:$0xff] %vm426_vm2, %v7140_v29  ;;  %v6902_v45 = vmul.f32 %v6870_v12, %v12246_v13  ;;  %v6840_v34 = vmul.f32 0.5, %v9961_v63  ;;  %9970 = vtanh.f32 %v6783_v61  ;;  %v12354_v9 = vadd.f32 %v9334_v58, %v12165_v5  ;;  %v6618_v62 = vpop.f32.mrb[17].mxu1  ;;  %v6958_v63 = vld [vmem:[%s10068_s27 + $0x108] sm:$0xff] }
 0x5fc   : > { %v7143_v16 = vadd.f32 %v12231_v36, %v6903_v60  ;;  %v6873_v25 = vadd.f32 0.5, %v6841_v2  ;;  %9972 = vtanh.f32 %v6782_v56  ;;  %v12358_v35 = vadd.f32 %v12165_v5, %v6618_v62 }
 0x5fd   : > { %v9963_v53 = vpop.eup %9962  ;;  %v7142_v46 = vadd.f32 %v12234_v44, %v6902_v45  ;;  %v6872_v51 = vadd.f32 0.5, %v6840_v34  ;;  %v6785_v13 = vmul.f32 0.5, %v12354_v9  ;;  %v12383_v30 = vsel %vm345_vm1, %v7069_v23, %v7070_v0 }
 0x5fe   : > { %v9965_v48 = vpop.eup %9964  ;;  %7175 = vst.msk [vmem:[%s12289_s21 + $0x38] sm:$0xff] %vm426_vm2, %v7143_v16  ;;  %v6905_v28 = vmul.f32 %v6873_v25, %v12260_v52  ;;  %v6843_v36 = vmul.f32 0.5, %v9963_v53  ;;  %v6784_v6 = vmul.f32 0.5, %v12358_v35  ;;  %v9337_v59 = vpop.f32.mrb[18].mxu1  ;;  %v7075_v29 = vrot.slane %v6959_v32, 1 }
 0x5ff   : > { %7174 = vst.msk [vmem:[%s12289_s21 + $0x30] sm:$0xff] %vm426_vm2, %v7142_v46  ;;  %v6904_v44 = vmul.f32 %v6872_v51, %v12270_v19  ;;  %v6842_v3 = vmul.f32 0.5, %v9965_v48  ;;  %9974 = vtanh.f32 %v6785_v13  ;;  %v12373_v22 = vadd.f32 %v9337_v59, %v12165_v5  ;;  %v6628_v27 = vpop.f32.mrb[19].mxu1 }
 0x600   : > { %v7145_v52 = vadd.f32 %v12237_v39, %v6905_v28  ;;  %v6875_v18 = vadd.f32 0.5, %v6843_v36  ;;  %9976 = vtanh.f32 %v6784_v6  ;;  %v12378_v20 = vadd.f32 %v12165_v5, %v6628_v27  ;;  %v12429_v27 = vld [vmem:[%s10068_s27 + $0x128] sm:$0xff] }
 0x601   : > { %v9967_v37 = vpop.eup %9966  ;;  %v7144_v19 = vadd.f32 %v12249_v31, %v6904_v44  ;;  %v6874_v41 = vadd.f32 0.5, %v6842_v3  ;;  %v6787_v50 = vmul.f32 0.5, %v12373_v22  ;;  %v7077_v26 = vrot.slane %v6960_v43, 1 }
 0x602   : > { %v9969_v4 = vpop.eup %9968  ;;  %7177 = vst.msk [vmem:[%s12289_s21 + $0x48] sm:$0xff] %vm426_vm2, %v7145_v52  ;;  %v6907_v39 = vmul.f32 %v6875_v18, %v12293_v47  ;;  %v6845_v55 = vmul.f32 0.5, %v9967_v37  ;;  %v6786_v57 = vmul.f32 0.5, %v12378_v20  ;;  %v9340_v21 = vpop.f32.mrb[20].mxu1  ;;  %v7074_v16 = vrot.slane %v6958_v63, 1 }
 0x603   : > { %7176 = vst.msk [vmem:[%s12289_s21 + $0x40] sm:$0xff] %vm426_vm2, %v7144_v19  ;;  %v6906_v31 = vmul.f32 %v6874_v41, %v12298_v15  ;;  %v6844_v12 = vmul.f32 0.5, %v9969_v4  ;;  %9978 = vtanh.f32 %v6787_v50  ;;  %v12394_v61 = vadd.f32 %v9340_v21, %v12165_v5  ;;  %v6638_v0 = vpop.f32.mrb[21].mxu1  ;;  %v6963_v37 = vld [vmem:[%s10068_s27 + $0x130] sm:$0x3] }
 0x604   : > { %v7147_v47 = vadd.f32 %v12254_v14, %v6907_v39  ;;  %v6877_v60 = vadd.f32 0.5, %v6845_v55  ;;  %9980 = vtanh.f32 %v6786_v57  ;;  %v12399_v2 = vadd.f32 %v12165_v5, %v6638_v0 }
 0x605   : > { %v9971_v56 = vpop.eup %9970  ;;  %v7146_v58 = vadd.f32 %v12257_v54, %v6906_v31  ;;  %v6876_v15 = vadd.f32 0.5, %v6844_v12  ;;  %v6789_v11 = vmul.f32 0.5, %v12394_v61  ;;  %v12419_v36 = vsel %vm345_vm1, %v7075_v29, %v7077_v26  ;;  %v12450_v12 = vld [vmem:[%s10068_s27 + $0x120] sm:$0xff] }
 0x606   : > { %v9973_v45 = vpop.eup %9972  ;;  %7179 = vst.msk [vmem:[%s12289_s21 + $0x58] sm:$0xff] %vm426_vm2, %v7147_v47  ;;  %v6909_v34 = vmul.f32 %v6877_v60, %v12310_v40  ;;  %v6847_v62 = vmul.f32 0.5, %v9971_v56  ;;  %v6788_v14 = vmul.f32 0.5, %v12399_v2  ;;  %v9343_v25 = vpop.f32.mrb[22].mxu1  ;;  %v12426_v3 = vsel %vm345_vm1, %v7074_v16, %v7075_v29 }
 0x607   : > { %7178 = vst.msk [vmem:[%s12289_s21 + $0x50] sm:$0xff] %vm426_vm2, %v7146_v58  ;;  %v6908_v53 = vmul.f32 %v6876_v15, %v12314_v7  ;;  %v6846_v54 = vmul.f32 0.5, %v9973_v45  ;;  %9982 = vtanh.f32 %v6789_v11  ;;  %v12411_v46 = vadd.f32 %v9343_v25, %v12165_v5  ;;  %v6648_v51 = vpop.f32.mrb[23].mxu1  ;;  %v12473_v25 = vld [vmem:[%s10068_s27 + $0x140] sm:$0xff] }
 0x608   : > { %v7149_v13 = vadd.f32 %v12263_v8, %v6909_v34  ;;  %v6879_v40 = vadd.f32 0.5, %v6847_v62  ;;  %9984 = vtanh.f32 %v6788_v14  ;;  %v12415_v23 = vadd.f32 %v12165_v5, %v6648_v51 }
 0x609   : > { %v9975_v48 = vpop.eup %9974  ;;  %v7148_v28 = vadd.f32 %v12273_v42, %v6908_v53  ;;  %v6878_v7 = vadd.f32 0.5, %v6846_v54  ;;  %v6791_v6 = vmul.f32 0.5, %v12411_v46  ;;  %v7080_v57 = vrot.slane %v12429_v27, 1 }
 0x60a   : > { %v9977_v59 = vpop.eup %9976  ;;  %7181 = vst.msk [vmem:[%s12289_s21 + $0x68] sm:$0xff] %vm426_vm2, %v7149_v13  ;;  %v6911_v8 = vmul.f32 %v6879_v40, %v12335_v17  ;;  %v6849_v44 = vmul.f32 0.5, %v9975_v48  ;;  %v6790_v42 = vmul.f32 0.5, %v12415_v23  ;;  %v9346_v32 = vpop.f32.mrb[24].mxu1  ;;  %v7082_v31 = vrot.slane %v6963_v37, 1 }
 0x60b   : > { %7180 = vst.msk [vmem:[%s12289_s21 + $0x60] sm:$0xff] %vm426_vm2, %v7148_v28  ;;  %v6910_v52 = vmul.f32 %v6878_v7, %v12340_v38  ;;  %v6848_v18 = vmul.f32 0.5, %v9977_v59  ;;  %9986 = vtanh.f32 %v6791_v6  ;;  %v12437_v19 = vadd.f32 %v9346_v32, %v12165_v5  ;;  %v6658_v17 = vpop.f32.mrb[25].mxu1  ;;  %v6966_v13 = vld [vmem:[%s10068_s27 + $0x148] sm:$0x3] }
 0x60c   : > { %v7151_v41 = vadd.f32 %v12277_v33, %v6911_v8  ;;  %v6881_v50 = vadd.f32 0.5, %v6849_v44  ;;  %9988 = vtanh.f32 %v6790_v42  ;;  %v12441_v4 = vadd.f32 %v12165_v5, %v6658_v17 }
 0x60d   : > { %v9979_v39 = vpop.eup %9978  ;;  %v7150_v38 = vadd.f32 %v12280_v49, %v6910_v52  ;;  %v6880_v55 = vadd.f32 0.5, %v6848_v18  ;;  %v6793_v21 = vmul.f32 0.5, %v12437_v19  ;;  %v7079_v45 = vrot.slane %v12450_v12, 1 }
 0x60e   : > { %v9981_v43 = vpop.eup %9980  ;;  %7183 = vst.msk [vmem:[%s12289_s21 + $0x78] sm:$0xff] %vm426_vm2, %v7151_v41  ;;  %v6913_v29 = vmul.f32 %v6881_v50, %v12354_v9  ;;  %v6851_v33 = vmul.f32 0.5, %v9979_v39  ;;  %v6792_v0 = vmul.f32 0.5, %v12441_v4  ;;  %v9349_v63 = vpop.f32.mrb[26].mxu1  ;;  %v7083_v16 = vsel %vm345_vm1, %v7080_v57, %v7082_v31  ;;  %v6964_v41 = vld [vmem:[%s10068_s27 + $0x138] sm:$0xff] }
 0x60f   : > { %7182 = vst.msk [vmem:[%s12289_s21 + $0x70] sm:$0xff] %vm426_vm2, %v7150_v38  ;;  %v6912_v49 = vmul.f32 %v6880_v55, %v12358_v35  ;;  %v6850_v47 = vmul.f32 0.5, %v9981_v43  ;;  %9990 = vtanh.f32 %v6793_v21  ;;  %v12457_v60 = vadd.f32 %v9349_v63, %v12165_v5  ;;  %v6668_v56 = vpop.f32.mrb[27].mxu1  ;;  %v6969_v63 = vld [vmem:[%s10068_s27 + $0x160] sm:$0x3] }
 0x610   : > { %v7153_v9 = vadd.f32 %v12319_v24, %v6913_v29  ;;  %v6883_v58 = vadd.f32 0.5, %v6851_v33  ;;  %9992 = vtanh.f32 %v6792_v0  ;;  %v12461_v15 = vadd.f32 %v12165_v5, %v6668_v56 }
 0x611   : > { %v9983_v11 = vpop.eup %9982  ;;  %v7152_v26 = vadd.f32 %v12326_v1, %v6912_v49  ;;  %v6882_v35 = vadd.f32 0.5, %v6850_v47  ;;  %v6795_v34 = vmul.f32 0.5, %v12457_v60  ;;  %v7085_v8 = vrot.slane %v12473_v25, 1 }
 0x612   : > { %v9985_v62 = vpop.eup %9984  ;;  %7185 = vst.msk [vmem:[%s12289_s21 + $0x88] sm:$0xff] %vm426_vm2, %v7153_v9  ;;  %v6915_v24 = vmul.f32 %v6883_v58, %v12373_v22  ;;  %v6853_v14 = vmul.f32 0.5, %v9983_v11  ;;  %v6794_v53 = vmul.f32 0.5, %v12461_v15  ;;  %v9352_v1 = vpop.f32.mrb[28].mxu1  ;;  %v7087_v52 = vrot.slane %v6966_v13, 1 }
 0x613   : > { %7184 = vst.msk [vmem:[%s12289_s21 + $0x80] sm:$0xff] %vm426_vm2, %v7152_v26  ;;  %v6914_v54 = vmul.f32 %v6882_v35, %v12378_v20  ;;  %v6852_v51 = vmul.f32 0.5, %v9985_v62  ;;  %9994 = vtanh.f32 %v6795_v34  ;;  %v12481_v22 = vadd.f32 %v9352_v1, %v12165_v5  ;;  %v6678_v40 = vpop.f32.mrb[29].mxu1  ;;  %v6972_v34 = vld [vmem:[%s10068_s27 + $0x178] sm:$0x3]  ;;  %v6970_v1 = vld [vmem:[%s10068_s27 + $0x168] sm:$0xff] }
 0x614   : > { %v7155_v48 = vadd.f32 %v12367_v10, %v6915_v24  ;;  %v6885_v28 = vadd.f32 0.5, %v6853_v14  ;;  %9996 = vtanh.f32 %v6794_v53  ;;  %v12485_v7 = vadd.f32 %v12165_v5, %v6678_v40 }
 0x615   : > { %v9987_v6 = vpop.eup %9986  ;;  %v7154_v20 = vadd.f32 %v12383_v30, %v6914_v54  ;;  %v6884_v59 = vadd.f32 0.5, %v6852_v51  ;;  %v6797_v44 = vmul.f32 0.5, %v12481_v22  ;;  %v7081_v29 = vsel %vm345_vm1, %v7079_v45, %v7080_v57  ;;  %v6967_v57 = vld [vmem:[%s10068_s27 + $0x150] sm:$0xff] }
 0x616   : > { %v9989_v42 = vpop.eup %9988  ;;  %7187 = vst.msk [vmem:[%s12289_s21 + $0x98] sm:$0xff] %vm426_vm2, %v7155_v48  ;;  %v6917_v10 = vmul.f32 %v6885_v28, %v12394_v61  ;;  %v6855_v32 = vmul.f32 0.5, %v9987_v6  ;;  %v6796_v18 = vmul.f32 0.5, %v12485_v7  ;;  %v9355_v37 = vpop.f32.mrb[30].mxu1  ;;  %v7084_v0 = vrot.slane %v6964_v41, 1  ;;  %v6971_v45 = vld [vmem:[%s10068_s27 + $0x170] sm:$0xff] }
 0x617   : > { %7186 = vst.msk [vmem:[%s12289_s21 + $0x90] sm:$0xff] %vm426_vm2, %v7154_v20  ;;  %v6916_v17 = vmul.f32 %v6884_v59, %v12399_v2  ;;  %v6854_v30 = vmul.f32 0.5, %v9989_v42  ;;  %9998 = vtanh.f32 %v6797_v44  ;;  %v12499_v50 = vadd.f32 %v9355_v37, %v12165_v5  ;;  %v6688_v39 = vpop.f32.mrb[31].mxu1  ;;  %v6974_v42 = vld [vmem:[%s10068_s27 + $0x188] sm:$0xff] }
 0x618   : > { %v7157_v61 = vadd.f32 %v12419_v36, %v6917_v10  ;;  %v6887_v38 = vadd.f32 0.5, %v6855_v32  ;;  %10000 = vtanh.f32 %v6796_v18  ;;  %v12503_v55 = vadd.f32 %v12165_v5, %v6688_v39  ;;  %v6968_v5 = vld [vmem:[%s10068_s27 + $0x158] sm:$0xff]  ;;  %v6975_v10 = vld [vmem:[%s10068_s27 + $0x190] sm:$0x3]  ;;  %v6973_v18 = vld [vmem:[%s10068_s27 + $0x180] sm:$0xff] }
 0x619   : > { %v9991_v21 = vpop.eup %9990  ;;  %v7156_v2 = vadd.f32 %v12426_v3, %v6916_v17  ;;  %v6886_v43 = vadd.f32 0.5, %v6854_v30  ;;  %v6799_v33 = vmul.f32 0.5, %v12499_v50  ;;  %v7090_v26 = vrot.slane %v6968_v5, 1 }
 0x61a   : > { %v9993_v31 = vpop.eup %9992  ;;  %7189 = vst.msk [vmem:[%s12289_s21 + $0xa8] sm:$0xff] %vm426_vm2, %v7157_v61  ;;  %v6919_v36 = vmul.f32 %v6887_v38, %v12411_v46  ;;  %v6857_v12 = vmul.f32 0.5, %v9991_v21  ;;  %v6798_v49 = vmul.f32 0.5, %v12503_v55  ;;  %v7088_v46 = vsel %vm345_vm1, %v7085_v8, %v7087_v52 }
 0x61b   : > { %7188 = vst.msk [vmem:[%s12289_s21 + $0xa0] sm:$0xff] %vm426_vm2, %v7156_v2  ;;  %v6918_v3 = vmul.f32 %v6886_v43, %v12415_v23  ;;  %v6856_v27 = vmul.f32 0.5, %v9993_v31  ;;  %10002 = vtanh.f32 %v6799_v33  ;;  %v7092_v35 = vrot.slane %v6969_v63, 1 }
 0x61c   : > { %v7159_v47 = vadd.f32 %v7083_v16, %v6919_v36  ;;  %v6889_v56 = vadd.f32 0.5, %v6857_v12  ;;  %10004 = vtanh.f32 %v6798_v49  ;;  %v7086_v24 = vsel %vm345_vm1, %v7084_v0, %v7085_v8 }
 0x61d   : > { %v9995_v9 = vpop.eup %9994  ;;  %v7158_v58 = vadd.f32 %v7081_v29, %v6918_v3  ;;  %v6888_v11 = vadd.f32 0.5, %v6856_v27  ;;  %v7089_v16 = vrot.slane %v6967_v57, 1  ;;  %v7095_v13 = vrot.slane %v6971_v45, 1 }
 0x61e   : > { %v9997_v62 = vpop.eup %9996  ;;  %7191 = vst.msk [vmem:[%s12289_s21 + $0xb8] sm:$0xff] %vm426_vm2, %v7159_v47  ;;  %v6921_v23 = vmul.f32 %v6889_v56, %v12437_v19  ;;  %v6859_v14 = vmul.f32 0.5, %v9995_v9  ;;  %v7097_v40 = vrot.slane %v6972_v34, 1  ;;  %v7093_v28 = vsel %vm345_vm1, %v7090_v26, %v7092_v35 }
 0x61f   : > { %7190 = vst.msk [vmem:[%s12289_s21 + $0xb0] sm:$0xff] %vm426_vm2, %v7158_v58  ;;  %v6920_v25 = vmul.f32 %v6888_v11, %v12441_v4  ;;  %v6858_v53 = vmul.f32 0.5, %v9997_v62  ;;  %v7091_v59 = vsel %vm345_vm1, %v7089_v16, %v7090_v26  ;;  %v7094_v44 = vrot.slane %v6970_v1, 1 }
 0x620   : > { %v7161_v54 = vadd.f32 %v7088_v46, %v6921_v23  ;;  %v6891_v51 = vadd.f32 0.5, %v6859_v14  ;;  %v7098_v30 = vsel %vm345_vm1, %v7095_v13, %v7097_v40  ;;  %v7100_v61 = vrot.slane %v6974_v42, 1 }
 0x621   : > { %v9999_v19 = vpop.eup %9998  ;;  %v7160_v48 = vadd.f32 %v7086_v24, %v6920_v25  ;;  %v6890_v6 = vadd.f32 0.5, %v6858_v53  ;;  %v7102_v38 = vrot.slane %v6975_v10, 1  ;;  %v7099_v29 = vrot.slane %v6973_v18, 1 }
 0x622   : > { %v10001_v20 = vpop.eup %10000  ;;  %7193 = vst.msk [vmem:[%s12289_s21 + $0xc8] sm:$0xff] %vm426_vm2, %v7161_v54  ;;  %v6923_v4 = vmul.f32 %v6891_v51, %v12457_v60  ;;  %v6861_v8 = vmul.f32 0.5, %v9999_v19 }
 0x623   : > { %7192 = vst.msk [vmem:[%s12289_s21 + $0xc0] sm:$0xff] %vm426_vm2, %v7160_v48  ;;  %v6922_v32 = vmul.f32 %v6890_v6, %v12461_v15  ;;  %v6860_v52 = vmul.f32 0.5, %v10001_v20  ;;  %v7096_v15 = vsel %vm345_vm1, %v7094_v44, %v7095_v13  ;;  %v7103_v5 = vsel %vm345_vm1, %v7100_v61, %v7102_v38 }
 0x624   : > { %v7163_v37 = vadd.f32 %v7093_v28, %v6923_v4  ;;  %v6893_v17 = vadd.f32 0.5, %v6861_v8  ;;  %v7101_v49 = vsel %vm345_vm1, %v7099_v29, %v7100_v61 }
 0x625   : > { %v10003_v41 = vpop.eup %10002  ;;  %v7162_v60 = vadd.f32 %v7091_v59, %v6922_v32  ;;  %v6892_v39 = vadd.f32 0.5, %v6860_v52 }
 0x626   : > { %v10005_v21 = vpop.eup %10004  ;;  %7195 = vst.msk [vmem:[%s12289_s21 + $0xd8] sm:$0xff] %vm426_vm2, %v7163_v37  ;;  %v6925_v2 = vmul.f32 %v6893_v17, %v12481_v22  ;;  %v6863_v43 = vmul.f32 0.5, %v10003_v41 }
 0x627   : > { %7194 = vst.msk [vmem:[%s12289_s21 + $0xd0] sm:$0xff] %vm426_vm2, %v7162_v60  ;;  %v6924_v33 = vmul.f32 %v6892_v39, %v12485_v7  ;;  %v6862_v31 = vmul.f32 0.5, %v10005_v21 }
 0x628   : > { %v7165_v36 = vadd.f32 %v7098_v30, %v6925_v2  ;;  %v6895_v12 = vadd.f32 0.5, %v6863_v43 }
 0x629   : > { %v7164_v0 = vadd.f32 %v7096_v15, %v6924_v33  ;;  %v6894_v63 = vadd.f32 0.5, %v6862_v31 }
 0x62a   : > { %7197 = vst.msk [vmem:[%s12289_s21 + $0xe8] sm:$0xff] %vm426_vm2, %v7165_v36  ;;  %v6927_v22 = vmul.f32 %v6895_v12, %v12499_v50 }
 0x62b   : > { %7196 = vst.msk [vmem:[%s12289_s21 + $0xe0] sm:$0xff] %vm426_vm2, %v7164_v0  ;;  %v6926_v3 = vmul.f32 %v6894_v63, %v12503_v55 }
 0x62c   : > { %v7167_v27 = vadd.f32 %v7103_v5, %v6927_v22 }
 0x62d   : > { %v7166_v57 = vadd.f32 %v7101_v49, %v6926_v3 }
 0x62e   : > { %7199 = vst.msk [vmem:[%s12289_s21 + $0xf8] sm:$0xff] %vm426_vm2, %v7167_v27 }
 0x62f   : > { %7198 = vst.msk [vmem:[%s12289_s21 + $0xf0] sm:$0xff] %vm426_vm2, %v7166_v57 }
 0x630 PF: > { %s15_s18 = sadd.s32 1, %s10012_s18  }
 0x631   : > { %p12_p4 = scmp.ge.s32.totalorder %s15_s18, 4  }
 0x633   :  { %14 = sbr.rel (!%p12_p4) target bundleno = 1 (0x1), region = 73 }

</bundles_post_ra>
